<compile_context>
chip_gen: v7x
topology: tpu7x:2x2x1
jax: 0.10.0
libtpu: 0.0.40
codegen_flags: <defaults>
</compile_context>

<pallas_src>
import jax
import jax.numpy as jnp
from jax.experimental import pallas as pl
from jax.experimental.pallas import tpu as pltpu


# -----------------------------------------------------------------------------
# Net.forward : x -> (features, outputs)
# -----------------------------------------------------------------------------
def net_forward_kernel(x_ref,
                       w1_ref, b1_ref, a1_ref,
                       w2_ref, b2_ref, a2_ref,
                       w3_ref, b3_ref, a3_ref,
                       w4_ref, b4_ref, a4_ref,
                       w5_ref, b5_ref,
                       w6_ref, b6_ref,
                       feat_ref, out_ref):
    def dense(h, w_ref, b_ref):
        return jnp.dot(h, w_ref[...], preferred_element_type=jnp.float32) + b_ref[...]

    def prelu(h, a_ref):
        a = a_ref[...]                          # (1, 1) learnable slope, VPU broadcast
        return jnp.where(h >= 0.0, h, h * a)

    h = x_ref[...]                                        # (TB, 784) f32
    h = prelu(dense(h, w1_ref, b1_ref), a1_ref)           # (TB, 512)
    h = prelu(dense(h, w2_ref, b2_ref), a2_ref)           # (TB, 256)
    h = prelu(dense(h, w3_ref, b3_ref), a3_ref)           # (TB, 128)
    h = prelu(dense(h, w4_ref, b4_ref), a4_ref)           # (TB, 64)
    feat = dense(h, w5_ref, b5_ref)                       # (TB, 2)  features
    feat_ref[...] = feat
    out_ref[...] = dense(feat, w6_ref, b6_ref)            # (TB, 10) logits


def net_forward(x, Ws, bs, alphas, *, tb=128):
    """Pallas Net.forward.

    x      : (B, 784) f32
    Ws[i]  : (in_i, out_i) f32   (already transposed vs. torch's (out, in))
    bs[i]  : (1, out_i)  f32
    alphas : 4x (1, 1)   f32     (PReLU slopes)
    Returns (features (B, 2), outputs (B, 10)).
    """
    B, d_in = x.shape
    tb = min(tb, B)
    assert B % tb == 0 and tb % 8 == 0, (B, tb)

    flat_params = []
    for li in range(4):
        flat_params += [Ws[li], bs[li], alphas[li]]
    flat_params += [Ws[4], bs[4], Ws[5], bs[5]]

    feat_dim = Ws[4].shape[1]
    out_dim = Ws[5].shape[1]

    def replicated(arr):
        # Whole-parameter block, same block index every grid step -> loaded once.
        return pl.BlockSpec(arr.shape, lambda i: (0, 0))

    in_specs = [pl.BlockSpec((tb, d_in), lambda i: (i, 0))]
    in_specs += [replicated(p) for p in flat_params]

    out_shape = (jax.ShapeDtypeStruct((B, feat_dim), jnp.float32),
                 jax.ShapeDtypeStruct((B, out_dim), jnp.float32))
    out_specs = [pl.BlockSpec((tb, feat_dim), lambda i: (i, 0)),
                 pl.BlockSpec((tb, out_dim), lambda i: (i, 0))]

    return pl.pallas_call(
        net_forward_kernel,
        out_shape=out_shape,
        grid_spec=pltpu.PrefetchScalarGridSpec(
            num_scalar_prefetch=0,
            grid=(B // tb,),
            in_specs=in_specs,
            out_specs=out_specs,
        ),
        compiler_params=pltpu.CompilerParams(
            dimension_semantics=("parallel",),      # batch tiles are independent
        ),
    )(x, *flat_params)


# -----------------------------------------------------------------------------
# CenterLoss forward (improved per performance review)
# -----------------------------------------------------------------------------
def center_loss_kernel(xs_ref, ys_ref, invcnt_ref, center_ref, out_ref, acc_ref):
    i = pl.program_id(0)

    @pl.when(i == 0)
    def _():
        acc_ref[...] = jnp.zeros_like(acc_ref)

    xs = xs_ref[...]                       # (TB, F) f32 features
    ys = ys_ref[...]                       # (TB, 1) int32 labels
    inv = invcnt_ref[...]                  # (TB, 1) f32  = 1 / count[ys]
    ctr = center_ref[...]                  # (C, F) f32 class centers

    tb = xs.shape[0]
    n_cls = ctr.shape[0]

    # Build the one-hot tile in VMEM (no (B, C) HBM traffic).
    onehot = (jax.lax.broadcasted_iota(jnp.int32, (tb, n_cls), 1) == ys)
    onehot = onehot.astype(jnp.float32)

    # center.index_select(0, ys)  ==  one_hot @ center   (exact MXU gather)
    center_exp = jnp.dot(onehot, ctr, preferred_element_type=jnp.float32)   # (TB, F)

    diff = xs - center_exp
    dist = jnp.sqrt(jnp.sum(diff * diff, axis=1, keepdims=True))            # (TB, 1)

    # dist / count_exp folded into a VPU multiply with the precomputed 1/count;
    # no degenerate N=1 matmul, no transpose.
    acc_ref[...] += jnp.sum(dist * inv, axis=0, keepdims=True)              # (1, 1)

    @pl.when(i == pl.num_programs(0) - 1)
    def _():
        out_ref[...] = acc_ref[...]


def center_loss(xs, ys, center, *, tb=128):
    """Pallas CenterLoss forward. xs: (B, F) f32, ys: (B,) int, center: (C, F) f32."""
    B, F = xs.shape
    C, Fc = center.shape
    assert F == Fc
    ys = ys.astype(jnp.int32)

    tb = min(tb, B)
    assert B % tb == 0 and tb % 8 == 0, (B, tb)

    # torch.histc(ys, bins=C, min=0, max=C-1) on int labels == bincount.
    # Hoisted out of the kernel (tiny O(B) XLA work) so batch tiles are independent.
    count = jnp.bincount(ys, length=C).astype(jnp.float32)                  # (C,)
    inv_count = jnp.where(count > 0, 1.0 / count, 0.0)[ys].reshape(B, 1)    # (B, 1)
    ys_col = ys.reshape(B, 1)                                               # (B, 1)

    out = pl.pallas_call(
        center_loss_kernel,
        out_shape=jax.ShapeDtypeStruct((1, 1), jnp.float32),
        grid_spec=pltpu.PrefetchScalarGridSpec(
            num_scalar_prefetch=0,
            grid=(B // tb,),
            in_specs=[
                pl.BlockSpec((tb, F), lambda i: (i, 0)),     # feature tile
                pl.BlockSpec((tb, 1), lambda i: (i, 0)),     # label tile (int32)
                pl.BlockSpec((tb, 1), lambda i: (i, 0)),     # 1/count tile
                pl.BlockSpec((C, F), lambda i: (0, 0)),      # centers, replicated
            ],
            out_specs=pl.BlockSpec((1, 1), lambda i: (0, 0)),
            scratch_shapes=[pltpu.VMEM((1, 1), jnp.float32)],
        ),
        # The batch axis carries the scalar accumulator, so it must be "arbitrary".
        # (On v7x one could emit per-core partials with a "parallel" axis and sum
        # in the wrapper; not worth it at these problem sizes.)
        compiler_params=pltpu.CompilerParams(
            dimension_semantics=("arbitrary",),
        ),
    )(xs.astype(jnp.float32), ys_col, inv_count, center.astype(jnp.float32))
    return out[0, 0]


# -----------------------------------------------------------------------------
# Pure-JAX references
# -----------------------------------------------------------------------------
def net_forward_ref(x, Ws, bs, alphas):
    hi = jax.lax.Precision.HIGHEST
    h = x
    for li in range(4):
        h = jnp.dot(h, Ws[li], precision=hi) + bs[li]
        h = jnp.where(h >= 0.0, h, h * alphas[li])
    feat = jnp.dot(h, Ws[4], precision=hi) + bs[4]
    out = jnp.dot(feat, Ws[5], precision=hi) + bs[5]
    return feat, out


def center_loss_ref(xs, ys, center):
    C = center.shape[0]
    ys = ys.astype(jnp.int32)
    center_exp = center[ys]
    count = jnp.bincount(ys, length=C).astype(jnp.float32)
    count_exp = count[ys]
    dist = jnp.sqrt(jnp.sum((xs - center_exp) ** 2, axis=1))
    return jnp.sum(dist / count_exp)


if __name__ == "__main__":
    key = jax.random.PRNGKey(0)
    k_params, k_x, k_y, k_c = jax.random.split(key, 4)

    batch, n_cls = 256, 10
    layer_dims = [784, 512, 256, 128, 64, 2, 10]   # fc1 (5 Linear) + fc2 (1 Linear)

    wkeys = jax.random.split(k_params, 6)
    Ws = [jax.random.normal(wkeys[i], (layer_dims[i], layer_dims[i + 1]),
                            dtype=jnp.float32) * 0.05
          for i in range(6)]
    bs = [jnp.zeros((1, layer_dims[i + 1]), dtype=jnp.float32) for i in range(6)]
    alphas = [jnp.full((1, 1), 0.25, dtype=jnp.float32) for _ in range(4)]  # PReLU init

    x = jax.random.normal(k_x, (batch, 784), dtype=jnp.float32)
    labels = jax.random.randint(k_y, (batch,), 0, n_cls, dtype=jnp.int32)
    center = jax.random.normal(k_c, (n_cls, 2), dtype=jnp.float32)

    # Pallas forward + Pallas center loss on the produced features.
    feats, logits = net_forward(x, Ws, bs, alphas, tb=128)
    feats = jax.block_until_ready(feats)
    logits = jax.block_until_ready(logits)
    loss = jax.block_until_ready(center_loss(feats, labels, center, tb=128))

    # References.
    feats_r, logits_r = net_forward_ref(x, Ws, bs, alphas)
    loss_r = center_loss_ref(feats, labels, center)   # same features -> apples-to-apples

    assert jnp.allclose(feats, feats_r, rtol=1e-4, atol=1e-4), "features mismatch"
    assert jnp.allclose(logits, logits_r, rtol=1e-4, atol=1e-4), "logits mismatch"
    assert jnp.allclose(loss, loss_r, rtol=1e-4, atol=1e-4), (loss, loss_r)
    print("KERNEL_OK")
</pallas_src>

<mosaic_0001>
module attributes {stable_mosaic.version = 11 : i64} {
  func.func @net_forward_kernel(%arg0: i32, %arg1: memref<128x784xf32, #tpu.memory_space<vmem>>, %arg2: memref<784x512xf32, #tpu.memory_space<vmem>>, %arg3: memref<1x512xf32, #tpu.memory_space<vmem>>, %arg4: memref<1x1xf32, #tpu.memory_space<vmem>>, %arg5: memref<512x256xf32, #tpu.memory_space<vmem>>, %arg6: memref<1x256xf32, #tpu.memory_space<vmem>>, %arg7: memref<1x1xf32, #tpu.memory_space<vmem>>, %arg8: memref<256x128xf32, #tpu.memory_space<vmem>>, %arg9: memref<1x128xf32, #tpu.memory_space<vmem>>, %arg10: memref<1x1xf32, #tpu.memory_space<vmem>>, %arg11: memref<128x64xf32, #tpu.memory_space<vmem>>, %arg12: memref<1x64xf32, #tpu.memory_space<vmem>>, %arg13: memref<1x1xf32, #tpu.memory_space<vmem>>, %arg14: memref<64x2xf32, #tpu.memory_space<vmem>>, %arg15: memref<1x2xf32, #tpu.memory_space<vmem>>, %arg16: memref<2x10xf32, #tpu.memory_space<vmem>>, %arg17: memref<1x10xf32, #tpu.memory_space<vmem>>, %arg18: memref<128x2xf32, #tpu.memory_space<vmem>>, %arg19: memref<128x10xf32, #tpu.memory_space<vmem>>) attributes {dimension_semantics = [#tpu.dimension_semantics<parallel>], iteration_bounds = array<i64: 2>, scalar_prefetch = 0 : i64, scratch_operands = 0 : i64, tpu.core_type = #tpu.core_type<tc>, window_params = [{transform_indices = @transform_0, window_bounds = array<i64: 128, 784>}, {pipeline_mode = #tpu.pipeline_mode<synchronous>, transform_indices = @transform_1, window_bounds = array<i64: 784, 512>}, {pipeline_mode = #tpu.pipeline_mode<synchronous>, transform_indices = @transform_2, window_bounds = array<i64: 1, 512>}, {pipeline_mode = #tpu.pipeline_mode<synchronous>, transform_indices = @transform_3, window_bounds = array<i64: 1, 1>}, {pipeline_mode = #tpu.pipeline_mode<synchronous>, transform_indices = @transform_4, window_bounds = array<i64: 512, 256>}, {pipeline_mode = #tpu.pipeline_mode<synchronous>, transform_indices = @transform_5, window_bounds = array<i64: 1, 256>}, {pipeline_mode = #tpu.pipeline_mode<synchronous>, transform_indices = @transform_6, window_bounds = array<i64: 1, 1>}, {pipeline_mode = #tpu.pipeline_mode<synchronous>, transform_indices = @transform_7, window_bounds = array<i64: 256, 128>}, {pipeline_mode = #tpu.pipeline_mode<synchronous>, transform_indices = @transform_8, window_bounds = array<i64: 1, 128>}, {pipeline_mode = #tpu.pipeline_mode<synchronous>, transform_indices = @transform_9, window_bounds = array<i64: 1, 1>}, {pipeline_mode = #tpu.pipeline_mode<synchronous>, transform_indices = @transform_10, window_bounds = array<i64: 128, 64>}, {pipeline_mode = #tpu.pipeline_mode<synchronous>, transform_indices = @transform_11, window_bounds = array<i64: 1, 64>}, {pipeline_mode = #tpu.pipeline_mode<synchronous>, transform_indices = @transform_12, window_bounds = array<i64: 1, 1>}, {pipeline_mode = #tpu.pipeline_mode<synchronous>, transform_indices = @transform_13, window_bounds = array<i64: 64, 2>}, {pipeline_mode = #tpu.pipeline_mode<synchronous>, transform_indices = @transform_14, window_bounds = array<i64: 1, 2>}, {pipeline_mode = #tpu.pipeline_mode<synchronous>, transform_indices = @transform_15, window_bounds = array<i64: 2, 10>}, {pipeline_mode = #tpu.pipeline_mode<synchronous>, transform_indices = @transform_16, window_bounds = array<i64: 1, 10>}, {transform_indices = @transform_17, window_bounds = array<i64: 128, 2>}, {transform_indices = @transform_18, window_bounds = array<i64: 128, 10>}]} {
    %c0 = arith.constant 0 : index
    %c0_0 = arith.constant 0 : index
    %0 = vector.load %arg1[%c0, %c0_0] : memref<128x784xf32, #tpu.memory_space<vmem>>, vector<128x784xf32>
    %c0_1 = arith.constant 0 : index
    %c0_2 = arith.constant 0 : index
    %1 = vector.load %arg2[%c0_1, %c0_2] : memref<784x512xf32, #tpu.memory_space<vmem>>, vector<784x512xf32>
    %cst = arith.constant dense<0.000000e+00> : vector<128x512xf32>
    %2 = tpu.matmul %0, %1, %cst {dimension_numbers = #tpu.dot_dimension_numbers<[1], [0], [0], [1], [0, 0, 1, 1], [], []>} : vector<128x784xf32>, vector<784x512xf32>, vector<128x512xf32> -> vector<128x512xf32>
    %c0_3 = arith.constant 0 : index
    %c0_4 = arith.constant 0 : index
    %3 = vector.load %arg3[%c0_3, %c0_4] : memref<1x512xf32, #tpu.memory_space<vmem>>, vector<1x512xf32>
    %4 = vector.broadcast %3 : vector<1x512xf32> to vector<128x512xf32>
    %5 = arith.addf %2, %4 : vector<128x512xf32>
    %c0_5 = arith.constant 0 : index
    %c0_6 = arith.constant 0 : index
    %6 = vector.load %arg4[%c0_5, %c0_6] : memref<1x1xf32, #tpu.memory_space<vmem>>, vector<1x1xf32>
    %cst_7 = arith.constant 0.000000e+00 : f32
    %7 = vector.broadcast %cst_7 : f32 to vector<128x512xf32>
    %8 = arith.cmpf oge, %5, %7 : vector<128x512xf32>
    %9 = vector.broadcast %6 : vector<1x1xf32> to vector<128x512xf32>
    %10 = arith.mulf %5, %9 : vector<128x512xf32>
    %11 = arith.select %8, %5, %10 : vector<128x512xi1>, vector<128x512xf32>
    %c0_8 = arith.constant 0 : index
    %c0_9 = arith.constant 0 : index
    %12 = vector.load %arg5[%c0_8, %c0_9] : memref<512x256xf32, #tpu.memory_space<vmem>>, vector<512x256xf32>
    %cst_10 = arith.constant dense<0.000000e+00> : vector<128x256xf32>
    %13 = tpu.matmul %11, %12, %cst_10 {dimension_numbers = #tpu.dot_dimension_numbers<[1], [0], [0], [1], [0, 0, 1, 1], [], []>} : vector<128x512xf32>, vector<512x256xf32>, vector<128x256xf32> -> vector<128x256xf32>
    %c0_11 = arith.constant 0 : index
    %c0_12 = arith.constant 0 : index
    %14 = vector.load %arg6[%c0_11, %c0_12] : memref<1x256xf32, #tpu.memory_space<vmem>>, vector<1x256xf32>
    %15 = vector.broadcast %14 : vector<1x256xf32> to vector<128x256xf32>
    %16 = arith.addf %13, %15 : vector<128x256xf32>
    %c0_13 = arith.constant 0 : index
    %c0_14 = arith.constant 0 : index
    %17 = vector.load %arg7[%c0_13, %c0_14] : memref<1x1xf32, #tpu.memory_space<vmem>>, vector<1x1xf32>
    %cst_15 = arith.constant 0.000000e+00 : f32
    %18 = vector.broadcast %cst_15 : f32 to vector<128x256xf32>
    %19 = arith.cmpf oge, %16, %18 : vector<128x256xf32>
    %20 = vector.broadcast %17 : vector<1x1xf32> to vector<128x256xf32>
    %21 = arith.mulf %16, %20 : vector<128x256xf32>
    %22 = arith.select %19, %16, %21 : vector<128x256xi1>, vector<128x256xf32>
    %c0_16 = arith.constant 0 : index
    %c0_17 = arith.constant 0 : index
    %23 = vector.load %arg8[%c0_16, %c0_17] : memref<256x128xf32, #tpu.memory_space<vmem>>, vector<256x128xf32>
    %cst_18 = arith.constant dense<0.000000e+00> : vector<128x128xf32>
    %24 = tpu.matmul %22, %23, %cst_18 {dimension_numbers = #tpu.dot_dimension_numbers<[1], [0], [0], [1], [0, 0, 1, 1], [], []>} : vector<128x256xf32>, vector<256x128xf32>, vector<128x128xf32> -> vector<128x128xf32>
    %c0_19 = arith.constant 0 : index
    %c0_20 = arith.constant 0 : index
    %25 = vector.load %arg9[%c0_19, %c0_20] : memref<1x128xf32, #tpu.memory_space<vmem>>, vector<1x128xf32>
    %26 = vector.broadcast %25 : vector<1x128xf32> to vector<128x128xf32>
    %27 = arith.addf %24, %26 : vector<128x128xf32>
    %c0_21 = arith.constant 0 : index
    %c0_22 = arith.constant 0 : index
    %28 = vector.load %arg10[%c0_21, %c0_22] : memref<1x1xf32, #tpu.memory_space<vmem>>, vector<1x1xf32>
    %cst_23 = arith.constant 0.000000e+00 : f32
    %29 = vector.broadcast %cst_23 : f32 to vector<128x128xf32>
    %30 = arith.cmpf oge, %27, %29 : vector<128x128xf32>
    %31 = vector.broadcast %28 : vector<1x1xf32> to vector<128x128xf32>
    %32 = arith.mulf %27, %31 : vector<128x128xf32>
    %33 = arith.select %30, %27, %32 : vector<128x128xi1>, vector<128x128xf32>
    %c0_24 = arith.constant 0 : index
    %c0_25 = arith.constant 0 : index
    %34 = vector.load %arg11[%c0_24, %c0_25] : memref<128x64xf32, #tpu.memory_space<vmem>>, vector<128x64xf32>
    %cst_26 = arith.constant dense<0.000000e+00> : vector<128x64xf32>
    %35 = tpu.matmul %33, %34, %cst_26 {dimension_numbers = #tpu.dot_dimension_numbers<[1], [0], [0], [1], [0, 0, 1, 1], [], []>} : vector<128x128xf32>, vector<128x64xf32>, vector<128x64xf32> -> vector<128x64xf32>
    %c0_27 = arith.constant 0 : index
    %c0_28 = arith.constant 0 : index
    %36 = vector.load %arg12[%c0_27, %c0_28] : memref<1x64xf32, #tpu.memory_space<vmem>>, vector<1x64xf32>
    %37 = vector.broadcast %36 : vector<1x64xf32> to vector<128x64xf32>
    %38 = arith.addf %35, %37 : vector<128x64xf32>
    %c0_29 = arith.constant 0 : index
    %c0_30 = arith.constant 0 : index
    %39 = vector.load %arg13[%c0_29, %c0_30] : memref<1x1xf32, #tpu.memory_space<vmem>>, vector<1x1xf32>
    %cst_31 = arith.constant 0.000000e+00 : f32
    %40 = vector.broadcast %cst_31 : f32 to vector<128x64xf32>
    %41 = arith.cmpf oge, %38, %40 : vector<128x64xf32>
    %42 = vector.broadcast %39 : vector<1x1xf32> to vector<128x64xf32>
    %43 = arith.mulf %38, %42 : vector<128x64xf32>
    %44 = arith.select %41, %38, %43 : vector<128x64xi1>, vector<128x64xf32>
    %c0_32 = arith.constant 0 : index
    %c0_33 = arith.constant 0 : index
    %45 = vector.load %arg14[%c0_32, %c0_33] : memref<64x2xf32, #tpu.memory_space<vmem>>, vector<64x2xf32>
    %cst_34 = arith.constant dense<0.000000e+00> : vector<128x2xf32>
    %46 = tpu.matmul %44, %45, %cst_34 {dimension_numbers = #tpu.dot_dimension_numbers<[1], [0], [0], [1], [0, 0, 1, 1], [], []>} : vector<128x64xf32>, vector<64x2xf32>, vector<128x2xf32> -> vector<128x2xf32>
    %c0_35 = arith.constant 0 : index
    %c0_36 = arith.constant 0 : index
    %47 = vector.load %arg15[%c0_35, %c0_36] : memref<1x2xf32, #tpu.memory_space<vmem>>, vector<1x2xf32>
    %48 = vector.broadcast %47 : vector<1x2xf32> to vector<128x2xf32>
    %49 = arith.addf %46, %48 : vector<128x2xf32>
    %c0_37 = arith.constant 0 : index
    %c0_38 = arith.constant 0 : index
    %50 = vector.load %arg18[%c0_37, %c0_38] : memref<128x2xf32, #tpu.memory_space<vmem>>, vector<128x2xf32>
    tpu.vector_store %arg18[%c0_37, %c0_38], %49 {strides = array<i32>} : memref<128x2xf32, #tpu.memory_space<vmem>>, vector<128x2xf32>,
    %c0_39 = arith.constant 0 : index
    %c0_40 = arith.constant 0 : index
    %51 = vector.load %arg16[%c0_39, %c0_40] : memref<2x10xf32, #tpu.memory_space<vmem>>, vector<2x10xf32>
    %cst_41 = arith.constant dense<0.000000e+00> : vector<128x10xf32>
    %52 = tpu.matmul %49, %51, %cst_41 {dimension_numbers = #tpu.dot_dimension_numbers<[1], [0], [0], [1], [0, 0, 1, 1], [], []>} : vector<128x2xf32>, vector<2x10xf32>, vector<128x10xf32> -> vector<128x10xf32>
    %c0_42 = arith.constant 0 : index
    %c0_43 = arith.constant 0 : index
    %53 = vector.load %arg17[%c0_42, %c0_43] : memref<1x10xf32, #tpu.memory_space<vmem>>, vector<1x10xf32>
    %54 = vector.broadcast %53 : vector<1x10xf32> to vector<128x10xf32>
    %55 = arith.addf %52, %54 : vector<128x10xf32>
    %c0_44 = arith.constant 0 : index
    %c0_45 = arith.constant 0 : index
    %56 = vector.load %arg19[%c0_44, %c0_45] : memref<128x10xf32, #tpu.memory_space<vmem>>, vector<128x10xf32>
    tpu.vector_store %arg19[%c0_44, %c0_45], %55 {strides = array<i32>} : memref<128x10xf32, #tpu.memory_space<vmem>>, vector<128x10xf32>,
    return
  }
  func.func @transform_0(%arg0: i32) -> (i32, i32) {
    %c0_i32 = arith.constant 0 : i32
    %c0_i32_0 = arith.constant 0 : i32
    return %arg0, %c0_i32 : i32, i32
  }
  func.func @transform_1(%arg0: i32) -> (i32, i32) {
    %c0_i32 = arith.constant 0 : i32
    %c0_i32_0 = arith.constant 0 : i32
    %c0_i32_1 = arith.constant 0 : i32
    return %c0_i32, %c0_i32_0 : i32, i32
  }
  func.func @transform_2(%arg0: i32) -> (i32, i32) {
    %c0_i32 = arith.constant 0 : i32
    %c0_i32_0 = arith.constant 0 : i32
    %c0_i32_1 = arith.constant 0 : i32
    return %c0_i32, %c0_i32_0 : i32, i32
  }
  func.func @transform_3(%arg0: i32) -> (i32, i32) {
    %c0_i32 = arith.constant 0 : i32
    %c0_i32_0 = arith.constant 0 : i32
    %c0_i32_1 = arith.constant 0 : i32
    return %c0_i32, %c0_i32_0 : i32, i32
  }
  func.func @transform_4(%arg0: i32) -> (i32, i32) {
    %c0_i32 = arith.constant 0 : i32
    %c0_i32_0 = arith.constant 0 : i32
    %c0_i32_1 = arith.constant 0 : i32
    return %c0_i32, %c0_i32_0 : i32, i32
  }
  func.func @transform_5(%arg0: i32) -> (i32, i32) {
    %c0_i32 = arith.constant 0 : i32
    %c0_i32_0 = arith.constant 0 : i32
    %c0_i32_1 = arith.constant 0 : i32
    return %c0_i32, %c0_i32_0 : i32, i32
  }
  func.func @transform_6(%arg0: i32) -> (i32, i32) {
    %c0_i32 = arith.constant 0 : i32
    %c0_i32_0 = arith.constant 0 : i32
    %c0_i32_1 = arith.constant 0 : i32
    return %c0_i32, %c0_i32_0 : i32, i32
  }
  func.func @transform_7(%arg0: i32) -> (i32, i32) {
    %c0_i32 = arith.constant 0 : i32
    %c0_i32_0 = arith.constant 0 : i32
    %c0_i32_1 = arith.constant 0 : i32
    return %c0_i32, %c0_i32_0 : i32, i32
  }
  func.func @transform_8(%arg0: i32) -> (i32, i32) {
    %c0_i32 = arith.constant 0 : i32
    %c0_i32_0 = arith.constant 0 : i32
    %c0_i32_1 = arith.constant 0 : i32
    return %c0_i32, %c0_i32_0 : i32, i32
  }
  func.func @transform_9(%arg0: i32) -> (i32, i32) {
    %c0_i32 = arith.constant 0 : i32
    %c0_i32_0 = arith.constant 0 : i32
    %c0_i32_1 = arith.constant 0 : i32
    return %c0_i32, %c0_i32_0 : i32, i32
  }
  func.func @transform_10(%arg0: i32) -> (i32, i32) {
    %c0_i32 = arith.constant 0 : i32
    %c0_i32_0 = arith.constant 0 : i32
    %c0_i32_1 = arith.constant 0 : i32
    return %c0_i32, %c0_i32_0 : i32, i32
  }
  func.func @transform_11(%arg0: i32) -> (i32, i32) {
    %c0_i32 = arith.constant 0 : i32
    %c0_i32_0 = arith.constant 0 : i32
    %c0_i32_1 = arith.constant 0 : i32
    return %c0_i32, %c0_i32_0 : i32, i32
  }
  func.func @transform_12(%arg0: i32) -> (i32, i32) {
    %c0_i32 = arith.constant 0 : i32
    %c0_i32_0 = arith.constant 0 : i32
    %c0_i32_1 = arith.constant 0 : i32
    return %c0_i32, %c0_i32_0 : i32, i32
  }
  func.func @transform_13(%arg0: i32) -> (i32, i32) {
    %c0_i32 = arith.constant 0 : i32
    %c0_i32_0 = arith.constant 0 : i32
    %c0_i32_1 = arith.constant 0 : i32
    return %c0_i32, %c0_i32_0 : i32, i32
  }
  func.func @transform_14(%arg0: i32) -> (i32, i32) {
    %c0_i32 = arith.constant 0 : i32
    %c0_i32_0 = arith.constant 0 : i32
    %c0_i32_1 = arith.constant 0 : i32
    return %c0_i32, %c0_i32_0 : i32, i32
  }
  func.func @transform_15(%arg0: i32) -> (i32, i32) {
    %c0_i32 = arith.constant 0 : i32
    %c0_i32_0 = arith.constant 0 : i32
    %c0_i32_1 = arith.constant 0 : i32
    return %c0_i32, %c0_i32_0 : i32, i32
  }
  func.func @transform_16(%arg0: i32) -> (i32, i32) {
    %c0_i32 = arith.constant 0 : i32
    %c0_i32_0 = arith.constant 0 : i32
    %c0_i32_1 = arith.constant 0 : i32
    return %c0_i32, %c0_i32_0 : i32, i32
  }
  func.func @transform_17(%arg0: i32) -> (i32, i32) {
    %c0_i32 = arith.constant 0 : i32
    %c0_i32_0 = arith.constant 0 : i32
    return %arg0, %c0_i32 : i32, i32
  }
  func.func @transform_18(%arg0: i32) -> (i32, i32) {
    %c0_i32 = arith.constant 0 : i32
    %c0_i32_0 = arith.constant 0 : i32
    return %arg0, %c0_i32 : i32, i32
  }
}

</mosaic_0001>

<bundles_post_ra>
// kernel: tpu_custom_call.1
= control target key start
LH: loop header
LB: loop body
LE: loop exit
PB: predicated region body
PF: predicated region fallthrough
CT: control target
= control target key end

     0   :  { %s7951_s0 = inlined_call_operand.vmem [shape: f32[256,784], index: 0, kind: input, shape index: {}]   ;;  %s7952_s1 = inlined_call_operand.vmem [shape: f32[784,512], index: 1, kind: input, shape index: {}]   ;;  %s7953_s2 = inlined_call_operand.vmem [shape: f32[1,512], index: 2, kind: input, shape index: {}]   ;;  %s7954_s3 = inlined_call_operand.<no memory space> [shape: f32[1,1], index: 3, kind: input, shape index: {}]   ;;  %s7955_s4 = inlined_call_operand.hbm [shape: f32[512,256], index: 4, kind: input, shape index: {}]   ;;  %s7956_s5 = inlined_call_operand.vmem [shape: f32[1,256], index: 5, kind: input, shape index: {}]   ;;  %s7957_s7 = inlined_call_operand.vmem [shape: f32[256,128], index: 7, kind: input, shape index: {}]   ;;  %s7958_s8 = inlined_call_operand.vmem [shape: f32[1,128], index: 8, kind: input, shape index: {}]   ;;  %s7959_s10 = inlined_call_operand.vmem [shape: f32[128,64], index: 10, kind: input, shape index: {}]   ;;  %s7960_s11 = inlined_call_operand.vmem [shape: f32[1,64], index: 11, kind: input, shape index: {}]   ;;  %s7961_s13 = inlined_call_operand.vmem [shape: f32[64,2], index: 13, kind: input, shape index: {}]   ;;  %s7962_s14 = inlined_call_operand.vmem [shape: f32[1,2], index: 14, kind: input, shape index: {}]   ;;  %s7963_s15 = inlined_call_operand.vmem [shape: f32[2,10], index: 15, kind: input, shape index: {}]   ;;  %s7964_s16 = inlined_call_operand.vmem [shape: f32[1,10], index: 16, kind: input, shape index: {}]   ;;  %s7965_s17 = inlined_call_operand.vmem [shape: f32[256,2], index: 17, kind: output, shape index: {0}]   ;;  %s7966_s18 = inlined_call_operand.vmem [shape: f32[256,10], index: 18, kind: output, shape index: {1}]   ;;  %s7967_s6 = inlined_call_operand.<no memory space> [shape: f32[1,1], index: 6, kind: input, shape index: {}]   ;;  %s7968_s9 = inlined_call_operand.<no memory space> [shape: f32[1,1], index: 9, kind: input, shape index: {}]   ;;  %s7969_s12 = inlined_call_operand.<no memory space> [shape: f32[1,1], index: 12, kind: input, shape index: {}]  }
   0x1   :  { %7974 = sst [smem:[#allocation9_spill]] %s7951_s0  ;;  %v24_v0 = vstv %s7954_s3  ;;  %v26_v1 = vstv %s7967_s6  ;;  %v28_v2 = vstv %s7968_s9  ;;  %v30_v3 = vstv %s7969_s12 }
   0x2   :  { %7975 = sst [smem:[#allocation10_spill]] %s7952_s1  ;;  %25 = vst [vmem:[#allocation2] sm:$0x1] %v24_v0  ;;  %27 = vst [vmem:[#allocation3] sm:$0x1] %v26_v1 }
   0x3   :  { %7976 = sst [smem:[#allocation11_spill]] %s7953_s2  ;;  %29 = vst [vmem:[#allocation4] sm:$0x1] %v28_v2  ;;  %31 = vst [vmem:[#allocation5] sm:$0x1] %v30_v3 }
   0x4   :  { %32 = vsyncpa [#allocation7], 0  ;;  %s5763_s21 = smov 0  }
   0x5 LB: > { %s4270_s3 = sadd.s32 4294967295, %s5649_s21   ;;  %p4272_p0 = scmp.ge.s32.totalorder %s5649_s21, 1  ;;  %s5649_s21 = sphi %s5763_s21, %s38_s21  }
   0x6   : > { %p457_p1 = scmp.lt.s32.totalorder %s5649_s21, 3  ;;  %s5651_s6 = smov [#allocation6]  }
   0x7   : > { %s478_s9 = sshll.u32 %s5651_s6, 4  ;;  %p5777_p3 = scmp.eq.s32.totalorder %s4270_s3, 0  ;;  %s479_s9 = int_to_ptr.vmem [resolvable:$true] %s478_s9 }
   0x8   : > { %p5771_p2 = pnand %p4272_p0, %p457_p1  ;;  %s5611_s25 = scalar_lea.hbm %s7955_s4, 16384 }
   0x9   : > { %s7978_s22 = scalar_select %p5777_p3, 1, 0 }
   0xa   : > { %s7977_s12 = scalar_select %p5771_p2, 1, 0 }
   0xb   : > { %p5574_p4 = pneg %p5771_p2  ;;  %p5612_p6 = scmp.ne.s32.totalorder %s7955_s4, %s5611_s25 }
   0xc   : > { %p5618_p10 = scmp.lt.u32.totalorder %s5611_s25, %s7955_s4 }
   0xd   : > { %p5785_p5 = pnand %p5777_p3, %p5574_p4 }
   0xf   : > { %p5613_p7 = pneg %p5785_p5 }
  0x11   : > { %p5614_p8 = pnand %p5613_p7, %p5612_p6 }
  0x13   : > { %p5615_p9 = pneg %p5614_p8 }
  0x15   : > { %p5620_p11 = pnand %p5618_p10, %p5615_p9 }
  0x17   : > { %5623 = shalt.err (!%p5620_p11)
}
  0x18   : > { %s5624_s30 = scalar_lea.vmem %s479_s9, 16384  ;;  %p5632_p1 = scmp.lt.s32.totalorder %s479_s9, %s479_s9 }
  0x19   : > { %p5625_p12 = scmp.ne.s32.totalorder %s479_s9, %s5624_s30  ;;  %p5633_p4 = scmp.lt.s32.totalorder %s5624_s30, %s5624_s30 }
  0x1b   : > { %p5627_p13 = pnand %p5625_p12, %p5613_p7  ;;  %p5634_p3 = por %p5633_p4, %p5632_p1 }
  0x1d   : > { %p5628_p0 = pneg %p5627_p13 }
  0x1f   : > { %p5635_p2 = pnand %p5634_p3, %p5628_p0 }
  0x21   : > { %5638 = shalt.err (!%p5635_p2)
}
  0x22   : > { %s5652_s0 = smov 256   ;;  %s5653_s19 = smov 16  }
  0x23   : > { %5577 = dma.hbm_to_vmem [thread:$0]  (!%p5785_p5), %s7955_s4, 16384, %s479_s9, [#allocation7], %s5652_s0, %s5652_s0, %s5653_s19  }
  0x24   : > { %p7980_p6 = scmp.ne.s32.totalorder %s7977_s12, 0 }
  0x25   : > { %p7981_p8 = scmp.ne.s32.totalorder (!%p7980_p6), %s7978_s22, 0 }
  0x26   : > { %540 = sbr.rel (%p7980_p6) target bundleno = 1687 (0x697), region = 88 }
  0x2d   : > { %5644 = dma.done.wait (%p7981_p8), [#allocation7], 16384  }
  0x2e   : > { %5646 = vsyncadd (%p7981_p8), [#allocation7], 4294950912  ;;  %s4277_s6 = sshll.u32 %s4270_s3, 4  ;;  %v5654_v4 = vmov 0.0   ;;  %s7982_s23 = sld [smem:[#allocation10_spill]]  ;;  %vm1145_vm0 = vcmask 130048  }
  0x2f   : > { %1741 = vmatprep.mubr.f32.mxu1 %v5654_v4  ;;  %p601_p2 = scmp.lt.s32.totalorder %s4277_s6, 31  ;;  %s7983_s28 = sld [smem:[#allocation9_spill]] }
  0x30   : > { %s7984_s30 = sld [smem:[#allocation11_spill]] }
  0x31   : > { %s7986_s6 = smov (!%p601_p2, %s4277_s6), 31 }
  0x32   : > { %s5569_s9 = smul.u32 56, %s7986_s6 }
  0x34   : > { %v732_v5 = vld [vmem:[%s7982_s23 + $0x8] sm:$0xff]  ;;  %v731_v10 = vld [vmem:[%s7982_s23] sm:$0xff]  ;;  %v734_v20 = vld [vmem:[%s7982_s23 + $0x18] sm:$0xff] }
  0x35   : > { %v736_v6 = vld [vmem:[%s7982_s23 + $0x28] sm:$0xff]  ;;  %s5829_s29 = scalar_lea.vmem %s7983_s28, %s5569_s9  ;;  %v735_v11 = vld [vmem:[%s7982_s23 + $0x20] sm:$0xff]  ;;  %v738_v22 = vld [vmem:[%s7982_s23 + $0x38] sm:$0xff]  ;;  %s4280_s9 = sshll.u32 %s7986_s6, 3 }
  0x36   : > { %v1116_v7 = vld [vmem:[%s7982_s23 + $0xc08] sm:$0xff]  ;;  %v4633_v8 = vpack.c.bf16 %v736_v6, %v732_v5  ;;  %v4635_v13 = vpack.c.bf16 %v735_v11, %v731_v10  ;;  %v1115_v14 = vld [vmem:[%s7982_s23 + $0xc00] sm:$0xff]  ;;  %v625_v19 = vld [vmem:[%s5829_s29 + $0x30] sm:$0xff]  ;;  %v4829_v25 = vpack.c.bf16 %v738_v22, %v734_v20  ;;  %s7856_s27 = scalar_lea.vmem %s7965_s17, %s4280_s9  ;;  %s7914_s19 = scalar_lea.vmem %s7966_s18, %s4280_s9 }
  0x37   : > { %v1120_v9 = vld [vmem:[%s7982_s23 + $0xc28] sm:$0xff]  ;;  %v1119_v15 = vld [vmem:[%s7982_s23 + $0xc20] sm:$0xff]  ;;  %v733_v27 = vld [vmem:[%s7982_s23 + $0x10] sm:$0xff] }
  0x38   : > { %v4825_v12 = vpack.c.bf16 %v1120_v9, %v1116_v7  ;;  %v740_v16 = vld [vmem:[%s7982_s23 + $0x48] sm:$0xff]  ;;  %4634 = vmatprep.subr.bf16.mxu0 %v4633_v8  ;;  %v4827_v17 = vpack.c.bf16 %v1119_v15, %v1115_v14  ;;  %v739_v23 = vld [vmem:[%s7982_s23 + $0x40] sm:$0xff]  ;;  %v737_v28 = vld [vmem:[%s7982_s23 + $0x30] sm:$0xff] }
  0x39   : > { %v744_v18 = vld [vmem:[%s7982_s23 + $0x68] sm:$0xff]  ;;  %4636 = vmatpush1.bf16.msra.mxu0 %v4635_v13  ;;  %v743_v24 = vld [vmem:[%s7982_s23 + $0x60] sm:$0xff]  ;;  %v4831_v30 = vpack.c.bf16 %v737_v28, %v733_v27  ;;  %v742_v32 = vld [vmem:[%s7982_s23 + $0x58] sm:$0xff] }
  0x3a   : > { %4826 = vmatprep.subr.bf16.mxu1 %v4825_v12  ;;  %v4637_v21 = vpack.c.bf16 %v744_v18, %v740_v16  ;;  %v4639_v26 = vpack.c.bf16 %v743_v24, %v739_v23  ;;  %v748_v29 = vld [vmem:[%s7982_s23 + $0x88] sm:$0xff]  ;;  %v746_v34 = vld [vmem:[%s7982_s23 + $0x78] sm:$0xff]  ;;  %v747_v35 = vld [vmem:[%s7982_s23 + $0x80] sm:$0xff] }
  0x3b   : > { %4828 = vmatpush1.bf16.msra.mxu1 %v4827_v17  ;;  %v752_v31 = vld [vmem:[%s7982_s23 + $0xa8] sm:$0xff]  ;;  %v751_v36 = vld [vmem:[%s7982_s23 + $0xa0] sm:$0xff]  ;;  %v4833_v37 = vpack.c.bf16 %v746_v34, %v742_v32  ;;  %v741_v39 = vld [vmem:[%s7982_s23 + $0x50] sm:$0xff] }
  0x3c   : > { %4638 = vmatprep.subr.bf16.mxu0 %v4637_v21  ;;  %4830 = vmatprep.subr.bf16.mxu1 %v4829_v25  ;;  %v4641_v33 = vpack.c.bf16 %v752_v31, %v748_v29  ;;  %v4643_v38 = vpack.c.bf16 %v751_v36, %v747_v35  ;;  %v745_v40 = vld [vmem:[%s7982_s23 + $0x70] sm:$0xff]  ;;  %v756_v41 = vld [vmem:[%s7982_s23 + $0xc8] sm:$0xff]  ;;  %v750_v45 = vld [vmem:[%s7982_s23 + $0x98] sm:$0xff] }
  0x3d   : > { %4640 = vmatpush1.bf16.msra.mxu0 %v4639_v26  ;;  %v632_v42 = vld [vmem:[%s5829_s29 + $0x68] sm:$0xff]  ;;  %v4835_v43 = vpack.c.bf16 %v745_v40, %v741_v39  ;;  %v754_v47 = vld [vmem:[%s7982_s23 + $0xb8] sm:$0xff]  ;;  %v755_v48 = vld [vmem:[%s7982_s23 + $0xc0] sm:$0xff] }
  0x3e   : > { %4283 = vmatmul.mubr.msk.f32.vlgmr.msra.gmra.mrb[0].mxu1 %vm1145_vm0, %v625_v19  ;;  %v760_v44 = vld [vmem:[%s7982_s23 + $0xe8] sm:$0xff]  ;;  %4642 = vmatprep.subr.bf16.mxu0 %v4641_v33  ;;  %v759_v49 = vld [vmem:[%s7982_s23 + $0xe0] sm:$0xff]  ;;  %v4837_v50 = vpack.c.bf16 %v754_v47, %v750_v45  ;;  %v749_v51 = vld [vmem:[%s7982_s23 + $0x90] sm:$0xff] }
  0x3f   : > { %4832 = vmatpush1.bf16.msra.mxu1 %v4831_v30  ;;  %1747 = vmatprep.mubr.f32.mxu1 %v5654_v4  ;;  %v4645_v46 = vpack.c.bf16 %v760_v44, %v756_v41  ;;  %v753_v52 = vld [vmem:[%s7982_s23 + $0xb0] sm:$0xff]  ;;  %v764_v53 = vld [vmem:[%s7982_s23 + $0x108] sm:$0xff]  ;;  %v639_v54 = vld [vmem:[%s5829_s29 + $0xa0] sm:$0xff]  ;;  %v4647_v55 = vpack.c.bf16 %v759_v49, %v755_v48 }
  0x40   : > { %4834 = vmatprep.subr.bf16.mxu1 %v4833_v37  ;;  %v768_v56 = vld [vmem:[%s7982_s23 + $0x128] sm:$0xff]  ;;  %v758_v57 = vld [vmem:[%s7982_s23 + $0xd8] sm:$0xff]  ;;  %v4839_v58 = vpack.c.bf16 %v753_v52, %v749_v51  ;;  %v763_v60 = vld [vmem:[%s7982_s23 + $0x100] sm:$0xff] }
  0x41   : > { %4644 = vmatpush1.bf16.msra.mxu0 %v4643_v38  ;;  %v762_v59 = vld [vmem:[%s7982_s23 + $0xf8] sm:$0xff]  ;;  %v767_v61 = vld [vmem:[%s7982_s23 + $0x120] sm:$0xff]  ;;  %v4649_v62 = vpack.c.bf16 %v768_v56, %v764_v53  ;;  %v757_v0 = vld [vmem:[%s7982_s23 + $0xd0] sm:$0xff] }
  0x42   : > { %4284 = vmatmul.mubr.msk.f32.gmra.mrb[2].mxu1 %vm1145_vm0, %v632_v42  ;;  %4646 = vmatprep.subr.bf16.mxu0 %v4645_v46  ;;  %v4841_v63 = vpack.c.bf16 %v762_v59, %v758_v57  ;;  %v761_v1 = vld [vmem:[%s7982_s23 + $0xf0] sm:$0xff]  ;;  %v772_v2 = vld [vmem:[%s7982_s23 + $0x148] sm:$0xff]  ;;  %v766_v5 = vld [vmem:[%s7982_s23 + $0x118] sm:$0xff]  ;;  %v4651_v6 = vpack.c.bf16 %v767_v61, %v763_v60 }
  0x43   : > { %4836 = vmatpush1.bf16.msra.mxu1 %v4835_v43  ;;  %1753 = vmatprep.mubr.f32.mxu1 %v5654_v4  ;;  %v776_v3 = vld [vmem:[%s7982_s23 + $0x168] sm:$0xff]  ;;  %v770_v7 = vld [vmem:[%s7982_s23 + $0x138] sm:$0xff]  ;;  %v4843_v9 = vpack.c.bf16 %v761_v1, %v757_v0  ;;  %v771_v10 = vld [vmem:[%s7982_s23 + $0x140] sm:$0xff] }
  0x44   : > { %4838 = vmatprep.subr.bf16.mxu1 %v4837_v50  ;;  %v646_v8 = vld [vmem:[%s5829_s29 + $0xd8] sm:$0xff]  ;;  %v775_v11 = vld [vmem:[%s7982_s23 + $0x160] sm:$0xff]  ;;  %v4653_v12 = vpack.c.bf16 %v776_v3, %v772_v2  ;;  %v4845_v13 = vpack.c.bf16 %v770_v7, %v766_v5  ;;  %v765_v14 = vld [vmem:[%s7982_s23 + $0x110] sm:$0xff] }
  0x45   : > { %4648 = vmatpush1.bf16.msra.mxu0 %v4647_v55  ;;  %v769_v15 = vld [vmem:[%s7982_s23 + $0x130] sm:$0xff]  ;;  %v780_v16 = vld [vmem:[%s7982_s23 + $0x188] sm:$0xff]  ;;  %v774_v18 = vld [vmem:[%s7982_s23 + $0x158] sm:$0xff]  ;;  %v4655_v20 = vpack.c.bf16 %v775_v11, %v771_v10 }
  0x46   : > { %4285 = vmatmul.mubr.msk.f32.gmra.mrb[4].mxu1 %vm1145_vm0, %v639_v54  ;;  %4650 = vmatprep.subr.bf16.mxu0 %v4649_v62  ;;  %v784_v17 = vld [vmem:[%s7982_s23 + $0x1a8] sm:$0xff]  ;;  %v778_v19 = vld [vmem:[%s7982_s23 + $0x178] sm:$0xff]  ;;  %v653_v21 = vld [vmem:[%s5829_s29 + $0x110] sm:$0xff]  ;;  %v4847_v22 = vpack.c.bf16 %v769_v15, %v765_v14 }
  0x47   : > { %4840 = vmatpush1.bf16.msra.mxu1 %v4839_v58  ;;  %1759 = vmatprep.mubr.f32.mxu1 %v5654_v4  ;;  %v779_v23 = vld [vmem:[%s7982_s23 + $0x180] sm:$0xff]  ;;  %v4657_v25 = vpack.c.bf16 %v784_v17, %v780_v16  ;;  %v4849_v26 = vpack.c.bf16 %v778_v19, %v774_v18  ;;  %v773_v27 = vld [vmem:[%s7982_s23 + $0x150] sm:$0xff]  ;;  %v788_v29 = vld [vmem:[%s7982_s23 + $0x1c8] sm:$0xff] }
  0x48   : > { %4842 = vmatprep.subr.bf16.mxu1 %v4841_v63  ;;  %v783_v24 = vld [vmem:[%s7982_s23 + $0x1a0] sm:$0xff]  ;;  %v777_v28 = vld [vmem:[%s7982_s23 + $0x170] sm:$0xff]  ;;  %v792_v30 = vld [vmem:[%s7982_s23 + $0x1e8] sm:$0xff] }
  0x49   : > { %4652 = vmatpush1.bf16.msra.mxu0 %v4651_v6  ;;  %v782_v31 = vld [vmem:[%s7982_s23 + $0x198] sm:$0xff]  ;;  %v4659_v33 = vpack.c.bf16 %v783_v24, %v779_v23  ;;  %v660_v34 = vld [vmem:[%s5829_s29 + $0x148] sm:$0xff]  ;;  %v4851_v35 = vpack.c.bf16 %v777_v28, %v773_v27  ;;  %v787_v36 = vld [vmem:[%s7982_s23 + $0x1c0] sm:$0xff]  ;;  %v4661_v38 = vpack.c.bf16 %v792_v30, %v788_v29 }
  0x4a   : > { %4286 = vmatmul.mubr.msk.f32.gmra.mrb[6].mxu1 %vm1145_vm0, %v646_v8  ;;  %4654 = vmatprep.subr.bf16.mxu0 %v4653_v12  ;;  %v786_v32 = vld [vmem:[%s7982_s23 + $0x1b8] sm:$0xff]  ;;  %v791_v37 = vld [vmem:[%s7982_s23 + $0x1e0] sm:$0xff]  ;;  %v781_v40 = vld [vmem:[%s7982_s23 + $0x190] sm:$0xff] }
  0x4b   : > { %4844 = vmatpush1.bf16.msra.mxu1 %v4843_v9  ;;  %1765 = vmatprep.mubr.f32.mxu1 %v5654_v4  ;;  %v4853_v39 = vpack.c.bf16 %v786_v32, %v782_v31  ;;  %v785_v41 = vld [vmem:[%s7982_s23 + $0x1b0] sm:$0xff]  ;;  %v796_v42 = vld [vmem:[%s7982_s23 + $0x208] sm:$0xff]  ;;  %v790_v44 = vld [vmem:[%s7982_s23 + $0x1d8] sm:$0xff]  ;;  %v4663_v46 = vpack.c.bf16 %v791_v37, %v787_v36 }
  0x4c   : > { %4846 = vmatprep.subr.bf16.mxu1 %v4845_v13  ;;  %v800_v43 = vld [vmem:[%s7982_s23 + $0x228] sm:$0xff]  ;;  %v794_v45 = vld [vmem:[%s7982_s23 + $0x1f8] sm:$0xff]  ;;  %v667_v47 = vld [vmem:[%s5829_s29 + $0x180] sm:$0xff]  ;;  %v4855_v48 = vpack.c.bf16 %v785_v41, %v781_v40 }
  0x4d   : > { %4656 = vmatpush1.bf16.msra.mxu0 %v4655_v20  ;;  %v795_v49 = vld [vmem:[%s7982_s23 + $0x200] sm:$0xff]  ;;  %v4665_v51 = vpack.c.bf16 %v800_v43, %v796_v42  ;;  %v4857_v52 = vpack.c.bf16 %v794_v45, %v790_v44  ;;  %v789_v53 = vld [vmem:[%s7982_s23 + $0x1d0] sm:$0xff]  ;;  %v804_v55 = vld [vmem:[%s7982_s23 + $0x248] sm:$0xff] }
  0x4e   : > { %4287 = vmatmul.mubr.msk.f32.gmra.mrb[8].mxu1 %vm1145_vm0, %v653_v21  ;;  %4658 = vmatprep.subr.bf16.mxu0 %v4657_v25  ;;  %v799_v50 = vld [vmem:[%s7982_s23 + $0x220] sm:$0xff]  ;;  %v793_v54 = vld [vmem:[%s7982_s23 + $0x1f0] sm:$0xff]  ;;  %v808_v56 = vld [vmem:[%s7982_s23 + $0x268] sm:$0xff] }
  0x4f   : > { %4848 = vmatpush1.bf16.msra.mxu1 %v4847_v22  ;;  %1771 = vmatprep.mubr.f32.mxu1 %v5654_v4  ;;  %v798_v57 = vld [vmem:[%s7982_s23 + $0x218] sm:$0xff]  ;;  %v4667_v59 = vpack.c.bf16 %v799_v50, %v795_v49  ;;  %v4859_v61 = vpack.c.bf16 %v793_v54, %v789_v53  ;;  %v803_v62 = vld [vmem:[%s7982_s23 + $0x240] sm:$0xff]  ;;  %v4669_v0 = vpack.c.bf16 %v808_v56, %v804_v55  ;;  %v797_v2 = vld [vmem:[%s7982_s23 + $0x210] sm:$0xff] }
  0x50   : > { %4850 = vmatprep.subr.bf16.mxu1 %v4849_v26  ;;  %v802_v58 = vld [vmem:[%s7982_s23 + $0x238] sm:$0xff]  ;;  %v807_v63 = vld [vmem:[%s7982_s23 + $0x260] sm:$0xff]  ;;  %v801_v3 = vld [vmem:[%s7982_s23 + $0x230] sm:$0xff] }
  0x51   : > { %4660 = vmatpush1.bf16.msra.mxu0 %v4659_v33  ;;  %v674_v60 = vld [vmem:[%s5829_s29 + $0x1b8] sm:$0xff]  ;;  %v4861_v1 = vpack.c.bf16 %v802_v58, %v798_v57  ;;  %v812_v5 = vld [vmem:[%s7982_s23 + $0x288] sm:$0xff]  ;;  %v4671_v9 = vpack.c.bf16 %v807_v63, %v803_v62  ;;  %v681_v10 = vld [vmem:[%s5829_s29 + $0x1f0] sm:$0xff]  ;;  %v4863_v11 = vpack.c.bf16 %v801_v3, %v797_v2 }
  0x52   : > { %4288 = vmatmul.mubr.msk.f32.gmra.mrb[10].mxu1 %vm1145_vm0, %v660_v34  ;;  %4662 = vmatprep.subr.bf16.mxu0 %v4661_v38  ;;  %v816_v6 = vld [vmem:[%s7982_s23 + $0x2a8] sm:$0xff]  ;;  %v806_v7 = vld [vmem:[%s7982_s23 + $0x258] sm:$0xff]  ;;  %v811_v12 = vld [vmem:[%s7982_s23 + $0x280] sm:$0xff] }
  0x53   : > { %4852 = vmatpush1.bf16.msra.mxu1 %v4851_v35  ;;  %1777 = vmatprep.mubr.f32.mxu1 %v5654_v4  ;;  %v810_v8 = vld [vmem:[%s7982_s23 + $0x278] sm:$0xff]  ;;  %v815_v13 = vld [vmem:[%s7982_s23 + $0x2a0] sm:$0xff]  ;;  %v4673_v14 = vpack.c.bf16 %v816_v6, %v812_v5  ;;  %v805_v16 = vld [vmem:[%s7982_s23 + $0x250] sm:$0xff] }
  0x54   : > { %4854 = vmatprep.subr.bf16.mxu1 %v4853_v39  ;;  %v4865_v15 = vpack.c.bf16 %v810_v8, %v806_v7  ;;  %v809_v17 = vld [vmem:[%s7982_s23 + $0x270] sm:$0xff]  ;;  %v820_v18 = vld [vmem:[%s7982_s23 + $0x2c8] sm:$0xff]  ;;  %v814_v20 = vld [vmem:[%s7982_s23 + $0x298] sm:$0xff]  ;;  %v4675_v22 = vpack.c.bf16 %v815_v13, %v811_v12 }
  0x55   : > { %4664 = vmatpush1.bf16.msra.mxu0 %v4663_v46  ;;  %v824_v19 = vld [vmem:[%s7982_s23 + $0x2e8] sm:$0xff]  ;;  %v818_v21 = vld [vmem:[%s7982_s23 + $0x2b8] sm:$0xff]  ;;  %v4867_v24 = vpack.c.bf16 %v809_v17, %v805_v16  ;;  %v819_v25 = vld [vmem:[%s7982_s23 + $0x2c0] sm:$0xff] }
  0x56   : > { %4289 = vmatmul.mubr.msk.f32.gmra.mrb[12].mxu1 %vm1145_vm0, %v667_v47  ;;  %4666 = vmatprep.subr.bf16.mxu0 %v4665_v51  ;;  %v688_v23 = vld [vmem:[%s5829_s29 + $0x228] sm:$0xff]  ;;  %v823_v26 = vld [vmem:[%s7982_s23 + $0x2e0] sm:$0xff]  ;;  %v4677_v27 = vpack.c.bf16 %v824_v19, %v820_v18  ;;  %v4869_v28 = vpack.c.bf16 %v818_v21, %v814_v20  ;;  %v813_v29 = vld [vmem:[%s7982_s23 + $0x290] sm:$0xff] }
  0x57   : > { %4856 = vmatpush1.bf16.msra.mxu1 %v4855_v48  ;;  %1783 = vmatprep.mubr.f32.mxu1 %v5654_v4  ;;  %v817_v30 = vld [vmem:[%s7982_s23 + $0x2b0] sm:$0xff]  ;;  %v828_v31 = vld [vmem:[%s7982_s23 + $0x308] sm:$0xff]  ;;  %v822_v33 = vld [vmem:[%s7982_s23 + $0x2d8] sm:$0xff]  ;;  %v4679_v35 = vpack.c.bf16 %v823_v26, %v819_v25 }
  0x58   : > { %4858 = vmatprep.subr.bf16.mxu1 %v4857_v52  ;;  %v832_v32 = vld [vmem:[%s7982_s23 + $0x328] sm:$0xff]  ;;  %v826_v34 = vld [vmem:[%s7982_s23 + $0x2f8] sm:$0xff]  ;;  %v695_v36 = vld [vmem:[%s5829_s29 + $0x260] sm:$0xff]  ;;  %v4871_v37 = vpack.c.bf16 %v817_v30, %v813_v29 }
  0x59   : > { %4668 = vmatpush1.bf16.msra.mxu0 %v4667_v59  ;;  %v827_v38 = vld [vmem:[%s7982_s23 + $0x300] sm:$0xff]  ;;  %v4681_v40 = vpack.c.bf16 %v832_v32, %v828_v31  ;;  %v4873_v41 = vpack.c.bf16 %v826_v34, %v822_v33  ;;  %v821_v42 = vld [vmem:[%s7982_s23 + $0x2d0] sm:$0xff]  ;;  %v836_v44 = vld [vmem:[%s7982_s23 + $0x348] sm:$0xff] }
  0x5a   : > { %4290 = vmatmul.mubr.msk.f32.gmra.mrb[14].mxu1 %vm1145_vm0, %v674_v60  ;;  %4670 = vmatprep.subr.bf16.mxu0 %v4669_v0  ;;  %v831_v39 = vld [vmem:[%s7982_s23 + $0x320] sm:$0xff]  ;;  %v825_v43 = vld [vmem:[%s7982_s23 + $0x2f0] sm:$0xff]  ;;  %v840_v45 = vld [vmem:[%s7982_s23 + $0x368] sm:$0xff] }
  0x5b   : > { %4860 = vmatpush1.bf16.msra.mxu1 %v4859_v61  ;;  %1789 = vmatprep.mubr.f32.mxu1 %v5654_v4  ;;  %v830_v46 = vld [vmem:[%s7982_s23 + $0x318] sm:$0xff]  ;;  %v4683_v48 = vpack.c.bf16 %v831_v39, %v827_v38  ;;  %v6179_v49 = vld [vmem:[%s5829_s29 + $0x8] sm:$0xff]  ;;  %v4875_v51 = vpack.c.bf16 %v825_v43, %v821_v42  ;;  %v835_v52 = vld [vmem:[%s7982_s23 + $0x340] sm:$0xff]  ;;  %v4685_v54 = vpack.c.bf16 %v840_v45, %v836_v44 }
  0x5c   : > { %4862 = vmatprep.subr.bf16.mxu1 %v4861_v1  ;;  %v834_v47 = vld [vmem:[%s7982_s23 + $0x338] sm:$0xff]  ;;  %v839_v53 = vld [vmem:[%s7982_s23 + $0x360] sm:$0xff]  ;;  %v829_v56 = vld [vmem:[%s7982_s23 + $0x310] sm:$0xff]  ;;  %1258 = vmatprep.mubr.f32.mxu0 %v6179_v49 }
  0x5d   : > { %4672 = vmatpush1.bf16.msra.mxu0 %v4671_v9  ;;  %v702_v50 = vld [vmem:[%s5829_s29 + $0x298] sm:$0xff]  ;;  %v4877_v55 = vpack.c.bf16 %v834_v47, %v830_v46  ;;  %v833_v57 = vld [vmem:[%s7982_s23 + $0x330] sm:$0xff]  ;;  %v844_v58 = vld [vmem:[%s7982_s23 + $0x388] sm:$0xff]  ;;  %v4687_v62 = vpack.c.bf16 %v839_v53, %v835_v52 }
  0x5e   : > { %4291 = vmatmul.mubr.msk.f32.gmra.mrb[16].mxu1 %vm1145_vm0, %v681_v10  ;;  %4674 = vmatprep.subr.bf16.mxu0 %v4673_v14  ;;  %v848_v59 = vld [vmem:[%s7982_s23 + $0x3a8] sm:$0xff]  ;;  %v838_v60 = vld [vmem:[%s7982_s23 + $0x358] sm:$0xff]  ;;  %v709_v63 = vld [vmem:[%s5829_s29 + $0x2d0] sm:$0xff]  ;;  %v4879_v0 = vpack.c.bf16 %v833_v57, %v829_v56 }
  0x5f   : > { %4864 = vmatpush1.bf16.msra.mxu1 %v4863_v11  ;;  %1795 = vmatprep.mubr.f32.mxu1 %v5654_v4  ;;  %v842_v61 = vld [vmem:[%s7982_s23 + $0x378] sm:$0xff]  ;;  %v843_v1 = vld [vmem:[%s7982_s23 + $0x380] sm:$0xff]  ;;  %v4689_v3 = vpack.c.bf16 %v848_v59, %v844_v58  ;;  %v837_v6 = vld [vmem:[%s7982_s23 + $0x350] sm:$0xff] }
  0x60   : > { %4866 = vmatprep.subr.bf16.mxu1 %v4865_v15  ;;  %v847_v2 = vld [vmem:[%s7982_s23 + $0x3a0] sm:$0xff]  ;;  %v4881_v5 = vpack.c.bf16 %v842_v61, %v838_v60  ;;  %v841_v7 = vld [vmem:[%s7982_s23 + $0x370] sm:$0xff]  ;;  %v852_v8 = vld [vmem:[%s7982_s23 + $0x3c8] sm:$0xff] }
  0x61   : > { %4676 = vmatpush1.bf16.msra.mxu0 %v4675_v22  ;;  %v856_v9 = vld [vmem:[%s7982_s23 + $0x3e8] sm:$0xff]  ;;  %v846_v10 = vld [vmem:[%s7982_s23 + $0x398] sm:$0xff]  ;;  %v4691_v12 = vpack.c.bf16 %v847_v2, %v843_v1  ;;  %v4883_v14 = vpack.c.bf16 %v841_v7, %v837_v6  ;;  %v851_v15 = vld [vmem:[%s7982_s23 + $0x3c0] sm:$0xff] }
  0x62   : > { %4292 = vmatmul.mubr.msk.f32.gmra.mrb[18].mxu1 %vm1145_vm0, %v688_v23  ;;  %4678 = vmatprep.subr.bf16.mxu0 %v4677_v27  ;;  %v850_v11 = vld [vmem:[%s7982_s23 + $0x3b8] sm:$0xff]  ;;  %v716_v13 = vld [vmem:[%s5829_s29 + $0x308] sm:$0xff]  ;;  %v855_v16 = vld [vmem:[%s7982_s23 + $0x3e0] sm:$0xff]  ;;  %v4693_v17 = vpack.c.bf16 %v856_v9, %v852_v8 }
  0x63   : > { %4868 = vmatpush1.bf16.msra.mxu1 %v4867_v24  ;;  %1801 = vmatprep.mubr.f32.mxu1 %v5654_v4  ;;  %v4885_v18 = vpack.c.bf16 %v850_v11, %v846_v10  ;;  %v845_v19 = vld [vmem:[%s7982_s23 + $0x390] sm:$0xff]  ;;  %v860_v21 = vld [vmem:[%s7982_s23 + $0x408] sm:$0xff]  ;;  %v854_v23 = vld [vmem:[%s7982_s23 + $0x3d8] sm:$0xff]  ;;  %v4695_v25 = vpack.c.bf16 %v855_v16, %v851_v15 }
  0x64   : > { %4870 = vmatprep.subr.bf16.mxu1 %v4869_v28  ;;  %v849_v20 = vld [vmem:[%s7982_s23 + $0x3b0] sm:$0xff]  ;;  %v864_v22 = vld [vmem:[%s7982_s23 + $0x428] sm:$0xff]  ;;  %v858_v24 = vld [vmem:[%s7982_s23 + $0x3f8] sm:$0xff] }
  0x65   : > { %4680 = vmatpush1.bf16.msra.mxu0 %v4679_v35  ;;  %v723_v26 = vld [vmem:[%s5829_s29 + $0x340] sm:$0xff]  ;;  %v4887_v27 = vpack.c.bf16 %v849_v20, %v845_v19  ;;  %v4697_v30 = vpack.c.bf16 %v864_v22, %v860_v21  ;;  %v4889_v31 = vpack.c.bf16 %v858_v24, %v854_v23  ;;  %v853_v32 = vld [vmem:[%s7982_s23 + $0x3d0] sm:$0xff]  ;;  %v868_v34 = vld [vmem:[%s7982_s23 + $0x448] sm:$0xff] }
  0x66   : > { %4293 = vmatmul.mubr.msk.f32.gmra.mrb[20].mxu1 %vm1145_vm0, %v695_v36  ;;  %4682 = vmatprep.subr.bf16.mxu0 %v4681_v40  ;;  %v859_v28 = vld [vmem:[%s7982_s23 + $0x400] sm:$0xff]  ;;  %v857_v33 = vld [vmem:[%s7982_s23 + $0x3f0] sm:$0xff]  ;;  %v872_v35 = vld [vmem:[%s7982_s23 + $0x468] sm:$0xff] }
  0x67   : > { %4872 = vmatpush1.bf16.msra.mxu1 %v4871_v37  ;;  %1807 = vmatprep.mubr.f32.mxu1 %v5654_v4  ;;  %v863_v29 = vld [vmem:[%s7982_s23 + $0x420] sm:$0xff]  ;;  %v862_v38 = vld [vmem:[%s7982_s23 + $0x418] sm:$0xff]  ;;  %v4701_v45 = vpack.c.bf16 %v872_v35, %v868_v34  ;;  %v861_v46 = vld [vmem:[%s7982_s23 + $0x410] sm:$0xff] }
  0x68   : > { %4874 = vmatprep.subr.bf16.mxu1 %v4873_v41  ;;  %v619_v36 = vld [vmem:[%s5829_s29] sm:$0xff]  ;;  %v4699_v37 = vpack.c.bf16 %v863_v29, %v859_v28  ;;  %v866_v39 = vld [vmem:[%s7982_s23 + $0x438] sm:$0xff]  ;;  %v4891_v41 = vpack.c.bf16 %v857_v33, %v853_v32  ;;  %v865_v47 = vld [vmem:[%s7982_s23 + $0x430] sm:$0xff] }
  0x69   : > { %4684 = vmatpush1.bf16.msra.mxu0 %v4683_v48  ;;  %v730_v40 = vld [vmem:[%s5829_s29 + $0x378] sm:$0xff]  ;;  %v867_v42 = vld [vmem:[%s7982_s23 + $0x440] sm:$0xff]  ;;  %v4893_v48 = vpack.c.bf16 %v866_v39, %v862_v38  ;;  %v4895_v56 = vpack.c.bf16 %v865_v47, %v861_v46  ;;  %v869_v61 = vld [vmem:[%s7982_s23 + $0x450] sm:$0xff] }
  0x6a   : > { %4294 = vmatmul.mubr.msk.f32.gmra.mrb[22].mxu1 %vm1145_vm0, %v702_v50  ;;  %4686 = vmatprep.subr.bf16.mxu0 %v4685_v54  ;;  %v871_v43 = vld [vmem:[%s7982_s23 + $0x460] sm:$0xff]  ;;  %v876_v50 = vld [vmem:[%s7982_s23 + $0x488] sm:$0xff]  ;;  %v626_v52 = vld [vmem:[%s5829_s29 + $0x38] sm:$0xff] }
  0x6b   : > { %4876 = vmatpush1.bf16.msra.mxu1 %v4875_v51  ;;  %1813 = vmatprep.mubr.f32.mxu1 %v5654_v4  ;;  %v627_v44 = vld [vmem:[%s5829_s29 + $0x40] sm:$0xff]  ;;  %v880_v51 = vld [vmem:[%s7982_s23 + $0x4a8] sm:$0xff]  ;;  %v4703_v53 = vpack.c.bf16 %v871_v43, %v867_v42  ;;  %v870_v54 = vld [vmem:[%s7982_s23 + $0x458] sm:$0xff] }
  0x6c   : > { %4878 = vmatprep.subr.bf16.mxu1 %v4877_v55  ;;  %v874_v55 = vld [vmem:[%s7982_s23 + $0x478] sm:$0xff]  ;;  %v875_v57 = vld [vmem:[%s7982_s23 + $0x480] sm:$0xff]  ;;  %v4705_v60 = vpack.c.bf16 %v880_v51, %v876_v50  ;;  %v633_v1 = vld [vmem:[%s5829_s29 + $0x70] sm:$0xff] }
  0x6d   : > { %4688 = vmatpush1.bf16.msra.mxu0 %v4687_v62  ;;  %v879_v58 = vld [vmem:[%s7982_s23 + $0x4a0] sm:$0xff]  ;;  %v634_v59 = vld [vmem:[%s5829_s29 + $0x78] sm:$0xff]  ;;  %v873_v62 = vld [vmem:[%s7982_s23 + $0x470] sm:$0xff] }
  0x6e   : > { %4295 = vmatmul.mubr.msk.f32.gmra.mrb[24].mxu1 %vm1145_vm0, %v709_v63  ;;  %4690 = vmatprep.subr.bf16.mxu0 %v4689_v3  ;;  %v4897_v63 = vpack.c.bf16 %v874_v55, %v870_v54  ;;  %v4707_v2 = vpack.c.bf16 %v879_v58, %v875_v57  ;;  %v878_v3 = vld [vmem:[%s7982_s23 + $0x498] sm:$0xff]  ;;  %v4899_v6 = vpack.c.bf16 %v873_v62, %v869_v61  ;;  %v883_v7 = vld [vmem:[%s7982_s23 + $0x4c0] sm:$0xff]  ;;  %v641_v9 = vld [vmem:[%s5829_s29 + $0xb0] sm:$0xff] }
  0x6f   : > { %4880 = vmatpush1.bf16.msra.mxu1 %v4879_v0  ;;  %1819 = vmatprep.mubr.f32.mxu1 %v5654_v4  ;;  %v884_v0 = vld [vmem:[%s7982_s23 + $0x4c8] sm:$0xff]  ;;  %v887_v8 = vld [vmem:[%s7982_s23 + $0x4e0] sm:$0xff]  ;;  %v877_v11 = vld [vmem:[%s7982_s23 + $0x490] sm:$0xff] }
  0x70   : > { %4882 = vmatprep.subr.bf16.mxu1 %v4881_v5  ;;  %v882_v5 = vld [vmem:[%s7982_s23 + $0x4b8] sm:$0xff]  ;;  %v896_v15 = vld [vmem:[%s7982_s23 + $0x528] sm:$0xff]  ;;  %v891_v21 = vld [vmem:[%s7982_s23 + $0x500] sm:$0xff] }
  0x71   : > { %4692 = vmatpush1.bf16.msra.mxu0 %v4691_v12  ;;  %v881_v12 = vld [vmem:[%s7982_s23 + $0x4b0] sm:$0xff]  ;;  %v640_v16 = vld [vmem:[%s5829_s29 + $0xa8] sm:$0xff]  ;;  %v890_v19 = vld [vmem:[%s7982_s23 + $0x4f8] sm:$0xff] }
  0x72   : > { %4296 = vmatmul.mubr.msk.f32.gmra.mrb[26].mxu1 %vm1145_vm0, %v716_v13  ;;  %4694 = vmatprep.subr.bf16.mxu0 %v4693_v17  ;;  %v4901_v13 = vpack.c.bf16 %v882_v5, %v878_v3  ;;  %v4711_v17 = vpack.c.bf16 %v887_v8, %v883_v7  ;;  %v4903_v20 = vpack.c.bf16 %v881_v12, %v877_v11  ;;  %v895_v22 = vld [vmem:[%s7982_s23 + $0x520] sm:$0xff]  ;;  %v648_v23 = vld [vmem:[%s5829_s29 + $0xe8] sm:$0xff]  ;;  %v894_v32 = vld [vmem:[%s7982_s23 + $0x518] sm:$0xff] }
  0x73   : > { %4884 = vmatpush1.bf16.msra.mxu1 %v4883_v14  ;;  %1825 = vmatprep.mubr.f32.mxu1 %v5654_v4  ;;  %v892_v14 = vld [vmem:[%s7982_s23 + $0x508] sm:$0xff]  ;;  %v898_v33 = vld [vmem:[%s7982_s23 + $0x538] sm:$0xff]  ;;  %v899_v35 = vld [vmem:[%s7982_s23 + $0x540] sm:$0xff] }
  0x74   : > { %4886 = vmatprep.subr.bf16.mxu1 %v4885_v18  ;;  %v886_v18 = vld [vmem:[%s7982_s23 + $0x4d8] sm:$0xff]  ;;  %v4713_v24 = vpack.c.bf16 %v896_v15, %v892_v14  ;;  %v900_v28 = vld [vmem:[%s7982_s23 + $0x548] sm:$0xff]  ;;  %v893_v39 = vld [vmem:[%s7982_s23 + $0x510] sm:$0xff] }
  0x75   : > { %4696 = vmatpush1.bf16.msra.mxu0 %v4695_v25  ;;  %v885_v25 = vld [vmem:[%s7982_s23 + $0x4d0] sm:$0xff]  ;;  %v904_v29 = vld [vmem:[%s7982_s23 + $0x568] sm:$0xff]  ;;  %v902_v46 = vld [vmem:[%s7982_s23 + $0x558] sm:$0xff] }
  0x76   : > { %4297 = vmatmul.mubr.msk.f32.gmra.mrb[28].mxu1 %vm1145_vm0, %v723_v26  ;;  %4698 = vmatprep.subr.bf16.mxu0 %v4697_v30  ;;  %v889_v26 = vld [vmem:[%s7982_s23 + $0x4f0] sm:$0xff]  ;;  %v647_v30 = vld [vmem:[%s5829_s29 + $0xe0] sm:$0xff]  ;;  %v4717_v38 = vpack.c.bf16 %v904_v29, %v900_v28  ;;  %v908_v42 = vld [vmem:[%s7982_s23 + $0x588] sm:$0xff] }
  0x77   : > { %4888 = vmatpush1.bf16.msra.mxu1 %v4887_v27  ;;  %1831 = vmatprep.mubr.f32.mxu1 %v5654_v4  ;;  %v4905_v27 = vpack.c.bf16 %v890_v19, %v886_v18  ;;  %v4907_v34 = vpack.c.bf16 %v889_v26, %v885_v25  ;;  %v912_v43 = vld [vmem:[%s7982_s23 + $0x5a8] sm:$0xff]  ;;  %v906_v47 = vld [vmem:[%s7982_s23 + $0x578] sm:$0xff]  ;;  %v907_v50 = vld [vmem:[%s7982_s23 + $0x580] sm:$0xff] }
  0x78   : > { %4890 = vmatprep.subr.bf16.mxu1 %v4889_v31  ;;  %1259 = vmatmul.mubr.f32.vlgmr.msra.gmra.mrb[0].mxu0 %v619_v36  ;;  %v4715_v31 = vpack.c.bf16 %v895_v22, %v891_v21  ;;  %v911_v51 = vld [vmem:[%s7982_s23 + $0x5a0] sm:$0xff]  ;;  %v901_v54 = vld [vmem:[%s7982_s23 + $0x550] sm:$0xff]  ;;  %v916_v57 = vld [vmem:[%s7982_s23 + $0x5c8] sm:$0xff] }
  0x79   : > { %4700 = vmatpush1.bf16.msra.mxu0 %v4699_v37  ;;  %1264 = vmatprep.mubr.f32.mxu0 %v627_v44  ;;  %v655_v37 = vld [vmem:[%s5829_s29 + $0x120] sm:$0xff]  ;;  %v905_v55 = vld [vmem:[%s7982_s23 + $0x570] sm:$0xff]  ;;  %v920_v58 = vld [vmem:[%s7982_s23 + $0x5e8] sm:$0xff] }
  0x7a   : > { %4298 = vmatmul.mubr.msk.f32.gmra.mrb[30].mxu1 %vm1145_vm0, %v730_v40  ;;  %4702 = vmatprep.subr.bf16.mxu0 %v4701_v45  ;;  %v897_v40 = vld [vmem:[%s7982_s23 + $0x530] sm:$0xff]  ;;  %v910_v61 = vld [vmem:[%s7982_s23 + $0x598] sm:$0xff]  ;;  %v924_v7 = vld [vmem:[%s7982_s23 + $0x608] sm:$0xff] }
  0x7b   : > { %4892 = vmatpush1.bf16.msra.mxu1 %v4891_v41  ;;  %1902 = vmatprep.mubr.f32.mxu1 %v6179_v49  ;;  %v888_v49 = vld [vmem:[%s7982_s23 + $0x4e8] sm:$0xff]  ;;  %v4909_v41 = vpack.c.bf16 %v898_v33, %v894_v32  ;;  %v914_v62 = vld [vmem:[%s7982_s23 + $0x5b8] sm:$0xff]  ;;  %v909_v3 = vld [vmem:[%s7982_s23 + $0x590] sm:$0xff] }
  0x7c   : > { %1265 = vmatmul.mubr.f32.gmra.mrb[2].mxu0 %v626_v52  ;;  %4894 = vmatprep.subr.bf16.mxu1 %v4893_v48  ;;  %v4709_v10 = vpack.c.bf16 %v888_v49, %v884_v0  ;;  %v4911_v48 = vpack.c.bf16 %v897_v40, %v893_v39  ;;  %v915_v0 = vld [vmem:[%s7982_s23 + $0x5c0] sm:$0xff]  ;;  %v913_v5 = vld [vmem:[%s7982_s23 + $0x5b0] sm:$0xff]  ;;  %v928_v8 = vld [vmem:[%s7982_s23 + $0x628] sm:$0xff] }
  0x7d   : > { %4704 = vmatpush1.bf16.msra.mxu0 %v4703_v53  ;;  %1270 = vmatprep.mubr.f32.mxu0 %v634_v59  ;;  %v4721_v53 = vpack.c.bf16 %v912_v43, %v908_v42  ;;  %v919_v49 = vld [vmem:[%s7982_s23 + $0x5e0] sm:$0xff]  ;;  %v918_v11 = vld [vmem:[%s7982_s23 + $0x5d8] sm:$0xff]  ;;  %v917_v18 = vld [vmem:[%s7982_s23 + $0x5d0] sm:$0xff] }
  0x7e   : > { %1903 = vmatmul.mubr.f32.vlgmr.msra.gmra.mrb[32].mxu1 %v619_v36  ;;  %4706 = vmatprep.subr.bf16.mxu0 %v4705_v60  ;;  %v903_v36 = vld [vmem:[%s7982_s23 + $0x560] sm:$0xff]  ;;  %v4723_v60 = vpack.c.bf16 %v911_v51, %v907_v50  ;;  %v922_v12 = vld [vmem:[%s7982_s23 + $0x5f8] sm:$0xff]  ;;  %v921_v19 = vld [vmem:[%s7982_s23 + $0x5f0] sm:$0xff] }
  0x7f   : > { %4896 = vmatpush1.bf16.msra.mxu1 %v4895_v56  ;;  %1908 = vmatprep.mubr.f32.mxu1 %v627_v44  ;;  %v654_v44 = vld [vmem:[%s5829_s29 + $0x118] sm:$0xff]  ;;  %v4719_v45 = vpack.c.bf16 %v903_v36, %v899_v35  ;;  %v4913_v56 = vpack.c.bf16 %v906_v47, %v902_v46  ;;  %v923_v14 = vld [vmem:[%s7982_s23 + $0x600] sm:$0xff]  ;;  %v932_v21 = vld [vmem:[%s7982_s23 + $0x648] sm:$0xff] }
  0x80   : > { %1271 = vmatmul.mubr.f32.gmra.mrb[4].mxu0 %v633_v1  ;;  %4898 = vmatprep.subr.bf16.mxu1 %v4897_v63  ;;  %v4915_v63 = vpack.c.bf16 %v905_v55, %v901_v54  ;;  %v927_v15 = vld [vmem:[%s7982_s23 + $0x620] sm:$0xff]  ;;  %v936_v22 = vld [vmem:[%s7982_s23 + $0x668] sm:$0xff]  ;;  %v926_v25 = vld [vmem:[%s7982_s23 + $0x618] sm:$0xff] }
  0x81   : > { %4708 = vmatpush1.bf16.msra.mxu0 %v4707_v2  ;;  %1276 = vmatprep.mubr.f32.mxu0 %v641_v9  ;;  %v4725_v2 = vpack.c.bf16 %v920_v58, %v916_v57  ;;  %v930_v26 = vld [vmem:[%s7982_s23 + $0x638] sm:$0xff]  ;;  %v931_v28 = vld [vmem:[%s7982_s23 + $0x640] sm:$0xff]  ;;  %v925_v32 = vld [vmem:[%s7982_s23 + $0x610] sm:$0xff] }
  0x82   : > { %1909 = vmatmul.mubr.f32.gmra.mrb[34].mxu1 %v626_v52  ;;  %4710 = vmatprep.subr.bf16.mxu0 %v4709_v10  ;;  %v662_v52 = vld [vmem:[%s5829_s29 + $0x158] sm:$0xff]  ;;  %v4727_v10 = vpack.c.bf16 %v919_v49, %v915_v0  ;;  %v935_v29 = vld [vmem:[%s7982_s23 + $0x660] sm:$0xff]  ;;  %v929_v33 = vld [vmem:[%s7982_s23 + $0x630] sm:$0xff] }
  0x83   : > { %4900 = vmatpush1.bf16.msra.mxu1 %v4899_v6  ;;  %1914 = vmatprep.mubr.f32.mxu1 %v634_v59  ;;  %v661_v59 = vld [vmem:[%s5829_s29 + $0x150] sm:$0xff]  ;;  %v4917_v6 = vpack.c.bf16 %v914_v62, %v910_v61  ;;  %v940_v35 = vld [vmem:[%s7982_s23 + $0x688] sm:$0xff]  ;;  %v934_v39 = vld [vmem:[%s7982_s23 + $0x658] sm:$0xff] }
  0x84   : > { %1277 = vmatmul.mubr.f32.gmra.mrb[6].mxu0 %v640_v16  ;;  %4902 = vmatprep.subr.bf16.mxu1 %v4901_v13  ;;  %v4919_v13 = vpack.c.bf16 %v913_v5, %v909_v3  ;;  %v944_v36 = vld [vmem:[%s7982_s23 + $0x6a8] sm:$0xff]  ;;  %v938_v40 = vld [vmem:[%s7982_s23 + $0x678] sm:$0xff]  ;;  %v939_v42 = vld [vmem:[%s7982_s23 + $0x680] sm:$0xff] }
  0x85   : > { %4712 = vmatpush1.bf16.msra.mxu0 %v4711_v17  ;;  %1282 = vmatprep.mubr.f32.mxu0 %v648_v23  ;;  %v4729_v17 = vpack.c.bf16 %v928_v8, %v924_v7  ;;  %v943_v43 = vld [vmem:[%s7982_s23 + $0x6a0] sm:$0xff]  ;;  %v933_v46 = vld [vmem:[%s7982_s23 + $0x650] sm:$0xff]  ;;  %v948_v50 = vld [vmem:[%s7982_s23 + $0x6c8] sm:$0xff] }
  0x86   : > { %1915 = vmatmul.mubr.f32.gmra.mrb[36].mxu1 %v633_v1  ;;  %4714 = vmatprep.subr.bf16.mxu0 %v4713_v24  ;;  %v669_v1 = vld [vmem:[%s5829_s29 + $0x190] sm:$0xff]  ;;  %v4731_v24 = vpack.c.bf16 %v927_v15, %v923_v14  ;;  %v952_v51 = vld [vmem:[%s7982_s23 + $0x6e8] sm:$0xff]  ;;  %v942_v54 = vld [vmem:[%s7982_s23 + $0x698] sm:$0xff] }
  0x87   : > { %4904 = vmatpush1.bf16.msra.mxu1 %v4903_v20  ;;  %1920 = vmatprep.mubr.f32.mxu1 %v641_v9  ;;  %v668_v9 = vld [vmem:[%s5829_s29 + $0x188] sm:$0xff]  ;;  %v4921_v20 = vpack.c.bf16 %v922_v12, %v918_v11  ;;  %v937_v47 = vld [vmem:[%s7982_s23 + $0x670] sm:$0xff]  ;;  %v946_v55 = vld [vmem:[%s7982_s23 + $0x6b8] sm:$0xff] }
  0x88   : > { %1283 = vmatmul.mubr.f32.gmra.mrb[8].mxu0 %v647_v30  ;;  %4906 = vmatprep.subr.bf16.mxu1 %v4905_v27  ;;  %v4923_v27 = vpack.c.bf16 %v921_v19, %v917_v18  ;;  %v947_v57 = vld [vmem:[%s7982_s23 + $0x6c0] sm:$0xff]  ;;  %v941_v61 = vld [vmem:[%s7982_s23 + $0x690] sm:$0xff]  ;;  %v956_v0 = vld [vmem:[%s7982_s23 + $0x708] sm:$0xff] }
  0x89   : > { %4716 = vmatpush1.bf16.msra.mxu0 %v4715_v31  ;;  %1288 = vmatprep.mubr.f32.mxu0 %v655_v37  ;;  %v4733_v31 = vpack.c.bf16 %v936_v22, %v932_v21  ;;  %v951_v58 = vld [vmem:[%s7982_s23 + $0x6e0] sm:$0xff]  ;;  %v945_v62 = vld [vmem:[%s7982_s23 + $0x6b0] sm:$0xff]  ;;  %v960_v49 = vld [vmem:[%s7982_s23 + $0x728] sm:$0xff] }
  0x8a   : > { %1921 = vmatmul.mubr.f32.gmra.mrb[38].mxu1 %v640_v16  ;;  %4718 = vmatprep.subr.bf16.mxu0 %v4717_v38  ;;  %v676_v16 = vld [vmem:[%s5829_s29 + $0x1c8] sm:$0xff]  ;;  %v4735_v38 = vpack.c.bf16 %v935_v29, %v931_v28  ;;  %v950_v3 = vld [vmem:[%s7982_s23 + $0x6d8] sm:$0xff]  ;;  %v955_v7 = vld [vmem:[%s7982_s23 + $0x700] sm:$0xff] }
  0x8b   : > { %4908 = vmatpush1.bf16.msra.mxu1 %v4907_v34  ;;  %1926 = vmatprep.mubr.f32.mxu1 %v648_v23  ;;  %v675_v23 = vld [vmem:[%s5829_s29 + $0x1c0] sm:$0xff]  ;;  %v4925_v34 = vpack.c.bf16 %v930_v26, %v926_v25  ;;  %v954_v5 = vld [vmem:[%s7982_s23 + $0x6f8] sm:$0xff]  ;;  %v949_v11 = vld [vmem:[%s7982_s23 + $0x6d0] sm:$0xff] }
  0x8c   : > { %1289 = vmatmul.mubr.f32.gmra.mrb[10].mxu0 %v654_v44  ;;  %4910 = vmatprep.subr.bf16.mxu1 %v4909_v41  ;;  %v4927_v41 = vpack.c.bf16 %v929_v33, %v925_v32  ;;  %v959_v8 = vld [vmem:[%s7982_s23 + $0x720] sm:$0xff]  ;;  %v953_v12 = vld [vmem:[%s7982_s23 + $0x6f0] sm:$0xff]  ;;  %v964_v14 = vld [vmem:[%s7982_s23 + $0x748] sm:$0xff] }
  0x8d   : > { %4720 = vmatpush1.bf16.msra.mxu0 %v4719_v45  ;;  %1294 = vmatprep.mubr.f32.mxu0 %v662_v52  ;;  %v4737_v45 = vpack.c.bf16 %v944_v36, %v940_v35  ;;  %v968_v15 = vld [vmem:[%s7982_s23 + $0x768] sm:$0xff]  ;;  %v958_v18 = vld [vmem:[%s7982_s23 + $0x718] sm:$0xff]  ;;  %v963_v21 = vld [vmem:[%s7982_s23 + $0x740] sm:$0xff] }
  0x8e   : > { %1927 = vmatmul.mubr.f32.gmra.mrb[40].mxu1 %v647_v30  ;;  %4722 = vmatprep.subr.bf16.mxu0 %v4721_v53  ;;  %v683_v30 = vld [vmem:[%s5829_s29 + $0x200] sm:$0xff]  ;;  %v4739_v53 = vpack.c.bf16 %v943_v43, %v939_v42  ;;  %v962_v19 = vld [vmem:[%s7982_s23 + $0x738] sm:$0xff]  ;;  %v957_v25 = vld [vmem:[%s7982_s23 + $0x710] sm:$0xff] }
  0x8f   : > { %4912 = vmatpush1.bf16.msra.mxu1 %v4911_v48  ;;  %1932 = vmatprep.mubr.f32.mxu1 %v655_v37  ;;  %v682_v37 = vld [vmem:[%s5829_s29 + $0x1f8] sm:$0xff]  ;;  %v4929_v48 = vpack.c.bf16 %v938_v40, %v934_v39  ;;  %v967_v22 = vld [vmem:[%s7982_s23 + $0x760] sm:$0xff]  ;;  %v961_v26 = vld [vmem:[%s7982_s23 + $0x730] sm:$0xff] }
  0x90   : > { %1295 = vmatmul.mubr.f32.gmra.mrb[12].mxu0 %v661_v59  ;;  %4914 = vmatprep.subr.bf16.mxu1 %v4913_v56  ;;  %v4931_v56 = vpack.c.bf16 %v937_v47, %v933_v46  ;;  %v972_v28 = vld [vmem:[%s7982_s23 + $0x788] sm:$0xff]  ;;  %v966_v32 = vld [vmem:[%s7982_s23 + $0x758] sm:$0xff]  ;;  %v971_v35 = vld [vmem:[%s7982_s23 + $0x780] sm:$0xff] }
  0x91   : > { %4724 = vmatpush1.bf16.msra.mxu0 %v4723_v60  ;;  %1300 = vmatprep.mubr.f32.mxu0 %v669_v1  ;;  %v4741_v60 = vpack.c.bf16 %v952_v51, %v948_v50  ;;  %v976_v29 = vld [vmem:[%s7982_s23 + $0x7a8] sm:$0xff]  ;;  %v970_v33 = vld [vmem:[%s7982_s23 + $0x778] sm:$0xff]  ;;  %v975_v36 = vld [vmem:[%s7982_s23 + $0x7a0] sm:$0xff] }
  0x92   : > { %1933 = vmatmul.mubr.f32.gmra.mrb[42].mxu1 %v654_v44  ;;  %4726 = vmatprep.subr.bf16.mxu0 %v4725_v2  ;;  %v690_v44 = vld [vmem:[%s5829_s29 + $0x238] sm:$0xff]  ;;  %v4743_v2 = vpack.c.bf16 %v951_v58, %v947_v57  ;;  %v965_v39 = vld [vmem:[%s7982_s23 + $0x750] sm:$0xff]  ;;  %v980_v42 = vld [vmem:[%s7982_s23 + $0x7c8] sm:$0xff] }
  0x93   : > { %4916 = vmatpush1.bf16.msra.mxu1 %v4915_v63  ;;  %1938 = vmatprep.mubr.f32.mxu1 %v662_v52  ;;  %v689_v52 = vld [vmem:[%s5829_s29 + $0x230] sm:$0xff]  ;;  %v4933_v63 = vpack.c.bf16 %v946_v55, %v942_v54  ;;  %v984_v43 = vld [vmem:[%s7982_s23 + $0x7e8] sm:$0xff]  ;;  %v974_v46 = vld [vmem:[%s7982_s23 + $0x798] sm:$0xff] }
  0x94   : > { %1301 = vmatmul.mubr.f32.gmra.mrb[14].mxu0 %v668_v9  ;;  %4918 = vmatprep.subr.bf16.mxu1 %v4917_v6  ;;  %v4935_v6 = vpack.c.bf16 %v945_v62, %v941_v61  ;;  %v969_v40 = vld [vmem:[%s7982_s23 + $0x770] sm:$0xff]  ;;  %v978_v47 = vld [vmem:[%s7982_s23 + $0x7b8] sm:$0xff]  ;;  %v979_v50 = vld [vmem:[%s7982_s23 + $0x7c0] sm:$0xff] }
  0x95   : > { %4728 = vmatpush1.bf16.msra.mxu0 %v4727_v10  ;;  %1306 = vmatprep.mubr.f32.mxu0 %v676_v16  ;;  %v4745_v10 = vpack.c.bf16 %v960_v49, %v956_v0  ;;  %v983_v51 = vld [vmem:[%s7982_s23 + $0x7e0] sm:$0xff]  ;;  %v973_v54 = vld [vmem:[%s7982_s23 + $0x790] sm:$0xff]  ;;  %v988_v57 = vld [vmem:[%s7982_s23 + $0x808] sm:$0xff] }
  0x96   : > { %1939 = vmatmul.mubr.f32.gmra.mrb[44].mxu1 %v661_v59  ;;  %4730 = vmatprep.subr.bf16.mxu0 %v4729_v17  ;;  %v697_v59 = vld [vmem:[%s5829_s29 + $0x270] sm:$0xff]  ;;  %v4747_v17 = vpack.c.bf16 %v959_v8, %v955_v7  ;;  %v992_v58 = vld [vmem:[%s7982_s23 + $0x828] sm:$0xff]  ;;  %v982_v61 = vld [vmem:[%s7982_s23 + $0x7d8] sm:$0xff] }
  0x97   : > { %4920 = vmatpush1.bf16.msra.mxu1 %v4919_v13  ;;  %1944 = vmatprep.mubr.f32.mxu1 %v669_v1  ;;  %v696_v1 = vld [vmem:[%s5829_s29 + $0x268] sm:$0xff]  ;;  %v4937_v13 = vpack.c.bf16 %v954_v5, %v950_v3  ;;  %v977_v55 = vld [vmem:[%s7982_s23 + $0x7b0] sm:$0xff]  ;;  %v986_v62 = vld [vmem:[%s7982_s23 + $0x7f8] sm:$0xff] }
  0x98   : > { %1307 = vmatmul.mubr.f32.gmra.mrb[16].mxu0 %v675_v23  ;;  %4922 = vmatprep.subr.bf16.mxu1 %v4921_v20  ;;  %v4939_v20 = vpack.c.bf16 %v953_v12, %v949_v11  ;;  %v987_v0 = vld [vmem:[%s7982_s23 + $0x800] sm:$0xff]  ;;  %v981_v3 = vld [vmem:[%s7982_s23 + $0x7d0] sm:$0xff]  ;;  %v996_v7 = vld [vmem:[%s7982_s23 + $0x848] sm:$0xff] }
  0x99   : > { %4732 = vmatpush1.bf16.msra.mxu0 %v4731_v24  ;;  %1312 = vmatprep.mubr.f32.mxu0 %v683_v30  ;;  %v4749_v24 = vpack.c.bf16 %v968_v15, %v964_v14  ;;  %v991_v49 = vld [vmem:[%s7982_s23 + $0x820] sm:$0xff]  ;;  %v985_v5 = vld [vmem:[%s7982_s23 + $0x7f0] sm:$0xff]  ;;  %v1000_v8 = vld [vmem:[%s7982_s23 + $0x868] sm:$0xff] }
  0x9a   : > { %1945 = vmatmul.mubr.f32.gmra.mrb[46].mxu1 %v668_v9  ;;  %4734 = vmatprep.subr.bf16.mxu0 %v4733_v31  ;;  %v704_v9 = vld [vmem:[%s5829_s29 + $0x2a8] sm:$0xff]  ;;  %v4751_v31 = vpack.c.bf16 %v967_v22, %v963_v21  ;;  %v990_v11 = vld [vmem:[%s7982_s23 + $0x818] sm:$0xff]  ;;  %v995_v14 = vld [vmem:[%s7982_s23 + $0x840] sm:$0xff] }
  0x9b   : > { %4924 = vmatpush1.bf16.msra.mxu1 %v4923_v27  ;;  %1950 = vmatprep.mubr.f32.mxu1 %v676_v16  ;;  %v703_v16 = vld [vmem:[%s5829_s29 + $0x2a0] sm:$0xff]  ;;  %v4941_v27 = vpack.c.bf16 %v962_v19, %v958_v18  ;;  %v994_v12 = vld [vmem:[%s7982_s23 + $0x838] sm:$0xff]  ;;  %v989_v18 = vld [vmem:[%s7982_s23 + $0x810] sm:$0xff] }
  0x9c   : > { %1313 = vmatmul.mubr.f32.gmra.mrb[18].mxu0 %v682_v37  ;;  %4926 = vmatprep.subr.bf16.mxu1 %v4925_v34  ;;  %v4943_v34 = vpack.c.bf16 %v961_v26, %v957_v25  ;;  %v999_v15 = vld [vmem:[%s7982_s23 + $0x860] sm:$0xff]  ;;  %v993_v19 = vld [vmem:[%s7982_s23 + $0x830] sm:$0xff]  ;;  %v1004_v21 = vld [vmem:[%s7982_s23 + $0x888] sm:$0xff] }
  0x9d   : > { %4736 = vmatpush1.bf16.msra.mxu0 %v4735_v38  ;;  %1318 = vmatprep.mubr.f32.mxu0 %v690_v44  ;;  %v4753_v38 = vpack.c.bf16 %v976_v29, %v972_v28  ;;  %v1008_v22 = vld [vmem:[%s7982_s23 + $0x8a8] sm:$0xff]  ;;  %v998_v25 = vld [vmem:[%s7982_s23 + $0x858] sm:$0xff]  ;;  %v1003_v28 = vld [vmem:[%s7982_s23 + $0x880] sm:$0xff] }
  0x9e   : > { %1951 = vmatmul.mubr.f32.gmra.mrb[48].mxu1 %v675_v23  ;;  %4738 = vmatprep.subr.bf16.mxu0 %v4737_v45  ;;  %v711_v23 = vld [vmem:[%s5829_s29 + $0x2e0] sm:$0xff]  ;;  %v4755_v45 = vpack.c.bf16 %v975_v36, %v971_v35  ;;  %v1002_v26 = vld [vmem:[%s7982_s23 + $0x878] sm:$0xff]  ;;  %v1012_v35 = vld [vmem:[%s7982_s23 + $0x8c8] sm:$0xff] }
  0x9f   : > { %4928 = vmatpush1.bf16.msra.mxu1 %v4927_v41  ;;  %1956 = vmatprep.mubr.f32.mxu1 %v683_v30  ;;  %v710_v30 = vld [vmem:[%s5829_s29 + $0x2d8] sm:$0xff]  ;;  %v4945_v41 = vpack.c.bf16 %v970_v33, %v966_v32  ;;  %v1007_v29 = vld [vmem:[%s7982_s23 + $0x8a0] sm:$0xff]  ;;  %v997_v32 = vld [vmem:[%s7982_s23 + $0x850] sm:$0xff] }
  0xa0   : > { %1319 = vmatmul.mubr.f32.gmra.mrb[20].mxu0 %v689_v52  ;;  %4930 = vmatprep.subr.bf16.mxu1 %v4929_v48  ;;  %v4947_v48 = vpack.c.bf16 %v969_v40, %v965_v39  ;;  %v1001_v33 = vld [vmem:[%s7982_s23 + $0x870] sm:$0xff]  ;;  %v1016_v36 = vld [vmem:[%s7982_s23 + $0x8e8] sm:$0xff]  ;;  %v1006_v39 = vld [vmem:[%s7982_s23 + $0x898] sm:$0xff] }
  0xa1   : > { %4740 = vmatpush1.bf16.msra.mxu0 %v4739_v53  ;;  %1324 = vmatprep.mubr.f32.mxu0 %v697_v59  ;;  %v4757_v53 = vpack.c.bf16 %v984_v43, %v980_v42  ;;  %v1010_v40 = vld [vmem:[%s7982_s23 + $0x8b8] sm:$0xff]  ;;  %v1011_v42 = vld [vmem:[%s7982_s23 + $0x8c0] sm:$0xff] }
  0xa2   : > { %1957 = vmatmul.mubr.f32.gmra.mrb[50].mxu1 %v682_v37  ;;  %4742 = vmatprep.subr.bf16.mxu0 %v4741_v60  ;;  %v718_v37 = vld [vmem:[%s5829_s29 + $0x318] sm:$0xff]  ;;  %v4759_v60 = vpack.c.bf16 %v983_v51, %v979_v50  ;;  %v1015_v43 = vld [vmem:[%s7982_s23 + $0x8e0] sm:$0xff]  ;;  %v1020_v50 = vld [vmem:[%s7982_s23 + $0x908] sm:$0xff] }
  0xa3   : > { %4932 = vmatpush1.bf16.msra.mxu1 %v4931_v56  ;;  %1962 = vmatprep.mubr.f32.mxu1 %v690_v44  ;;  %v717_v44 = vld [vmem:[%s5829_s29 + $0x310] sm:$0xff]  ;;  %v4949_v56 = vpack.c.bf16 %v978_v47, %v974_v46  ;;  %v1024_v51 = vld [vmem:[%s7982_s23 + $0x928] sm:$0xff] }
  0xa4   : > { %1325 = vmatmul.mubr.f32.gmra.mrb[22].mxu0 %v696_v1  ;;  %4934 = vmatprep.subr.bf16.mxu1 %v4933_v63  ;;  %v4951_v63 = vpack.c.bf16 %v977_v55, %v973_v54  ;;  %v1005_v46 = vld [vmem:[%s7982_s23 + $0x890] sm:$0xff]  ;;  %v1014_v54 = vld [vmem:[%s7982_s23 + $0x8d8] sm:$0xff] }
  0xa5   : > { %4744 = vmatpush1.bf16.msra.mxu0 %v4743_v2  ;;  %1330 = vmatprep.mubr.f32.mxu0 %v704_v9  ;;  %v4761_v2 = vpack.c.bf16 %v992_v58, %v988_v57  ;;  %v1009_v47 = vld [vmem:[%s7982_s23 + $0x8b0] sm:$0xff]  ;;  %v1018_v55 = vld [vmem:[%s7982_s23 + $0x8f8] sm:$0xff]  ;;  %v1019_v57 = vld [vmem:[%s7982_s23 + $0x900] sm:$0xff] }
  0xa6   : > { %1963 = vmatmul.mubr.f32.gmra.mrb[52].mxu1 %v689_v52  ;;  %4746 = vmatprep.subr.bf16.mxu0 %v4745_v10  ;;  %v725_v52 = vld [vmem:[%s5829_s29 + $0x350] sm:$0xff]  ;;  %v4763_v10 = vpack.c.bf16 %v991_v49, %v987_v0  ;;  %v1023_v58 = vld [vmem:[%s7982_s23 + $0x920] sm:$0xff]  ;;  %v1028_v0 = vld [vmem:[%s7982_s23 + $0x948] sm:$0xff] }
  0xa7   : > { %4936 = vmatpush1.bf16.msra.mxu1 %v4935_v6  ;;  %1968 = vmatprep.mubr.f32.mxu1 %v697_v59  ;;  %v724_v59 = vld [vmem:[%s5829_s29 + $0x348] sm:$0xff]  ;;  %v4953_v6 = vpack.c.bf16 %v986_v62, %v982_v61  ;;  %v1013_v61 = vld [vmem:[%s7982_s23 + $0x8d0] sm:$0xff] }
  0xa8   : > { %1331 = vmatmul.mubr.f32.gmra.mrb[24].mxu0 %v703_v16  ;;  %4938 = vmatprep.subr.bf16.mxu1 %v4937_v13  ;;  %v4955_v13 = vpack.c.bf16 %v985_v5, %v981_v3  ;;  %v1017_v62 = vld [vmem:[%s7982_s23 + $0x8f0] sm:$0xff]  ;;  %v1032_v49 = vld [vmem:[%s7982_s23 + $0x968] sm:$0xff]  ;;  %v1022_v3 = vld [vmem:[%s7982_s23 + $0x918] sm:$0xff] }
  0xa9   : > { %4748 = vmatpush1.bf16.msra.mxu0 %v4747_v17  ;;  %1336 = vmatprep.mubr.f32.mxu0 %v711_v23  ;;  %v4765_v17 = vpack.c.bf16 %v1000_v8, %v996_v7  ;;  %v1026_v5 = vld [vmem:[%s7982_s23 + $0x938] sm:$0xff]  ;;  %v1027_v7 = vld [vmem:[%s7982_s23 + $0x940] sm:$0xff] }
  0xaa   : > { %1969 = vmatmul.mubr.f32.gmra.mrb[54].mxu1 %v696_v1  ;;  %4750 = vmatprep.subr.bf16.mxu0 %v4749_v24  ;;  %v622_v1 = vld [vmem:[%s5829_s29 + $0x18] sm:$0xff]  ;;  %v4767_v24 = vpack.c.bf16 %v999_v15, %v995_v14  ;;  %v1031_v8 = vld [vmem:[%s7982_s23 + $0x960] sm:$0xff]  ;;  %v1036_v14 = vld [vmem:[%s7982_s23 + $0x988] sm:$0xff] }
  0xab   : > { %4940 = vmatpush1.bf16.msra.mxu1 %v4939_v20  ;;  %1974 = vmatprep.mubr.f32.mxu1 %v704_v9  ;;  %v621_v9 = vld [vmem:[%s5829_s29 + $0x10] sm:$0xff]  ;;  %v4957_v20 = vpack.c.bf16 %v994_v12, %v990_v11  ;;  %v1040_v15 = vld [vmem:[%s7982_s23 + $0x9a8] sm:$0xff] }
  0xac   : > { %1337 = vmatmul.mubr.f32.gmra.mrb[26].mxu0 %v710_v30  ;;  %4942 = vmatprep.subr.bf16.mxu1 %v4941_v27  ;;  %v4959_v27 = vpack.c.bf16 %v993_v19, %v989_v18  ;;  %v1021_v11 = vld [vmem:[%s7982_s23 + $0x910] sm:$0xff]  ;;  %v1030_v18 = vld [vmem:[%s7982_s23 + $0x958] sm:$0xff] }
  0xad   : > { %4752 = vmatpush1.bf16.msra.mxu0 %v4751_v31  ;;  %1342 = vmatprep.mubr.f32.mxu0 %v718_v37  ;;  %v4769_v31 = vpack.c.bf16 %v1008_v22, %v1004_v21  ;;  %v1025_v12 = vld [vmem:[%s7982_s23 + $0x930] sm:$0xff]  ;;  %v1034_v19 = vld [vmem:[%s7982_s23 + $0x978] sm:$0xff]  ;;  %v1035_v21 = vld [vmem:[%s7982_s23 + $0x980] sm:$0xff] }
  0xae   : > { %1975 = vmatmul.mubr.f32.gmra.mrb[56].mxu1 %v703_v16  ;;  %4754 = vmatprep.subr.bf16.mxu0 %v4753_v38  ;;  %v629_v16 = vld [vmem:[%s5829_s29 + $0x50] sm:$0xff]  ;;  %v4771_v38 = vpack.c.bf16 %v1007_v29, %v1003_v28  ;;  %v1039_v22 = vld [vmem:[%s7982_s23 + $0x9a0] sm:$0xff]  ;;  %v1044_v28 = vld [vmem:[%s7982_s23 + $0x9c8] sm:$0xff] }
  0xaf   : > { %4944 = vmatpush1.bf16.msra.mxu1 %v4943_v34  ;;  %1980 = vmatprep.mubr.f32.mxu1 %v711_v23  ;;  %v628_v23 = vld [vmem:[%s5829_s29 + $0x48] sm:$0xff]  ;;  %v4961_v34 = vpack.c.bf16 %v1002_v26, %v998_v25  ;;  %v1029_v25 = vld [vmem:[%s7982_s23 + $0x950] sm:$0xff] }
  0xb0   : > { %1343 = vmatmul.mubr.f32.gmra.mrb[28].mxu0 %v717_v44  ;;  %4946 = vmatprep.subr.bf16.mxu1 %v4945_v41  ;;  %v4963_v41 = vpack.c.bf16 %v1001_v33, %v997_v32  ;;  %v1033_v26 = vld [vmem:[%s7982_s23 + $0x970] sm:$0xff]  ;;  %v1048_v29 = vld [vmem:[%s7982_s23 + $0x9e8] sm:$0xff]  ;;  %v1038_v32 = vld [vmem:[%s7982_s23 + $0x998] sm:$0xff] }
  0xb1   : > { %4756 = vmatpush1.bf16.msra.mxu0 %v4755_v45  ;;  %1348 = vmatprep.mubr.f32.mxu0 %v725_v52  ;;  %v4773_v45 = vpack.c.bf16 %v1016_v36, %v1012_v35  ;;  %v1042_v33 = vld [vmem:[%s7982_s23 + $0x9b8] sm:$0xff]  ;;  %v1043_v35 = vld [vmem:[%s7982_s23 + $0x9c0] sm:$0xff] }
  0xb2   : > { %1981 = vmatmul.mubr.f32.gmra.mrb[58].mxu1 %v710_v30  ;;  %4758 = vmatprep.subr.bf16.mxu0 %v4757_v53  ;;  %v636_v30 = vld [vmem:[%s5829_s29 + $0x88] sm:$0xff]  ;;  %v4775_v53 = vpack.c.bf16 %v1015_v43, %v1011_v42  ;;  %v1047_v36 = vld [vmem:[%s7982_s23 + $0x9e0] sm:$0xff] }
  0xb3   : > { %4948 = vmatpush1.bf16.msra.mxu1 %v4947_v48  ;;  %1986 = vmatprep.mubr.f32.mxu1 %v718_v37  ;;  %v635_v37 = vld [vmem:[%s5829_s29 + $0x80] sm:$0xff]  ;;  %v4965_v48 = vpack.c.bf16 %v1010_v40, %v1006_v39  ;;  %v1037_v39 = vld [vmem:[%s7982_s23 + $0x990] sm:$0xff]  ;;  %v1052_v42 = vld [vmem:[%s7982_s23 + $0xa08] sm:$0xff] }
  0xb4   : > { %1349 = vmatmul.mubr.f32.gmra.mrb[30].mxu0 %v724_v59  ;;  %4950 = vmatprep.subr.bf16.mxu1 %v4949_v56  ;;  %v4967_v56 = vpack.c.bf16 %v1009_v47, %v1005_v46  ;;  %v1041_v40 = vld [vmem:[%s7982_s23 + $0x9b0] sm:$0xff]  ;;  %v1056_v43 = vld [vmem:[%s7982_s23 + $0xa28] sm:$0xff]  ;;  %v1046_v46 = vld [vmem:[%s7982_s23 + $0x9d8] sm:$0xff] }
  0xb5   : > { %4760 = vmatpush1.bf16.msra.mxu0 %v4759_v60  ;;  %1419 = vmatprep.mubr.f32.mxu0 %v622_v1  ;;  %v4777_v60 = vpack.c.bf16 %v1024_v51, %v1020_v50  ;;  %v1050_v47 = vld [vmem:[%s7982_s23 + $0x9f8] sm:$0xff]  ;;  %v1051_v50 = vld [vmem:[%s7982_s23 + $0xa00] sm:$0xff] }
  0xb6   : > { %1987 = vmatmul.mubr.f32.gmra.mrb[60].mxu1 %v717_v44  ;;  %4762 = vmatprep.subr.bf16.mxu0 %v4761_v2  ;;  %v643_v44 = vld [vmem:[%s5829_s29 + $0xc0] sm:$0xff]  ;;  %v4779_v2 = vpack.c.bf16 %v1023_v58, %v1019_v57  ;;  %v1060_v57 = vld [vmem:[%s7982_s23 + $0xa48] sm:$0xff] }
  0xb7   : > { %4952 = vmatpush1.bf16.msra.mxu1 %v4951_v63  ;;  %1992 = vmatprep.mubr.f32.mxu1 %v725_v52  ;;  %v642_v52 = vld [vmem:[%s5829_s29 + $0xb8] sm:$0xff]  ;;  %v4969_v63 = vpack.c.bf16 %v1018_v55, %v1014_v54  ;;  %v1055_v51 = vld [vmem:[%s7982_s23 + $0xa20] sm:$0xff]  ;;  %v1045_v54 = vld [vmem:[%s7982_s23 + $0x9d0] sm:$0xff] }
  0xb8   : > { %1420 = vmatmul.mubr.f32.vlgmr.msra.gmra.mrb[0].mxu0 %v621_v9  ;;  %4954 = vmatprep.subr.bf16.mxu1 %v4953_v6  ;;  %v4971_v6 = vpack.c.bf16 %v1017_v62, %v1013_v61  ;;  %v1049_v55 = vld [vmem:[%s7982_s23 + $0x9f0] sm:$0xff]  ;;  %v1064_v58 = vld [vmem:[%s7982_s23 + $0xa68] sm:$0xff]  ;;  %v1054_v61 = vld [vmem:[%s7982_s23 + $0xa18] sm:$0xff] }
  0xb9   : > { %4764 = vmatpush1.bf16.msra.mxu0 %v4763_v10  ;;  %1425 = vmatprep.mubr.f32.mxu0 %v629_v16  ;;  %v4781_v10 = vpack.c.bf16 %v1032_v49, %v1028_v0  ;;  %v1058_v62 = vld [vmem:[%s7982_s23 + $0xa38] sm:$0xff]  ;;  %v1059_v0 = vld [vmem:[%s7982_s23 + $0xa40] sm:$0xff] }
  0xba   : > { %1993 = vmatmul.mubr.f32.gmra.mrb[62].mxu1 %v724_v59  ;;  %4766 = vmatprep.subr.bf16.mxu0 %v4765_v17  ;;  %v650_v59 = vld [vmem:[%s5829_s29 + $0xf8] sm:$0xff]  ;;  %v4783_v17 = vpack.c.bf16 %v1031_v8, %v1027_v7  ;;  %v1063_v49 = vld [vmem:[%s7982_s23 + $0xa60] sm:$0xff]  ;;  %v1068_v7 = vld [vmem:[%s7982_s23 + $0xa88] sm:$0xff] }
  0xbb   : > { %4956 = vmatpush1.bf16.msra.mxu1 %v4955_v13  ;;  %2063 = vmatprep.mubr.f32.mxu1 %v622_v1  ;;  %v649_v1 = vld [vmem:[%s5829_s29 + $0xf0] sm:$0xff]  ;;  %v4973_v13 = vpack.c.bf16 %v1026_v5, %v1022_v3  ;;  %v1072_v8 = vld [vmem:[%s7982_s23 + $0xaa8] sm:$0xff] }
  0xbc   : > { %1426 = vmatmul.mubr.f32.gmra.mrb[2].mxu0 %v628_v23  ;;  %4958 = vmatprep.subr.bf16.mxu1 %v4957_v20  ;;  %v4975_v20 = vpack.c.bf16 %v1025_v12, %v1021_v11  ;;  %v1053_v3 = vld [vmem:[%s7982_s23 + $0xa10] sm:$0xff]  ;;  %v1062_v11 = vld [vmem:[%s7982_s23 + $0xa58] sm:$0xff] }
  0xbd   : > { %4768 = vmatpush1.bf16.msra.mxu0 %v4767_v24  ;;  %1431 = vmatprep.mubr.f32.mxu0 %v636_v30  ;;  %v4785_v24 = vpack.c.bf16 %v1040_v15, %v1036_v14  ;;  %v1057_v5 = vld [vmem:[%s7982_s23 + $0xa30] sm:$0xff]  ;;  %v1066_v12 = vld [vmem:[%s7982_s23 + $0xa78] sm:$0xff]  ;;  %v1067_v14 = vld [vmem:[%s7982_s23 + $0xa80] sm:$0xff] }
  0xbe   : > { %2064 = vmatmul.mubr.f32.vlgmr.msra.gmra.mrb[32].mxu1 %v621_v9  ;;  %4770 = vmatprep.subr.bf16.mxu0 %v4769_v31  ;;  %v657_v9 = vld [vmem:[%s5829_s29 + $0x130] sm:$0xff]  ;;  %v4787_v31 = vpack.c.bf16 %v1039_v22, %v1035_v21  ;;  %v1071_v15 = vld [vmem:[%s7982_s23 + $0xaa0] sm:$0xff]  ;;  %v1076_v21 = vld [vmem:[%s7982_s23 + $0xac8] sm:$0xff] }
  0xbf   : > { %4960 = vmatpush1.bf16.msra.mxu1 %v4959_v27  ;;  %2069 = vmatprep.mubr.f32.mxu1 %v629_v16  ;;  %v656_v16 = vld [vmem:[%s5829_s29 + $0x128] sm:$0xff]  ;;  %v4977_v27 = vpack.c.bf16 %v1034_v19, %v1030_v18  ;;  %v1061_v18 = vld [vmem:[%s7982_s23 + $0xa50] sm:$0xff] }
  0xc0   : > { %1432 = vmatmul.mubr.f32.gmra.mrb[4].mxu0 %v635_v37  ;;  %4962 = vmatprep.subr.bf16.mxu1 %v4961_v34  ;;  %v4979_v34 = vpack.c.bf16 %v1033_v26, %v1029_v25  ;;  %v1065_v19 = vld [vmem:[%s7982_s23 + $0xa70] sm:$0xff]  ;;  %v1080_v22 = vld [vmem:[%s7982_s23 + $0xae8] sm:$0xff]  ;;  %v1070_v25 = vld [vmem:[%s7982_s23 + $0xa98] sm:$0xff] }
  0xc1   : > { %4772 = vmatpush1.bf16.msra.mxu0 %v4771_v38  ;;  %1437 = vmatprep.mubr.f32.mxu0 %v643_v44  ;;  %v4789_v38 = vpack.c.bf16 %v1048_v29, %v1044_v28  ;;  %v1074_v26 = vld [vmem:[%s7982_s23 + $0xab8] sm:$0xff]  ;;  %v1075_v28 = vld [vmem:[%s7982_s23 + $0xac0] sm:$0xff] }
  0xc2   : > { %2070 = vmatmul.mubr.f32.gmra.mrb[34].mxu1 %v628_v23  ;;  %4774 = vmatprep.subr.bf16.mxu0 %v4773_v45  ;;  %v664_v23 = vld [vmem:[%s5829_s29 + $0x168] sm:$0xff]  ;;  %v4791_v45 = vpack.c.bf16 %v1047_v36, %v1043_v35  ;;  %v1079_v29 = vld [vmem:[%s7982_s23 + $0xae0] sm:$0xff] }
  0xc3   : > { %4964 = vmatpush1.bf16.msra.mxu1 %v4963_v41  ;;  %2075 = vmatprep.mubr.f32.mxu1 %v636_v30  ;;  %v663_v30 = vld [vmem:[%s5829_s29 + $0x160] sm:$0xff]  ;;  %v4981_v41 = vpack.c.bf16 %v1042_v33, %v1038_v32  ;;  %v1069_v32 = vld [vmem:[%s7982_s23 + $0xa90] sm:$0xff]  ;;  %v1084_v35 = vld [vmem:[%s7982_s23 + $0xb08] sm:$0xff] }
  0xc4   : > { %1438 = vmatmul.mubr.f32.gmra.mrb[6].mxu0 %v642_v52  ;;  %4966 = vmatprep.subr.bf16.mxu1 %v4965_v48  ;;  %v4983_v48 = vpack.c.bf16 %v1041_v40, %v1037_v39  ;;  %v1073_v33 = vld [vmem:[%s7982_s23 + $0xab0] sm:$0xff]  ;;  %v1088_v36 = vld [vmem:[%s7982_s23 + $0xb28] sm:$0xff]  ;;  %v1078_v39 = vld [vmem:[%s7982_s23 + $0xad8] sm:$0xff] }
  0xc5   : > { %4776 = vmatpush1.bf16.msra.mxu0 %v4775_v53  ;;  %1443 = vmatprep.mubr.f32.mxu0 %v650_v59  ;;  %v4793_v53 = vpack.c.bf16 %v1056_v43, %v1052_v42  ;;  %v1082_v40 = vld [vmem:[%s7982_s23 + $0xaf8] sm:$0xff]  ;;  %v1083_v42 = vld [vmem:[%s7982_s23 + $0xb00] sm:$0xff] }
  0xc6   : > { %2076 = vmatmul.mubr.f32.gmra.mrb[36].mxu1 %v635_v37  ;;  %4778 = vmatprep.subr.bf16.mxu0 %v4777_v60  ;;  %v671_v37 = vld [vmem:[%s5829_s29 + $0x1a0] sm:$0xff]  ;;  %v4795_v60 = vpack.c.bf16 %v1055_v51, %v1051_v50  ;;  %v1092_v50 = vld [vmem:[%s7982_s23 + $0xb48] sm:$0xff] }
  0xc7   : > { %4968 = vmatpush1.bf16.msra.mxu1 %v4967_v56  ;;  %2081 = vmatprep.mubr.f32.mxu1 %v643_v44  ;;  %v670_v44 = vld [vmem:[%s5829_s29 + $0x198] sm:$0xff]  ;;  %v4985_v56 = vpack.c.bf16 %v1050_v47, %v1046_v46  ;;  %v1087_v43 = vld [vmem:[%s7982_s23 + $0xb20] sm:$0xff]  ;;  %v1077_v46 = vld [vmem:[%s7982_s23 + $0xad0] sm:$0xff] }
  0xc8   : > { %1444 = vmatmul.mubr.f32.gmra.mrb[8].mxu0 %v649_v1  ;;  %4970 = vmatprep.subr.bf16.mxu1 %v4969_v63  ;;  %v4987_v63 = vpack.c.bf16 %v1049_v55, %v1045_v54  ;;  %v1081_v47 = vld [vmem:[%s7982_s23 + $0xaf0] sm:$0xff]  ;;  %v1096_v51 = vld [vmem:[%s7982_s23 + $0xb68] sm:$0xff]  ;;  %v1086_v54 = vld [vmem:[%s7982_s23 + $0xb18] sm:$0xff] }
  0xc9   : > { %4780 = vmatpush1.bf16.msra.mxu0 %v4779_v2  ;;  %1449 = vmatprep.mubr.f32.mxu0 %v657_v9  ;;  %v4797_v2 = vpack.c.bf16 %v1064_v58, %v1060_v57  ;;  %v1090_v55 = vld [vmem:[%s7982_s23 + $0xb38] sm:$0xff]  ;;  %v1091_v57 = vld [vmem:[%s7982_s23 + $0xb40] sm:$0xff] }
  0xca   : > { %2082 = vmatmul.mubr.f32.gmra.mrb[38].mxu1 %v642_v52  ;;  %4782 = vmatprep.subr.bf16.mxu0 %v4781_v10  ;;  %v678_v52 = vld [vmem:[%s5829_s29 + $0x1d8] sm:$0xff]  ;;  %v4799_v10 = vpack.c.bf16 %v1063_v49, %v1059_v0  ;;  %v1095_v58 = vld [vmem:[%s7982_s23 + $0xb60] sm:$0xff]  ;;  %v1100_v0 = vld [vmem:[%s7982_s23 + $0xb88] sm:$0xff] }
  0xcb   : > { %4972 = vmatpush1.bf16.msra.mxu1 %v4971_v6  ;;  %2087 = vmatprep.mubr.f32.mxu1 %v650_v59  ;;  %v677_v59 = vld [vmem:[%s5829_s29 + $0x1d0] sm:$0xff]  ;;  %v4989_v6 = vpack.c.bf16 %v1058_v62, %v1054_v61  ;;  %v1104_v49 = vld [vmem:[%s7982_s23 + $0xba8] sm:$0xff] }
  0xcc   : > { %1450 = vmatmul.mubr.f32.gmra.mrb[10].mxu0 %v656_v16  ;;  %4974 = vmatprep.subr.bf16.mxu1 %v4973_v13  ;;  %v4991_v13 = vpack.c.bf16 %v1057_v5, %v1053_v3  ;;  %v1085_v61 = vld [vmem:[%s7982_s23 + $0xb10] sm:$0xff]  ;;  %v1094_v3 = vld [vmem:[%s7982_s23 + $0xb58] sm:$0xff] }
  0xcd   : > { %4784 = vmatpush1.bf16.msra.mxu0 %v4783_v17  ;;  %1455 = vmatprep.mubr.f32.mxu0 %v664_v23  ;;  %v4801_v17 = vpack.c.bf16 %v1072_v8, %v1068_v7  ;;  %v1089_v62 = vld [vmem:[%s7982_s23 + $0xb30] sm:$0xff]  ;;  %v1098_v5 = vld [vmem:[%s7982_s23 + $0xb78] sm:$0xff]  ;;  %v1099_v7 = vld [vmem:[%s7982_s23 + $0xb80] sm:$0xff] }
  0xce   : > { %2088 = vmatmul.mubr.f32.gmra.mrb[40].mxu1 %v649_v1  ;;  %4786 = vmatprep.subr.bf16.mxu0 %v4785_v24  ;;  %v685_v1 = vld [vmem:[%s5829_s29 + $0x210] sm:$0xff]  ;;  %v4803_v24 = vpack.c.bf16 %v1071_v15, %v1067_v14  ;;  %v1103_v8 = vld [vmem:[%s7982_s23 + $0xba0] sm:$0xff]  ;;  %v1108_v14 = vld [vmem:[%s7982_s23 + $0xbc8] sm:$0xff] }
  0xcf   : > { %4976 = vmatpush1.bf16.msra.mxu1 %v4975_v20  ;;  %2093 = vmatprep.mubr.f32.mxu1 %v657_v9  ;;  %v684_v9 = vld [vmem:[%s5829_s29 + $0x208] sm:$0xff]  ;;  %v4993_v20 = vpack.c.bf16 %v1066_v12, %v1062_v11  ;;  %v1093_v11 = vld [vmem:[%s7982_s23 + $0xb50] sm:$0xff] }
  0xd0   : > { %1456 = vmatmul.mubr.f32.gmra.mrb[12].mxu0 %v663_v30  ;;  %4978 = vmatprep.subr.bf16.mxu1 %v4977_v27  ;;  %v4995_v27 = vpack.c.bf16 %v1065_v19, %v1061_v18  ;;  %v1097_v12 = vld [vmem:[%s7982_s23 + $0xb70] sm:$0xff]  ;;  %v1112_v15 = vld [vmem:[%s7982_s23 + $0xbe8] sm:$0xff]  ;;  %v1102_v18 = vld [vmem:[%s7982_s23 + $0xb98] sm:$0xff] }
  0xd1   : > { %4788 = vmatpush1.bf16.msra.mxu0 %v4787_v31  ;;  %1461 = vmatprep.mubr.f32.mxu0 %v671_v37  ;;  %v4805_v31 = vpack.c.bf16 %v1080_v22, %v1076_v21  ;;  %v1106_v19 = vld [vmem:[%s7982_s23 + $0xbb8] sm:$0xff]  ;;  %v1107_v21 = vld [vmem:[%s7982_s23 + $0xbc0] sm:$0xff] }
  0xd2   : > { %2094 = vmatmul.mubr.f32.gmra.mrb[42].mxu1 %v656_v16  ;;  %4790 = vmatprep.subr.bf16.mxu0 %v4789_v38  ;;  %v692_v16 = vld [vmem:[%s5829_s29 + $0x248] sm:$0xff]  ;;  %v4807_v38 = vpack.c.bf16 %v1079_v29, %v1075_v28  ;;  %v1111_v22 = vld [vmem:[%s7982_s23 + $0xbe0] sm:$0xff]  ;;  %v1110_v28 = vld [vmem:[%s7982_s23 + $0xbd8] sm:$0xff] }
  0xd3   : > { %4980 = vmatpush1.bf16.msra.mxu1 %v4979_v34  ;;  %2099 = vmatprep.mubr.f32.mxu1 %v664_v23  ;;  %v691_v23 = vld [vmem:[%s5829_s29 + $0x240] sm:$0xff]  ;;  %v4997_v34 = vpack.c.bf16 %v1074_v26, %v1070_v25  ;;  %v1101_v25 = vld [vmem:[%s7982_s23 + $0xb90] sm:$0xff]  ;;  %v1114_v29 = vld [vmem:[%s7982_s23 + $0xbf8] sm:$0xff] }
  0xd4   : > { %1462 = vmatmul.mubr.f32.gmra.mrb[14].mxu0 %v670_v44  ;;  %4982 = vmatprep.subr.bf16.mxu1 %v4981_v41  ;;  %v4999_v41 = vpack.c.bf16 %v1073_v33, %v1069_v32  ;;  %v1105_v26 = vld [vmem:[%s7982_s23 + $0xbb0] sm:$0xff]  ;;  %v624_v33 = vld [vmem:[%s5829_s29 + $0x28] sm:$0xff] }
  0xd5   : > { %4792 = vmatpush1.bf16.msra.mxu0 %v4791_v45  ;;  %1467 = vmatprep.mubr.f32.mxu0 %v678_v52  ;;  %v4809_v45 = vpack.c.bf16 %v1088_v36, %v1084_v35  ;;  %v5015_v32 = vpack.c.bf16 %v1105_v26, %v1101_v25  ;;  %v1109_v35 = vld [vmem:[%s7982_s23 + $0xbd0] sm:$0xff]  ;;  %v2707_v25 = vld [vmem:[#allocation6 + $0xb8] sm:$0xff] }
  0xd6   : > { %2100 = vmatmul.mubr.f32.gmra.mrb[44].mxu1 %v663_v30  ;;  %4794 = vmatprep.subr.bf16.mxu0 %v4793_v53  ;;  %v699_v30 = vld [vmem:[%s5829_s29 + $0x280] sm:$0xff]  ;;  %v4811_v53 = vpack.c.bf16 %v1087_v43, %v1083_v42  ;;  %v1113_v36 = vld [vmem:[%s7982_s23 + $0xbf0] sm:$0xff]  ;;  %v666_v26 = vld [vmem:[%s5829_s29 + $0x178] sm:$0xff] }
  0xd7   : > { %4984 = vmatpush1.bf16.msra.mxu1 %v4983_v48  ;;  %2105 = vmatprep.mubr.f32.mxu1 %v671_v37  ;;  %v698_v37 = vld [vmem:[%s5829_s29 + $0x278] sm:$0xff]  ;;  %v5001_v48 = vpack.c.bf16 %v1082_v40, %v1078_v39  ;;  %v623_v39 = vld [vmem:[%s5829_s29 + $0x20] sm:$0xff]  ;;  %v5019_v40 = vpack.c.bf16 %v1113_v36, %v1109_v35  ;;  %v1117_v43 = vld [vmem:[%s7982_s23 + $0xc10] sm:$0xff] }
  0xd8   : > { %1468 = vmatmul.mubr.f32.gmra.mrb[16].mxu0 %v677_v59  ;;  %4986 = vmatprep.subr.bf16.mxu1 %v4985_v56  ;;  %v5003_v56 = vpack.c.bf16 %v1081_v47, %v1077_v46  ;;  %v638_v46 = vld [vmem:[%s5829_s29 + $0x98] sm:$0xff]  ;;  %v5655_v47 = vmov 0  }
  0xd9   : > { %4796 = vmatpush1.bf16.msra.mxu0 %v4795_v60  ;;  %1473 = vmatprep.mubr.f32.mxu0 %v685_v1  ;;  %v4813_v60 = vpack.c.bf16 %v1096_v51, %v1092_v50  ;;  %v2685_v50 = vld [vmem:[#allocation6 + $0x8] sm:$0xff]  ;;  %v2687_v51 = vld [vmem:[#allocation6 + $0x18] sm:$0xff] }
  0xda   : > { %2106 = vmatmul.mubr.f32.gmra.mrb[46].mxu1 %v670_v44  ;;  %4798 = vmatprep.subr.bf16.mxu0 %v4797_v2  ;;  %v706_v44 = vld [vmem:[%s5829_s29 + $0x2b8] sm:$0xff]  ;;  %v4815_v2 = vpack.c.bf16 %v1095_v58, %v1091_v57 }
  0xdb   : > { %4988 = vmatpush1.bf16.msra.mxu1 %v4987_v63  ;;  %2111 = vmatprep.mubr.f32.mxu1 %v678_v52  ;;  %v705_v52 = vld [vmem:[%s5829_s29 + $0x2b0] sm:$0xff]  ;;  %v5005_v63 = vpack.c.bf16 %v1090_v55, %v1086_v54  ;;  %v5025_v54 = vpack.c.bf16 %v2687_v51, %v2685_v50  ;;  %v2691_v57 = vld [vmem:[#allocation6 + $0x38] sm:$0xff] }
  0xdc   : > { %1474 = vmatmul.mubr.f32.gmra.mrb[18].mxu0 %v684_v9  ;;  %4990 = vmatprep.subr.bf16.mxu1 %v4989_v6  ;;  %v5007_v6 = vpack.c.bf16 %v1089_v62, %v1085_v61  ;;  %v2686_v55 = vld [vmem:[#allocation6 + $0x10] sm:$0xff]  ;;  %v2688_v61 = vld [vmem:[#allocation6 + $0x20] sm:$0xff] }
  0xdd   : > { %4800 = vmatpush1.bf16.msra.mxu0 %v4799_v10  ;;  %1479 = vmatprep.mubr.f32.mxu0 %v692_v16  ;;  %v4817_v10 = vpack.c.bf16 %v1104_v49, %v1100_v0  ;;  %v2690_v62 = vld [vmem:[#allocation6 + $0x30] sm:$0xff]  ;;  %v2693_v0 = vld [vmem:[#allocation6 + $0x48] sm:$0xff]  ;;  %v2695_v49 = vld [vmem:[#allocation6 + $0x58] sm:$0xff] }
  0xde   : > { %2112 = vmatmul.mubr.f32.gmra.mrb[48].mxu1 %v677_v59  ;;  %4802 = vmatprep.subr.bf16.mxu0 %v4801_v17  ;;  %v713_v59 = vld [vmem:[%s5829_s29 + $0x2f0] sm:$0xff]  ;;  %v4819_v17 = vpack.c.bf16 %v1103_v8, %v1099_v7  ;;  %v644_v7 = vld [vmem:[%s5829_s29 + $0xc8] sm:$0xff] }
  0xdf   : > { %4992 = vmatpush1.bf16.msra.mxu1 %v4991_v13  ;;  %2117 = vmatprep.mubr.f32.mxu1 %v685_v1  ;;  %v712_v1 = vld [vmem:[%s5829_s29 + $0x2e8] sm:$0xff]  ;;  %v5009_v13 = vpack.c.bf16 %v1098_v5, %v1094_v3  ;;  %v5033_v3 = vpack.c.bf16 %v2695_v49, %v2693_v0  ;;  %v2714_v50 = vld [vmem:[#allocation6 + $0xf0] sm:$0xff]  ;;  %v2723_v0 = vld [vmem:[#allocation6 + $0x138] sm:$0xff] }
  0xe0   : > { %1480 = vmatmul.mubr.f32.gmra.mrb[20].mxu0 %v691_v23  ;;  %4994 = vmatprep.subr.bf16.mxu1 %v4993_v20  ;;  %v5011_v20 = vpack.c.bf16 %v1097_v12, %v1093_v11  ;;  %v2692_v5 = vld [vmem:[#allocation6 + $0x40] sm:$0xff]  ;;  %v2697_v8 = vld [vmem:[#allocation6 + $0x68] sm:$0xff]  ;;  %v694_v49 = vld [vmem:[%s5829_s29 + $0x258] sm:$0xff] }
  0xe1   : > { %4804 = vmatpush1.bf16.msra.mxu0 %v4803_v24  ;;  %1485 = vmatprep.mubr.f32.mxu0 %v699_v30  ;;  %v4821_v24 = vpack.c.bf16 %v1112_v15, %v1108_v14  ;;  %v2698_v14 = vld [vmem:[#allocation6 + $0x70] sm:$0xff]  ;;  %v651_v15 = vld [vmem:[%s5829_s29 + $0x100] sm:$0xff] }
  0xe2   : > { %2118 = vmatmul.mubr.f32.gmra.mrb[50].mxu1 %v684_v9  ;;  %4806 = vmatprep.subr.bf16.mxu0 %v4805_v31  ;;  %v720_v9 = vld [vmem:[%s5829_s29 + $0x328] sm:$0xff]  ;;  %v4823_v31 = vpack.c.bf16 %v1111_v22, %v1107_v21  ;;  %v2702_v22 = vld [vmem:[#allocation6 + $0x90] sm:$0xff] }
  0xe3   : > { %4996 = vmatpush1.bf16.msra.mxu1 %v4995_v27  ;;  %2123 = vmatprep.mubr.f32.mxu1 %v692_v16  ;;  %v719_v16 = vld [vmem:[%s5829_s29 + $0x320] sm:$0xff]  ;;  %v5013_v27 = vpack.c.bf16 %v1106_v19, %v1102_v18 }
  0xe4   : > { %1486 = vmatmul.mubr.f32.gmra.mrb[22].mxu0 %v698_v37  ;;  %4998 = vmatprep.subr.bf16.mxu1 %v4997_v34  ;;  %v5017_v34 = vpack.c.bf16 %v1114_v29, %v1110_v28  ;;  %v659_v18 = vld [vmem:[%s5829_s29 + $0x140] sm:$0xff] }
  0xe5   : > { %4808 = vmatpush1.bf16.msra.mxu0 %v4807_v38  ;;  %1491 = vmatprep.mubr.f32.mxu0 %v706_v44  ;;  %v1122_v38 = vld [vmem:[%s7982_s23 + $0xc38] sm:$0xff]  ;;  %v2700_v21 = vld [vmem:[#allocation6 + $0x80] sm:$0xff] }
  0xe6   : > { %2124 = vmatmul.mubr.f32.gmra.mrb[52].mxu1 %v691_v23  ;;  %4810 = vmatprep.subr.bf16.mxu0 %v4809_v45  ;;  %v727_v23 = vld [vmem:[%s5829_s29 + $0x360] sm:$0xff]  ;;  %v630_v45 = vld [vmem:[%s5829_s29 + $0x58] sm:$0xff] }
  0xe7   : > { %5000 = vmatpush1.bf16.msra.mxu1 %v4999_v41  ;;  %2129 = vmatprep.mubr.f32.mxu1 %v699_v30  ;;  %v726_v30 = vld [vmem:[%s5829_s29 + $0x358] sm:$0xff]  ;;  %v631_v41 = vld [vmem:[%s5829_s29 + $0x60] sm:$0xff] }
  0xe8   : > { %1492 = vmatmul.mubr.f32.gmra.mrb[24].mxu0 %v705_v52  ;;  %5002 = vmatprep.subr.bf16.mxu1 %v5001_v48  ;;  %v4315_v48 = vld [vmem:[#allocation2] ss:$0 sm:$0xff]  ;;  %v2704_v29 = vld [vmem:[#allocation6 + $0xa0] sm:$0xff] }
  0xe9   : > { %4812 = vmatpush1.bf16.msra.mxu0 %v4811_v53  ;;  %1497 = vmatprep.mubr.f32.mxu0 %v713_v59 }
  0xea   : > { %2130 = vmatmul.mubr.f32.gmra.mrb[54].mxu1 %v698_v37  ;;  %4814 = vmatprep.subr.bf16.mxu0 %v4813_v60  ;;  %v1118_v37 = vld [vmem:[%s7982_s23 + $0xc18] sm:$0xff] }
  0xeb   : > { %5004 = vmatpush1.bf16.msra.mxu1 %v5003_v56  ;;  %2135 = vmatprep.mubr.f32.mxu1 %v706_v44  ;;  %v5021_v42 = vpack.c.bf16 %v1122_v38, %v1118_v37  ;;  %v1121_v44 = vld [vmem:[%s7982_s23 + $0xc30] sm:$0xff]  ;;  %v2708_v38 = vld [vmem:[#allocation6 + $0xc0] sm:$0xff] }
  0xec   : > { %1498 = vmatmul.mubr.f32.gmra.mrb[26].mxu0 %v712_v1  ;;  %5006 = vmatprep.subr.bf16.mxu1 %v5005_v63  ;;  %v5023_v53 = vpack.c.bf16 %v1121_v44, %v1117_v43  ;;  %v2689_v56 = vld [vmem:[#allocation6 + $0x28] sm:$0xff]  ;;  %v2715_v43 = vld [vmem:[#allocation6 + $0xf8] sm:$0xff] }
  0xed   : > { %4816 = vmatpush1.bf16.msra.mxu0 %v4815_v2  ;;  %1503 = vmatprep.mubr.f32.mxu0 %v720_v9  ;;  %v5029_v60 = vpack.c.bf16 %v2691_v57, %v2689_v56  ;;  %v637_v63 = vld [vmem:[%s5829_s29 + $0x90] sm:$0xff]  ;;  %v5031_v2 = vpack.c.bf16 %v2690_v62, %v2688_v61  ;;  %v680_v44 = vld [vmem:[%s5829_s29 + $0x1e8] sm:$0xff]  ;;  %v686_v62 = vld [vmem:[%s5829_s29 + $0x218] sm:$0xff] }
  0xee   : > { %2136 = vmatmul.mubr.f32.gmra.mrb[56].mxu1 %v705_v52  ;;  %4818 = vmatprep.subr.bf16.mxu0 %v4817_v10  ;;  %v2684_v52 = vld [vmem:[#allocation6] sm:$0xff] }
  0xef   : > { %5008 = vmatpush1.bf16.msra.mxu1 %v5007_v6  ;;  %2141 = vmatprep.mubr.f32.mxu1 %v713_v59  ;;  %v5027_v58 = vpack.c.bf16 %v2686_v55, %v2684_v52  ;;  %v4316_v59 = vld [vmem:[#allocation3] ss:$0 sm:$0xff]  ;;  %v2694_v6 = vld [vmem:[#allocation6 + $0x50] sm:$0xff]  ;;  %v652_v10 = vld [vmem:[%s5829_s29 + $0x108] sm:$0xff] }
  0xf0   : > { %1504 = vmatmul.mubr.f32.gmra.mrb[28].mxu0 %v719_v16  ;;  %5010 = vmatprep.subr.bf16.mxu1 %v5009_v13  ;;  %v5035_v11 = vpack.c.bf16 %v2694_v6, %v2692_v5  ;;  %v2696_v13 = vld [vmem:[#allocation6 + $0x60] sm:$0xff]  ;;  %v2722_v6 = vld [vmem:[#allocation6 + $0x130] sm:$0xff] }
  0xf1   : > { %4820 = vmatpush1.bf16.msra.mxu0 %v4819_v17  ;;  %1509 = vmatprep.mubr.f32.mxu0 %v727_v23  ;;  %v2703_v17 = vld [vmem:[#allocation6 + $0x98] sm:$0xff]  ;;  %v5039_v19 = vpack.c.bf16 %v2698_v14, %v2696_v13  ;;  %v2720_v5 = vld [vmem:[#allocation6 + $0x120] sm:$0xff] }
  0xf2   : > { %2142 = vmatmul.mubr.f32.gmra.mrb[58].mxu1 %v712_v1  ;;  %4822 = vmatprep.subr.bf16.mxu0 %v4821_v24  ;;  %v645_v1 = vld [vmem:[%s5829_s29 + $0xd0] sm:$0xff]  ;;  %v679_v52 = vld [vmem:[%s5829_s29 + $0x1e0] sm:$0xff] }
  0xf3   : > { %5012 = vmatpush1.bf16.msra.mxu1 %v5011_v20  ;;  %2147 = vmatprep.mubr.f32.mxu1 %v720_v9  ;;  %v2699_v9 = vld [vmem:[#allocation6 + $0x78] sm:$0xff]  ;;  %v2705_v24 = vld [vmem:[#allocation6 + $0xa8] sm:$0xff] }
  0xf4   : > { %1510 = vmatmul.mubr.f32.gmra.mrb[30].mxu0 %v726_v30  ;;  %5014 = vmatprep.subr.bf16.mxu1 %v5013_v27  ;;  %v5037_v12 = vpack.c.bf16 %v2699_v9, %v2697_v8  ;;  %v5043_v27 = vpack.c.bf16 %v2702_v22, %v2700_v21  ;;  %v5045_v28 = vpack.c.bf16 %v2707_v25, %v2705_v24  ;;  %v687_v55 = vld [vmem:[%s5829_s29 + $0x220] sm:$0xff]  ;;  %v693_v8 = vld [vmem:[%s5829_s29 + $0x250] sm:$0xff]  ;;  %v708_v21 = vld [vmem:[%s5829_s29 + $0x2c8] sm:$0xff] }
  0xf5   : > { %4824 = vmatpush1.bf16.msra.mxu0 %v4823_v31  ;;  %1580 = vmatprep.mubr.f32.mxu0 %v624_v33  ;;  %v665_v31 = vld [vmem:[%s5829_s29 + $0x170] sm:$0xff]  ;;  %v2728_v25 = vld [vmem:[#allocation6 + $0x160] sm:$0xff] }
  0xf6   : > { %2148 = vmatmul.mubr.f32.gmra.mrb[60].mxu1 %v719_v16  ;;  %5593 = vset.pattern.permute.xlu0 %v5655_v47  ;;  %v2701_v16 = vld [vmem:[#allocation6 + $0x88] sm:$0xff] }
  0xf7   : > { %5016 = vmatpush1.bf16.msra.mxu1 %v5015_v32  ;;  %2153 = vmatprep.mubr.f32.mxu1 %v727_v23  ;;  %v5041_v20 = vpack.c.bf16 %v2703_v17, %v2701_v16  ;;  %v658_v23 = vld [vmem:[%s5829_s29 + $0x138] sm:$0xff]  ;;  %v2709_v32 = vld [vmem:[#allocation6 + $0xc8] sm:$0xff] }
  0xf8   : > { %5018 = vmatprep.subr.bf16.mxu1 %v5017_v34  ;;  %1581 = vmatmul.mubr.f32.vlgmr.msra.gmra.mrb[0].mxu0 %v623_v39  ;;  %v673_v34 = vld [vmem:[%s5829_s29 + $0x1b0] sm:$0xff] }
  0xf9   : > { %1586 = vmatprep.mubr.f32.mxu0 %v631_v41  ;;  %2553 = vperm.xlu0 %5593, %v4315_v48   ;;  %v2712_v48 = vld [vmem:[#allocation6 + $0xe0] sm:$0xff]  ;;  %v2725_v9 = vld [vmem:[#allocation6 + $0x148] sm:$0xff]  ;;  %v2726_v16 = vld [vmem:[#allocation6 + $0x150] sm:$0xff] }
  0xfa   : > { %2154 = vmatmul.mubr.f32.gmra.mrb[62].mxu1 %v726_v30  ;;  %5026 = vmatprep.subr.bf16.mxu0 %v5025_v54  ;;  %v2706_v30 = vld [vmem:[#allocation6 + $0xb0] sm:$0xff]  ;;  %v2719_v54 = vld [vmem:[#allocation6 + $0x118] sm:$0xff]  ;;  %v5055_v56 = vpack.c.bf16 %v2714_v50, %v2712_v48  ;;  %v2736_v48 = vld [vmem:[#allocation6 + $0x1a0] sm:$0xff] }
  0xfb   : > { %5020 = vmatpush1.bf16.msra.mxu1 %v5019_v40  ;;  %2224 = vmatprep.mubr.f32.mxu1 %v624_v33  ;;  %v2711_v33 = vld [vmem:[#allocation6 + $0xd8] sm:$0xff]  ;;  %v5047_v35 = vpack.c.bf16 %v2706_v30, %v2704_v29  ;;  %v2733_v29 = vld [vmem:[#allocation6 + $0x188] sm:$0xff]  ;;  %v2738_v50 = vld [vmem:[#allocation6 + $0x1b0] sm:$0xff] }
  0xfc   : > { %5022 = vmatprep.subr.bf16.mxu1 %v5021_v42  ;;  %1587 = vmatmul.mubr.f32.gmra.mrb[2].mxu0 %v630_v45  ;;  %v5049_v37 = vpack.c.bf16 %v2711_v33, %v2709_v32  ;;  %v2713_v42 = vld [vmem:[#allocation6 + $0xe8] sm:$0xff]  ;;  %v2735_v30 = vld [vmem:[#allocation6 + $0x198] sm:$0xff] }
  0xfd   : > { %1592 = vmatprep.mubr.f32.mxu0 %v638_v46  ;;  %3185 = vperm.xlu0 %5593, %v4316_v59   ;;  %v2716_v59 = vld [vmem:[#allocation6 + $0x100] sm:$0xff] }
  0xfe   : > { %2225 = vmatmul.mubr.f32.vlgmr.msra.gmra.mrb[32].mxu1 %v623_v39  ;;  %5028 = vmatpush1.bf16.msra.mxu0 %v5027_v58  ;;  %v2710_v39 = vld [vmem:[#allocation6 + $0xd0] sm:$0xff] }
  0xff   : > { %5024 = vmatpush1.bf16.msra.mxu1 %v5023_v53  ;;  %2230 = vmatprep.mubr.f32.mxu1 %v631_v41  ;;  %v672_v41 = vld [vmem:[%s5829_s29 + $0x1a8] sm:$0xff] }
 0x100   : > { %1593 = vmatmul.mubr.f32.gmra.mrb[4].mxu0 %v637_v63  ;;  %5030 = vmatprep.subr.bf16.mxu0 %v5029_v60  ;;  %v2717_v53 = vld [vmem:[#allocation6 + $0x108] sm:$0xff]  ;;  %v2718_v60 = vld [vmem:[#allocation6 + $0x110] sm:$0xff] }
 0x101   : > { %1598 = vmatprep.mubr.f32.mxu0 %v645_v1  ;;  %5594 = vset.pattern.permute.xlu1 %v5655_v47  ;;  %v5053_v47 = vpack.c.bf16 %v2715_v43, %v2713_v42  ;;  %v5057_v58 = vpack.c.bf16 %v2719_v54, %v2717_v53  ;;  %v2739_v42 = vld [vmem:[#allocation6 + $0x1b8] sm:$0xff]  ;;  %v721_v53 = vld [vmem:[%s5829_s29 + $0x330] sm:$0xff] }
 0x102   : > { %2231 = vmatmul.mubr.f32.gmra.mrb[34].mxu1 %v630_v45  ;;  %5032 = vmatpush1.bf16.msra.mxu0 %v5031_v2  ;;  %v5051_v45 = vpack.c.bf16 %v2710_v39, %v2708_v38  ;;  %v714_v39 = vld [vmem:[%s5829_s29 + $0x2f8] sm:$0xff]  ;;  %v729_v54 = vld [vmem:[%s5829_s29 + $0x370] sm:$0xff] }
 0x103   : > { %2236 = vmatprep.mubr.f32.mxu1 %v638_v46  ;;  %5034 = vmatprep.subr.bf16.mxu0 %v5033_v3  ;;  %v722_v43 = vld [vmem:[%s5829_s29 + $0x338] sm:$0xff] }
 0x104   : > { %1599 = vmatmul.mubr.f32.gmra.mrb[6].mxu0 %v644_v7 }
 0x105   : > { %1604 = vmatprep.mubr.f32.mxu0 %v652_v10 }
 0x106   : > { %2237 = vmatmul.mubr.f32.gmra.mrb[36].mxu1 %v637_v63  ;;  %5036 = vmatpush1.bf16.msra.mxu0 %v5035_v11  ;;  %v2721_v63 = vld [vmem:[#allocation6 + $0x128] sm:$0xff] }
 0x107   : > { %2242 = vmatprep.mubr.f32.mxu1 %v645_v1  ;;  %5038 = vmatprep.subr.bf16.mxu0 %v5037_v12  ;;  %v5059_v1 = vpack.c.bf16 %v2718_v60, %v2716_v59  ;;  %v5061_v3 = vpack.c.bf16 %v2723_v0, %v2721_v63  ;;  %v701_v11 = vld [vmem:[%s5829_s29 + $0x290] sm:$0xff]  ;;  %v5063_v12 = vpack.c.bf16 %v2722_v6, %v2720_v5  ;;  %v728_v59 = vld [vmem:[%s5829_s29 + $0x368] sm:$0xff] }
 0x108   : > { %1605 = vmatmul.mubr.f32.gmra.mrb[8].mxu0 %v651_v15 }
 0x109   : > { %1610 = vmatprep.mubr.f32.mxu0 %v659_v18 }
 0x10a   : > { %2243 = vmatmul.mubr.f32.gmra.mrb[38].mxu1 %v644_v7  ;;  %5040 = vmatpush1.bf16.msra.mxu0 %v5039_v19  ;;  %v2729_v19 = vld [vmem:[#allocation6 + $0x168] sm:$0xff] }
 0x10b   : > { %2248 = vmatprep.mubr.f32.mxu1 %v652_v10  ;;  %5042 = vmatprep.subr.bf16.mxu0 %v5041_v20  ;;  %v2727_v10 = vld [vmem:[#allocation6 + $0x158] sm:$0xff] }
 0x10c   : > { %1611 = vmatmul.mubr.f32.gmra.mrb[10].mxu0 %v658_v23  ;;  %v5065_v14 = vpack.c.bf16 %v2727_v10, %v2725_v9  ;;  %v2731_v20 = vld [vmem:[#allocation6 + $0x178] sm:$0xff] }
 0x10d   : > { %1616 = vmatprep.mubr.f32.mxu0 %v666_v26  ;;  %v5069_v24 = vpack.c.bf16 %v2731_v20, %v2729_v19 }
 0x10e   : > { %2249 = vmatmul.mubr.f32.gmra.mrb[40].mxu1 %v651_v15  ;;  %5044 = vmatpush1.bf16.msra.mxu0 %v5043_v27  ;;  %v2724_v15 = vld [vmem:[#allocation6 + $0x140] sm:$0xff] }
 0x10f   : > { %2254 = vmatprep.mubr.f32.mxu1 %v659_v18  ;;  %5046 = vmatprep.subr.bf16.mxu0 %v5045_v28  ;;  %v700_v18 = vld [vmem:[%s5829_s29 + $0x288] sm:$0xff]  ;;  %v5067_v22 = vpack.c.bf16 %v2726_v16, %v2724_v15  ;;  %v707_v28 = vld [vmem:[%s5829_s29 + $0x2c0] sm:$0xff]  ;;  %v5598_v15 = vld [vmem:[%s5829_s29 + $0xd8] sm:$0xff] }
 0x110   : > { %1617 = vmatmul.mubr.f32.gmra.mrb[12].mxu0 %v665_v31  ;;  %v2741_v16 = vld [vmem:[#allocation6 + $0x1c8] sm:$0xff] }
 0x111   : > { %v7128_v36 = vpop.f32.mrb[0].mxu1  ;;  %1622 = vmatprep.mubr.f32.mxu0 %v673_v34 }
 0x112   : > { %v7130_v40 = vpop.f32.mrb[1].mxu1  ;;  %2255 = vmatmul.mubr.f32.gmra.mrb[42].mxu1 %v658_v23  ;;  %5048 = vmatpush1.bf16.msra.mxu0 %v5047_v35  ;;  %v2732_v35 = vld [vmem:[#allocation6 + $0x180] sm:$0xff] }
 0x113   : > { %2260 = vmatprep.mubr.f32.mxu1 %v666_v26  ;;  %5050 = vmatprep.subr.bf16.mxu0 %v5049_v37  ;;  %v2730_v26 = vld [vmem:[#allocation6 + $0x170] sm:$0xff] }
 0x114   : > { %1623 = vmatmul.mubr.f32.gmra.mrb[14].mxu0 %v672_v41  ;;  %v5071_v32 = vpack.c.bf16 %v2730_v26, %v2728_v25  ;;  %v2734_v37 = vld [vmem:[#allocation6 + $0x190] sm:$0xff] }
 0x115   : > { %v7134_v46 = vpop.f32.mrb[2].mxu1  ;;  %1628 = vmatprep.mubr.f32.mxu0 %v680_v44  ;;  %v5599_v25 = vld [vmem:[%s5829_s29 + $0x110] sm:$0xff] }
 0x116   : > { %v7136_v51 = vpop.f32.mrb[3].mxu1  ;;  %2261 = vmatmul.mubr.f32.gmra.mrb[44].mxu1 %v665_v31  ;;  %5052 = vmatpush1.bf16.msra.mxu0 %v5051_v45  ;;  %v715_v31 = vld [vmem:[%s5829_s29 + $0x300] sm:$0xff] }
 0x117   : > { %2266 = vmatprep.mubr.f32.mxu1 %v673_v34  ;;  %5054 = vmatprep.subr.bf16.mxu0 %v5053_v47  ;;  %v5073_v34 = vpack.c.bf16 %v2735_v30, %v2733_v29  ;;  %v2747_v29 = vld [vmem:[#allocation6 + $0x1f8] sm:$0xff] }
 0x118   : > { %1629 = vmatmul.mubr.f32.gmra.mrb[16].mxu0 %v679_v52 }
 0x119   : > { %v7140_v57 = vpop.f32.mrb[4].mxu1  ;;  %1634 = vmatprep.mubr.f32.mxu0 %v687_v55 }
 0x11a   : > { %v7142_v61 = vpop.f32.mrb[5].mxu1  ;;  %2267 = vmatmul.mubr.f32.gmra.mrb[46].mxu1 %v672_v41  ;;  %5056 = vmatpush1.bf16.msra.mxu0 %v5055_v56  ;;  %v2737_v41 = vld [vmem:[#allocation6 + $0x1a8] sm:$0xff] }
 0x11b   : > { %2272 = vmatprep.mubr.f32.mxu1 %v680_v44  ;;  %5058 = vmatprep.subr.bf16.mxu0 %v5057_v58  ;;  %v5075_v44 = vpack.c.bf16 %v2734_v37, %v2732_v35  ;;  %v5077_v47 = vpack.c.bf16 %v2739_v42, %v2737_v41  ;;  %v5601_v37 = vld [vmem:[%s5829_s29 + $0x180] sm:$0xff] }
 0x11c   : > { %1635 = vmatmul.mubr.f32.gmra.mrb[18].mxu0 %v686_v62  ;;  %v2751_v41 = vld [vmem:[#allocation6 + $0x218] sm:$0xff] }
 0x11d   : > { %v7146_v2 = vpop.f32.mrb[6].mxu1  ;;  %1640 = vmatprep.mubr.f32.mxu0 %v694_v49 }
 0x11e   : > { %v7148_v7 = vpop.f32.mrb[7].mxu1  ;;  %2273 = vmatmul.mubr.f32.gmra.mrb[48].mxu1 %v679_v52  ;;  %5060 = vmatpush1.bf16.msra.mxu0 %v5059_v1 }
 0x11f   : > { %2278 = vmatprep.mubr.f32.mxu1 %v687_v55  ;;  %5062 = vmatprep.subr.bf16.mxu0 %v5061_v3  ;;  %v5079_v55 = vpack.c.bf16 %v2738_v50, %v2736_v48  ;;  %v5595_v3 = vld [vmem:[%s5829_s29 + $0x30] sm:$0xff]  ;;  %v5605_v48 = vld [vmem:[%s5829_s29 + $0x260] sm:$0xff]  ;;  %v5606_v50 = vld [vmem:[%s5829_s29 + $0x298] sm:$0xff] }
 0x120   : > { %1641 = vmatmul.mubr.f32.gmra.mrb[20].mxu0 %v693_v8 }
 0x121   : > { %v7152_v13 = vpop.f32.mrb[8].mxu1  ;;  %1646 = vmatprep.mubr.f32.mxu0 %v701_v11 }
 0x122   : > { %v7154_v17 = vpop.f32.mrb[9].mxu1  ;;  %2279 = vmatmul.mubr.f32.gmra.mrb[50].mxu1 %v686_v62  ;;  %5064 = vmatpush1.bf16.msra.mxu0 %v5063_v12 }
 0x123   : > { %2284 = vmatprep.mubr.f32.mxu1 %v694_v49  ;;  %5066 = vmatprep.subr.bf16.mxu0 %v5065_v14 }
 0x124   : > { %1647 = vmatmul.mubr.f32.gmra.mrb[22].mxu0 %v700_v18 }
 0x125   : > { %v7158_v23 = vpop.f32.mrb[10].mxu1  ;;  %1652 = vmatprep.mubr.f32.mxu0 %v708_v21 }
 0x126   : > { %v7160_v27 = vpop.f32.mrb[11].mxu1  ;;  %2285 = vmatmul.mubr.f32.gmra.mrb[52].mxu1 %v693_v8  ;;  %5068 = vmatpush1.bf16.msra.mxu0 %v5067_v22  ;;  %v5596_v8 = vld [vmem:[%s5829_s29 + $0x68] sm:$0xff]  ;;  %v2742_v22 = vld [vmem:[#allocation6 + $0x1d0] sm:$0xff] }
 0x127   : > { %2290 = vmatprep.mubr.f32.mxu1 %v701_v11  ;;  %5070 = vmatprep.subr.bf16.mxu0 %v5069_v24  ;;  %v5597_v11 = vld [vmem:[%s5829_s29 + $0xa0] sm:$0xff] }
 0x128   : > { %1653 = vmatmul.mubr.f32.gmra.mrb[24].mxu0 %v707_v28 }
 0x129   : > { %v7164_v33 = vpop.f32.mrb[12].mxu1  ;;  %1658 = vmatprep.mubr.f32.mxu0 %v715_v31 }
 0x12a   : > { %v7166_v38 = vpop.f32.mrb[13].mxu1  ;;  %2291 = vmatmul.mubr.f32.gmra.mrb[54].mxu1 %v700_v18  ;;  %5072 = vmatpush1.bf16.msra.mxu0 %v5071_v32  ;;  %v2743_v18 = vld [vmem:[#allocation6 + $0x1d8] sm:$0xff]  ;;  %v2746_v32 = vld [vmem:[#allocation6 + $0x1f0] sm:$0xff] }
 0x12b   : > { %2296 = vmatprep.mubr.f32.mxu1 %v708_v21  ;;  %5074 = vmatprep.subr.bf16.mxu0 %v5073_v34  ;;  %v5081_v20 = vpack.c.bf16 %v2743_v18, %v2741_v16  ;;  %v2740_v21 = vld [vmem:[#allocation6 + $0x1c0] sm:$0xff] }
 0x12c   : > { %1659 = vmatmul.mubr.f32.gmra.mrb[26].mxu0 %v714_v39  ;;  %v5083_v26 = vpack.c.bf16 %v2742_v22, %v2740_v21  ;;  %v5600_v34 = vld [vmem:[%s5829_s29 + $0x148] sm:$0xff] }
 0x12d   : > { %v7170_v45 = vpop.f32.mrb[14].mxu1  ;;  %1664 = vmatprep.mubr.f32.mxu0 %v722_v43 }
 0x12e   : > { %v7172_v52 = vpop.f32.mrb[15].mxu1  ;;  %2297 = vmatmul.mubr.f32.gmra.mrb[56].mxu1 %v707_v28  ;;  %5076 = vmatpush1.bf16.msra.mxu0 %v5075_v44  ;;  %v2745_v28 = vld [vmem:[#allocation6 + $0x1e8] sm:$0xff] }
 0x12f   : > { %2302 = vmatprep.mubr.f32.mxu1 %v715_v31  ;;  %5078 = vmatprep.subr.bf16.mxu0 %v5077_v47  ;;  %v5085_v30 = vpack.c.bf16 %v2747_v29, %v2745_v28  ;;  %v2744_v31 = vld [vmem:[#allocation6 + $0x1e0] sm:$0xff]  ;;  %v5603_v44 = vld [vmem:[%s5829_s29 + $0x1f0] sm:$0xff] }
 0x130   : > { %1665 = vmatmul.mubr.f32.gmra.mrb[28].mxu0 %v721_v53  ;;  %v5087_v35 = vpack.c.bf16 %v2746_v32, %v2744_v31  ;;  %v5604_v47 = vld [vmem:[%s5829_s29 + $0x228] sm:$0xff]  ;;  %v2750_v32 = vld [vmem:[#allocation6 + $0x210] sm:$0xff] }
 0x131   : > { %v7176_v56 = vpop.f32.mrb[16].mxu1  ;;  %1670 = vmatprep.mubr.f32.mxu0 %v729_v54  ;;  %v2748_v31 = vld [vmem:[#allocation6 + $0x200] sm:$0xff] }
 0x132   : > { %v7178_v58 = vpop.f32.mrb[17].mxu1  ;;  %2303 = vmatmul.mubr.f32.gmra.mrb[58].mxu1 %v714_v39  ;;  %5080 = vmatpush1.bf16.msra.mxu0 %v5079_v55  ;;  %v2749_v39 = vld [vmem:[#allocation6 + $0x208] sm:$0xff]  ;;  %v5609_v55 = vld [vmem:[%s5829_s29 + $0x340] sm:$0xff] }
 0x133   : > { %2308 = vmatprep.mubr.f32.mxu1 %v722_v43  ;;  %5082 = vmatprep.subr.bf16.mxu0 %v5081_v20  ;;  %v5089_v42 = vpack.c.bf16 %v2751_v41, %v2749_v39  ;;  %v5602_v43 = vld [vmem:[%s5829_s29 + $0x1b8] sm:$0xff]  ;;  %v2753_v39 = vld [vmem:[#allocation6 + $0x228] sm:$0xff] }
 0x134   : > { %1671 = vmatmul.mubr.f32.gmra.mrb[30].mxu0 %v728_v59  ;;  %v2755_v41 = vld [vmem:[#allocation6 + $0x238] sm:$0xff] }
 0x135   : > { %v7181_v60 = vpop.f32.mrb[18].mxu1 }
 0x136   : > { %v7183_v62 = vpop.f32.mrb[19].mxu1  ;;  %2309 = vmatmul.mubr.f32.gmra.mrb[60].mxu1 %v721_v53  ;;  %5084 = vmatpush1.bf16.msra.mxu0 %v5083_v26  ;;  %v5607_v53 = vld [vmem:[%s5829_s29 + $0x2d0] sm:$0xff] }
 0x137   : > { %2314 = vmatprep.mubr.f32.mxu1 %v729_v54  ;;  %5086 = vmatprep.subr.bf16.mxu0 %v5085_v30  ;;  %v5608_v54 = vld [vmem:[%s5829_s29 + $0x308] sm:$0xff] }
 0x139   : > { %v7185_v63 = vpop.f32.mrb[20].mxu1 }
 0x13a   : > { %v7187_v0 = vpop.f32.mrb[21].mxu1  ;;  %2315 = vmatmul.mubr.f32.gmra.mrb[62].mxu1 %v728_v59  ;;  %5088 = vmatpush1.bf16.msra.mxu0 %v5087_v35  ;;  %v5610_v59 = vld [vmem:[%s5829_s29 + $0x378] sm:$0xff] }
 0x13b   : > { %2385 = vmatprep.mubr.f32.mxu1 %v5654_v4  ;;  %5090 = vmatprep.subr.bf16.mxu0 %v5089_v42 }
 0x13d   : > { %v7190_v49 = vpop.f32.mrb[22].mxu1 }
 0x13e   : > { %v7192_v1 = vpop.f32.mrb[23].mxu1  ;;  %4299 = vmatmul.mubr.msk.f32.vlgmr.msra.gmra.mrb[32].mxu1 %vm1145_vm0, %v5595_v3  ;;  %v1125_v3 = vlaneseq }
 0x13f   : > { %2391 = vmatprep.mubr.f32.mxu1 %v5654_v4 }
 0x141   : > { %v7197_v5 = vpop.f32.mrb[24].mxu1 }
 0x142   : > { %v7199_v6 = vpop.f32.mrb[25].mxu1  ;;  %4300 = vmatmul.mubr.msk.f32.gmra.mrb[34].mxu1 %vm1145_vm0, %v5596_v8  ;;  %v7257_v8 = vshrl.u32 %v1125_v3, 7 }
 0x143   : > { %2397 = vmatprep.mubr.f32.mxu1 %v5654_v4 }
 0x144   : > { %v1131_v16 = vsub.s32 1, %v7257_v8 }
 0x145   : > { %v7204_v9 = vpop.f32.mrb[26].mxu1 }
 0x146   : > { %v7206_v10 = vpop.f32.mrb[27].mxu1  ;;  %4301 = vmatmul.mubr.msk.f32.gmra.mrb[36].mxu1 %vm1145_vm0, %v5597_v11  ;;  %v1127_v11 = vsub.s32 0, %v7257_v8 }
 0x147   : > { %2403 = vmatprep.mubr.f32.mxu1 %v5654_v4 }
 0x149   : > { %v7211_v12 = vpop.f32.mrb[28].mxu1 }
 0x14a   : > { %v7213_v14 = vpop.f32.mrb[29].mxu1  ;;  %4302 = vmatmul.mubr.msk.f32.gmra.mrb[38].mxu1 %vm1145_vm0, %v5598_v15  ;;  %v7263_v15 = vld [vmem:[%s7984_s30] sm:$0xf] }
 0x14b   : > { %2409 = vmatprep.mubr.f32.mxu1 %v5654_v4  ;;  %v7269_v18 = vrot.slane %v7263_v15, %v1127_v11 }
 0x14d   : > { %v7218_v19 = vpop.f32.mrb[30].mxu1 }
 0x14e   : > { %v7220_v24 = vpop.f32.mrb[31].mxu1  ;;  %4303 = vmatmul.mubr.msk.f32.gmra.mrb[40].mxu1 %vm1145_vm0, %v5599_v25 }
 0x14f   : > { %2415 = vmatprep.mubr.f32.mxu1 %v5654_v4 }
 0x152   : > { %4304 = vmatmul.mubr.msk.f32.gmra.mrb[42].mxu1 %vm1145_vm0, %v5600_v34 }
 0x153   : > { %2421 = vmatprep.mubr.f32.mxu1 %v5654_v4 }
 0x156   : > { %4305 = vmatmul.mubr.msk.f32.gmra.mrb[44].mxu1 %vm1145_vm0, %v5601_v37 }
 0x157   : > { %2427 = vmatprep.mubr.f32.mxu1 %v5654_v4 }
 0x15a   : > { %4306 = vmatmul.mubr.msk.f32.gmra.mrb[46].mxu1 %vm1145_vm0, %v5602_v43 }
 0x15b   : > { %2433 = vmatprep.mubr.f32.mxu1 %v5654_v4 }
 0x15e   : > { %4307 = vmatmul.mubr.msk.f32.gmra.mrb[48].mxu1 %vm1145_vm0, %v5603_v44  ;;  %v5091_v44 = vpack.c.bf16 %v2750_v32, %v2748_v31  ;;  %v3253_v31 = vld [vmem:[%s7957_s7 + $0x8] sm:$0xff]  ;;  %v3270_v32 = vld [vmem:[%s7957_s7 + $0x90] sm:$0xff] }
 0x15f   : > { %2439 = vmatprep.mubr.f32.mxu1 %v5654_v4 }
 0x162   : > { %4308 = vmatmul.mubr.msk.f32.gmra.mrb[50].mxu1 %vm1145_vm0, %v5604_v47 }
 0x163   : > { %2445 = vmatprep.mubr.f32.mxu1 %v5654_v4 }
 0x166   : > { %4309 = vmatmul.mubr.msk.f32.gmra.mrb[52].mxu1 %vm1145_vm0, %v5605_v48 }
 0x167   : > { %2451 = vmatprep.mubr.f32.mxu1 %v5654_v4 }
 0x16a   : > { %4310 = vmatmul.mubr.msk.f32.gmra.mrb[54].mxu1 %vm1145_vm0, %v5606_v50 }
 0x16b   : > { %2457 = vmatprep.mubr.f32.mxu1 %v5654_v4 }
 0x16e   : > { %4311 = vmatmul.mubr.msk.f32.gmra.mrb[56].mxu1 %vm1145_vm0, %v5607_v53  ;;  %v5093_v53 = vpack.c.bf16 %v2755_v41, %v2753_v39  ;;  %v2756_v41 = vld [vmem:[#allocation6 + $0x240] sm:$0xff] }
 0x16f   : > { %2463 = vmatprep.mubr.f32.mxu1 %v5654_v4 }
 0x172   : > { %4312 = vmatmul.mubr.msk.f32.gmra.mrb[58].mxu1 %vm1145_vm0, %v5608_v54  ;;  %v2754_v54 = vld [vmem:[#allocation6 + $0x230] sm:$0xff] }
 0x173   : > { %2469 = vmatprep.mubr.f32.mxu1 %v5654_v4 }
 0x176   : > { %4313 = vmatmul.mubr.msk.f32.gmra.mrb[60].mxu1 %vm1145_vm0, %v5609_v55  ;;  %v2757_v55 = vld [vmem:[#allocation6 + $0x248] sm:$0xff] }
 0x177   : > { %2475 = vmatprep.mubr.f32.mxu1 %v5654_v4  ;;  %v7274_v4 = vrot.slane %v7263_v15, %v1131_v16 }
 0x178   : > { %v7278_v26 = vpop.permute.xlu0 %2553 }
 0x17a   : > { %4314 = vmatmul.mubr.msk.f32.gmra.mrb[62].mxu1 %vm1145_vm0, %v5610_v59  ;;  %v2759_v59 = vld [vmem:[#allocation6 + $0x258] sm:$0xff] }
 0x17b   : > { %v5097_v39 = vpack.c.bf16 %v2759_v59, %v2757_v55  ;;  %v3272_v55 = vld [vmem:[%s7957_s7 + $0xa0] sm:$0xff]  ;;  %v3273_v59 = vld [vmem:[%s7957_s7 + $0xa8] sm:$0xff] }
 0x1cb   : > { %v1582_v20 = vpop.f32.mrb[0].mxu0 }
 0x1cc   : > { %v5249_v21 = vadd.f32 %v1582_v20, %v7269_v18  ;;  %v1584_v22 = vpop.f32.mrb[1].mxu0 }
 0x1cd   : > { %v5251_v25 = vadd.f32 %v1584_v22, %v7274_v4 }
 0x1ce   : > { %v5250_v28 = vadd.f32 %v5249_v21, %v7128_v36 }
 0x1cf   : > { %v5252_v29 = vadd.f32 %v5251_v25, %v7130_v40  ;;  %v1588_v30 = vpop.f32.mrb[2].mxu0  ;;  %v2752_v40 = vld [vmem:[#allocation6 + $0x220] sm:$0xff] }
 0x1d0   : > { %v5253_v34 = vadd.f32 %v1588_v30, %v7269_v18  ;;  %v1590_v35 = vpop.f32.mrb[3].mxu0  ;;  %v2556_v37 = vmul.f32 %v5250_v28, %v7278_v26  ;;  %vm2483_vm1 = vcmp.ge.f32.partialorder %v5250_v28, 0.0  ;;  %v3252_v25 = vld [vmem:[%s7957_s7] sm:$0xff] }
 0x1d1   : > { %v5255_v42 = vadd.f32 %v1590_v35, %v7274_v4  ;;  %vm2484_vm2 = vcmp.ge.f32.partialorder %v5252_v29, 0.0  ;;  %v2557_v43 = vmul.f32 %v5252_v29, %v7278_v26 }
 0x1d2   : > { %v5254_v36 = vadd.f32 %v5253_v34, %v7134_v46  ;;  %v2620_v21 = vsel %vm2483_vm1, %v5250_v28, %v2556_v37  ;;  %v3268_v46 = vld [vmem:[%s7957_s7 + $0x80] sm:$0xff]  ;;  %v3271_v34 = vld [vmem:[%s7957_s7 + $0x98] sm:$0xff]  ;;  %v5095_v37 = vpack.c.bf16 %v2754_v54, %v2752_v40 }
 0x1d3   : > { %v5256_v47 = vadd.f32 %v5255_v42, %v7136_v51  ;;  %v1594_v48 = vpop.f32.mrb[4].mxu0  ;;  %v2621_v50 = vsel %vm2484_vm2, %v5252_v29, %v2557_v43  ;;  %v3269_v51 = vld [vmem:[%s7957_s7 + $0x88] sm:$0xff]  ;;  %v2758_v42 = vld [vmem:[#allocation6 + $0x250] sm:$0xff]  ;;  %v7314_v43 = vpack.c.bf16 %v3253_v31, %v3252_v25 }
 0x1d4   : > { %v5257_v3 = vadd.f32 %v1594_v48, %v7269_v18  ;;  %v1596_v20 = vpop.f32.mrb[5].mxu0  ;;  %2888 = vmatprep.mubr.f32.mxu0 %v2621_v50  ;;  %vm2487_vm3 = vcmp.ge.f32.partialorder %v5254_v36, 0.0  ;;  %v2560_v22 = vmul.f32 %v5254_v36, %v7278_v26  ;;  %v7302_v30 = vpack.c.bf16 %v3269_v51, %v3268_v46  ;;  %v2760_v25 = vld [vmem:[#allocation6 + $0x260] sm:$0xff] }
 0x1d5   : > { %v5259_v29 = vadd.f32 %v1596_v20, %v7274_v4  ;;  %2889 = vmatmul.mubr.f32.vlgmr.msra.gmra.mrb[32].mxu0 %v2620_v21  ;;  %vm2488_vm4 = vcmp.ge.f32.partialorder %v5256_v47, 0.0  ;;  %v2561_v28 = vmul.f32 %v5256_v47, %v7278_v26  ;;  %v2761_v21 = vld [vmem:[#allocation6 + $0x268] sm:$0xff]  ;;  %v7318_v46 = vpack.c.bf16 %v3271_v34, %v3270_v32 }
 0x1d6   : > { %v5258_v35 = vadd.f32 %v5257_v3, %v7140_v57  ;;  %5092 = vmatpush1.bf16.msra.mxu0 %v5091_v44  ;;  %5233 = vmatprep.subr.bf16.mxu1 %v7302_v30  ;;  %v3254_v57 = vld [vmem:[%s7957_s7 + $0x10] sm:$0xff]  ;;  %v3255_v44 = vld [vmem:[%s7957_s7 + $0x18] sm:$0xff] }
 0x1d7   : > { %v5260_v48 = vadd.f32 %v5259_v29, %v7142_v61  ;;  %v1600_v50 = vpop.f32.mrb[6].mxu0  ;;  %v2625_v20 = vsel %vm2488_vm4, %v5256_v47, %v2561_v28  ;;  %5094 = vmatprep.subr.bf16.mxu0 %v5093_v53  ;;  %v2624_v61 = vsel %vm2487_vm3, %v5254_v36, %v2560_v22  ;;  %v2763_v53 = vld [vmem:[#allocation6 + $0x278] sm:$0xff]  ;;  %5241 = vmatpush3.bf16.msra.mxu1 %v7314_v43  ;;  %v2762_v29 = vld [vmem:[#allocation6 + $0x270] sm:$0xff] }
 0x1d8   : > { %v5261_v40 = vadd.f32 %v1600_v50, %v7269_v18  ;;  %v1602_v54 = vpop.f32.mrb[7].mxu0  ;;  %2894 = vmatprep.mubr.f32.mxu0 %v2625_v20  ;;  %v2564_v47 = vmul.f32 %v5258_v35, %v7278_v26  ;;  %vm2491_vm6 = vcmp.ge.f32.partialorder %v5258_v35, 0.0  ;;  %5234 = vmatprep.subr.bf16.mxu1 %v7318_v46  ;;  %v5099_v22 = vpack.c.bf16 %v2758_v42, %v2756_v41  ;;  %v2765_v20 = vld [vmem:[#allocation6 + $0x288] sm:$0xff]  ;;  %v2767_v42 = vld [vmem:[#allocation6 + $0x298] sm:$0xff] }
 0x1d9   : > { %v5263_v3 = vadd.f32 %v1602_v54, %v7274_v4  ;;  %2895 = vmatmul.mubr.f32.gmra.mrb[34].mxu0 %v2624_v61  ;;  %vm2492_vm5 = vcmp.ge.f32.partialorder %v5260_v48, 0.0  ;;  %v2565_v51 = vmul.f32 %v5260_v48, %v7278_v26  ;;  %v7340_v28 = vpack.c.bf16 %v3255_v44, %v3254_v57  ;;  %v3256_v61 = vld [vmem:[%s7957_s7 + $0x20] sm:$0xff] }
 0x1da   : > { %v5262_v36 = vadd.f32 %v5261_v40, %v7146_v2  ;;  %5096 = vmatpush1.bf16.msra.mxu0 %v5095_v37  ;;  %v5101_v50 = vpack.c.bf16 %v2763_v53, %v2761_v21  ;;  %v7343_v54 = vpack.c.bf16 %v3273_v59, %v3272_v55  ;;  %v3257_v2 = vld [vmem:[%s7957_s7 + $0x28] sm:$0xff]  ;;  %v3275_v21 = vld [vmem:[%s7957_s7 + $0xb8] sm:$0xff]  ;;  %v5103_v40 = vpack.c.bf16 %v2762_v29, %v2760_v25 }
 0x1db   : > { %v5264_v31 = vadd.f32 %v5263_v3, %v7148_v7  ;;  %v1606_v32 = vpop.f32.mrb[8].mxu0  ;;  %v2629_v34 = vsel %vm2492_vm5, %v5260_v48, %v2565_v51  ;;  %5098 = vmatprep.subr.bf16.mxu0 %v5097_v39  ;;  %v2628_v7 = vsel %vm2491_vm6, %v5258_v35, %v2564_v47  ;;  %5242 = vmatpush3.bf16.msra.mxu1 %v7340_v28  ;;  %v3274_v48 = vld [vmem:[%s7957_s7 + $0xb0] sm:$0xff]  ;;  %v2764_v47 = vld [vmem:[#allocation6 + $0x280] sm:$0xff] }
 0x1dc   : > { %v5265_v37 = vadd.f32 %v1606_v32, %v7269_v18  ;;  %v1608_v41 = vpop.f32.mrb[9].mxu0  ;;  %2900 = vmatprep.mubr.f32.mxu0 %v2629_v34  ;;  %v2568_v39 = vmul.f32 %v5262_v36, %v7278_v26  ;;  %vm2495_vm8 = vcmp.ge.f32.partialorder %v5262_v36, 0.0  ;;  %5235 = vmatprep.subr.bf16.mxu1 %v7343_v54  ;;  %v2766_v53 = vld [vmem:[#allocation6 + $0x290] sm:$0xff]  ;;  %v7365_v55 = vpack.c.bf16 %v3257_v2, %v3256_v61  ;;  %v2769_v34 = vld [vmem:[#allocation6 + $0x2a8] sm:$0xff] }
 0x1dd   : > { %v5267_v57 = vadd.f32 %v1608_v41, %v7274_v4  ;;  %2901 = vmatmul.mubr.f32.gmra.mrb[36].mxu0 %v2628_v7  ;;  %vm2496_vm7 = vcmp.ge.f32.partialorder %v5264_v31, 0.0  ;;  %v2569_v44 = vmul.f32 %v5264_v31, %v7278_v26  ;;  %v5105_v32 = vpack.c.bf16 %v2767_v42, %v2765_v20  ;;  %v3258_v7 = vld [vmem:[%s7957_s7 + $0x30] sm:$0xff]  ;;  %v3277_v20 = vld [vmem:[%s7957_s7 + $0xc8] sm:$0xff] }
 0x1de   : > { %v5266_v35 = vadd.f32 %v5265_v37, %v7152_v13  ;;  %5100 = vmatpush1.bf16.msra.mxu0 %v5099_v22  ;;  %v7368_v41 = vpack.c.bf16 %v3275_v21, %v3274_v48  ;;  %v3259_v13 = vld [vmem:[%s7957_s7 + $0x38] sm:$0xff]  ;;  %v5107_v37 = vpack.c.bf16 %v2766_v53, %v2764_v47 }
 0x1df   : > { %v5268_v59 = vadd.f32 %v5267_v57, %v7154_v17  ;;  %v1612_v3 = vpop.f32.mrb[10].mxu0  ;;  %v2633_v51 = vsel %vm2496_vm7, %v5264_v31, %v2569_v44  ;;  %5102 = vmatprep.subr.bf16.mxu0 %v5101_v50  ;;  %v2632_v17 = vsel %vm2495_vm8, %v5262_v36, %v2568_v39  ;;  %v2771_v31 = vld [vmem:[#allocation6 + $0x2b8] sm:$0xff]  ;;  %5243 = vmatpush3.bf16.msra.mxu1 %v7365_v55  ;;  %v2768_v39 = vld [vmem:[#allocation6 + $0x2a0] sm:$0xff]  ;;  %v2770_v42 = vld [vmem:[#allocation6 + $0x2b0] sm:$0xff] }
 0x1e0   : > { %v5269_v22 = vadd.f32 %v1612_v3, %v7269_v18  ;;  %v1614_v25 = vpop.f32.mrb[11].mxu0  ;;  %2906 = vmatprep.mubr.f32.mxu0 %v2633_v51  ;;  %v2572_v29 = vmul.f32 %v5266_v35, %v7278_v26  ;;  %v3276_v50 = vld [vmem:[%s7957_s7 + $0xc0] sm:$0xff]  ;;  %vm2499_vm10 = vcmp.ge.f32.partialorder %v5266_v35, 0.0  ;;  %5236 = vmatprep.subr.bf16.mxu1 %v7368_v41  ;;  %v7390_v48 = vpack.c.bf16 %v3259_v13, %v3258_v7  ;;  %v2773_v51 = vld [vmem:[#allocation6 + $0x2c8] sm:$0xff] }
 0x1e1   : > { %v5271_v61 = vadd.f32 %v1614_v25, %v7274_v4  ;;  %2907 = vmatmul.mubr.f32.gmra.mrb[38].mxu0 %v2632_v17  ;;  %vm2500_vm9 = vcmp.ge.f32.partialorder %v5268_v59, 0.0  ;;  %v2573_v2 = vmul.f32 %v5268_v59, %v7278_v26  ;;  %v5109_v3 = vpack.c.bf16 %v2771_v31, %v2769_v34  ;;  %v3260_v17 = vld [vmem:[%s7957_s7 + $0x40] sm:$0xff]  ;;  %v3279_v34 = vld [vmem:[%s7957_s7 + $0xd8] sm:$0xff] }
 0x1e2   : > { %v5270_v36 = vadd.f32 %v5269_v22, %v7158_v23  ;;  %5104 = vmatpush1.bf16.msra.mxu0 %v5103_v40  ;;  %v7393_v25 = vpack.c.bf16 %v3277_v20, %v3276_v50  ;;  %v3261_v23 = vld [vmem:[%s7957_s7 + $0x48] sm:$0xff]  ;;  %v5111_v22 = vpack.c.bf16 %v2770_v42, %v2768_v39 }
 0x1e3   : > { %v5272_v21 = vadd.f32 %v5271_v61, %v7160_v27  ;;  %v1618_v57 = vpop.f32.mrb[12].mxu0  ;;  %v2637_v44 = vsel %vm2500_vm9, %v5268_v59, %v2573_v2  ;;  %5106 = vmatprep.subr.bf16.mxu0 %v5105_v32  ;;  %v2636_v27 = vsel %vm2499_vm10, %v5266_v35, %v2572_v29  ;;  %v2775_v59 = vld [vmem:[#allocation6 + $0x2d8] sm:$0xff]  ;;  %5244 = vmatpush3.bf16.msra.mxu1 %v7390_v48  ;;  %v3278_v32 = vld [vmem:[%s7957_s7 + $0xd0] sm:$0xff]  ;;  %v2772_v29 = vld [vmem:[#allocation6 + $0x2c0] sm:$0xff] }
 0x1e4   : > { %v5273_v40 = vadd.f32 %v1618_v57, %v7269_v18  ;;  %v1620_v47 = vpop.f32.mrb[13].mxu0  ;;  %2912 = vmatprep.mubr.f32.mxu0 %v2637_v44  ;;  %v2576_v53 = vmul.f32 %v5270_v36, %v7278_v26  ;;  %vm2503_vm12 = vcmp.ge.f32.partialorder %v5270_v36, 0.0  ;;  %5237 = vmatprep.subr.bf16.mxu1 %v7393_v25  ;;  %v7415_v31 = vpack.c.bf16 %v3261_v23, %v3260_v17  ;;  %v2774_v57 = vld [vmem:[#allocation6 + $0x2d0] sm:$0xff] }
 0x1e5   : > { %v5275_v7 = vadd.f32 %v1620_v47, %v7274_v4  ;;  %2913 = vmatmul.mubr.f32.gmra.mrb[40].mxu0 %v2636_v27  ;;  %vm2504_vm11 = vcmp.ge.f32.partialorder %v5272_v21, 0.0  ;;  %v2577_v13 = vmul.f32 %v5272_v21, %v7278_v26  ;;  %v5113_v2 = vpack.c.bf16 %v2775_v59, %v2773_v51  ;;  %v3262_v47 = vld [vmem:[%s7957_s7 + $0x50] sm:$0xff] }
 0x1e6   : > { %v5274_v35 = vadd.f32 %v5273_v40, %v7164_v33  ;;  %5108 = vmatpush1.bf16.msra.mxu0 %v5107_v37  ;;  %v7418_v44 = vpack.c.bf16 %v3279_v34, %v3278_v32  ;;  %v3263_v33 = vld [vmem:[%s7957_s7 + $0x58] sm:$0xff]  ;;  %v5115_v40 = vpack.c.bf16 %v2774_v57, %v2772_v29  ;;  %v2776_v34 = vld [vmem:[#allocation6 + $0x2e0] sm:$0xff] }
 0x1e7   : > { %v5276_v50 = vadd.f32 %v5275_v7, %v7166_v38  ;;  %v1624_v20 = vpop.f32.mrb[14].mxu0  ;;  %v2641_v61 = vsel %vm2504_vm11, %v5272_v21, %v2577_v13  ;;  %5110 = vmatprep.subr.bf16.mxu0 %v5109_v3  ;;  %v2640_v38 = vsel %vm2503_vm12, %v5270_v36, %v2576_v53  ;;  %v2777_v21 = vld [vmem:[#allocation6 + $0x2e8] sm:$0xff]  ;;  %v2779_v3 = vld [vmem:[#allocation6 + $0x2f8] sm:$0xff]  ;;  %5245 = vmatpush3.bf16.msra.mxu1 %v7415_v31  ;;  %v2778_v7 = vld [vmem:[#allocation6 + $0x2f0] sm:$0xff] }
 0x1e8   : > { %v5277_v37 = vadd.f32 %v1624_v20, %v7269_v18  ;;  %v1626_v39 = vpop.f32.mrb[15].mxu0  ;;  %2918 = vmatprep.mubr.f32.mxu0 %v2641_v61  ;;  %v2580_v42 = vmul.f32 %v5274_v35, %v7278_v26  ;;  %vm2507_vm14 = vcmp.ge.f32.partialorder %v5274_v35, 0.0  ;;  %5238 = vmatprep.subr.bf16.mxu1 %v7418_v44  ;;  %v7434_v36 = vpack.c.bf16 %v3263_v33, %v3262_v47  ;;  %v2783_v29 = vld [vmem:[#allocation6 + $0x318] sm:$0xff] }
 0x1e9   : > { %v5279_v51 = vadd.f32 %v1626_v39, %v7274_v4  ;;  %2919 = vmatmul.mubr.f32.gmra.mrb[42].mxu0 %v2640_v38  ;;  %vm2508_vm13 = vcmp.ge.f32.partialorder %v5276_v50, 0.0  ;;  %v2581_v17 = vmul.f32 %v5276_v50, %v7278_v26  ;;  %v5117_v32 = vpack.c.bf16 %v2779_v3, %v2777_v21  ;;  %v2780_v39 = vld [vmem:[#allocation6 + $0x300] sm:$0xff]  ;;  %v2782_v38 = vld [vmem:[#allocation6 + $0x310] sm:$0xff] }
 0x1ea   : > { %v5278_v23 = vadd.f32 %v5277_v37, %v7170_v45  ;;  %5112 = vmatpush1.bf16.msra.mxu0 %v5111_v22  ;;  %v2644_v61 = vsel %vm2507_vm14, %v5274_v35, %v2580_v42  ;;  %v2781_v22 = vld [vmem:[#allocation6 + $0x308] sm:$0xff]  ;;  %v5119_v57 = vpack.c.bf16 %v2778_v7, %v2776_v34  ;;  %v2784_v7 = vld [vmem:[#allocation6 + $0x320] sm:$0xff] }
 0x1eb   : > { %v5280_v27 = vadd.f32 %v5279_v51, %v7172_v52  ;;  %v1630_v53 = vpop.f32.mrb[16].mxu0  ;;  %v2645_v59 = vsel %vm2508_vm13, %v5276_v50, %v2581_v17  ;;  %5114 = vmatprep.subr.bf16.mxu0 %v5113_v2  ;;  %5246 = vmatpush3.bf16.msra.mxu1 %v7434_v36  ;;  %v5121_v37 = vpack.c.bf16 %v2783_v29, %v2781_v22  ;;  %v2785_v17 = vld [vmem:[#allocation6 + $0x328] sm:$0xff] }
 0x1ec   : > { %v5281_v13 = vadd.f32 %v1630_v53, %v7269_v18  ;;  %v1632_v20 = vpop.f32.mrb[17].mxu0  ;;  %2924 = vmatprep.mubr.f32.mxu0 %v2645_v59  ;;  %v2584_v45 = vmul.f32 %v5278_v23, %v7278_v26  ;;  %vm2511_vm0 = vcmp.ge.f32.partialorder %v5278_v23, 0.0  ;;  %v2787_v53 = vld [vmem:[#allocation6 + $0x338] sm:$0xff]  ;;  %v2789_v29 = vld [vmem:[#allocation6 + $0x348] sm:$0xff] }
 0x1ed   : > { %v5283_v52 = vadd.f32 %v1632_v20, %v7274_v4  ;;  %2925 = vmatmul.mubr.f32.gmra.mrb[44].mxu0 %v2644_v61  ;;  %vm2512_vm15 = vcmp.ge.f32.partialorder %v5280_v27, 0.0  ;;  %v2585_v50 = vmul.f32 %v5280_v27, %v7278_v26 }
 0x1ee   : > { %v5282_v2 = vadd.f32 %v5281_v13, %v7176_v56  ;;  %5116 = vmatpush1.bf16.msra.mxu0 %v5115_v40  ;;  %v2648_v3 = vsel %vm2511_vm0, %v5278_v23, %v2584_v45  ;;  %v5125_v23 = vpack.c.bf16 %v2787_v53, %v2785_v17  ;;  %v2786_v13 = vld [vmem:[#allocation6 + $0x330] sm:$0xff]  ;;  %v2795_v17 = vld [vmem:[#allocation6 + $0x378] sm:$0xff] }
 0x1ef   : > { %v5284_v47 = vadd.f32 %v5283_v52, %v7178_v58  ;;  %v1636_v35 = vpop.f32.mrb[18].mxu0  ;;  %v2649_v33 = vsel %vm2512_vm15, %v5280_v27, %v2585_v50  ;;  %5118 = vmatprep.subr.bf16.mxu0 %v5117_v32  ;;  %v5123_v27 = vpack.c.bf16 %v2782_v38, %v2780_v39  ;;  %v2791_v52 = vld [vmem:[#allocation6 + $0x358] sm:$0xff]  ;;  %v2790_v39 = vld [vmem:[#allocation6 + $0x350] sm:$0xff] }
 0x1f0   : > { %v5285_v42 = vadd.f32 %v1636_v35, %v7269_v18  ;;  %v1638_v21 = vpop.f32.mrb[19].mxu0  ;;  %2930 = vmatprep.mubr.f32.mxu0 %v2649_v33  ;;  %v2588_v51 = vmul.f32 %v5282_v2, %v7278_v26  ;;  %vm2515_vm2 = vcmp.ge.f32.partialorder %v5282_v2, 0.0 }
 0x1f1   : > { %v5287_v56 = vadd.f32 %v1638_v21, %v7274_v4  ;;  %2931 = vmatmul.mubr.f32.gmra.mrb[46].mxu0 %v2648_v3  ;;  %vm2516_vm1 = vcmp.ge.f32.partialorder %v5284_v47, 0.0  ;;  %v2589_v58 = vmul.f32 %v5284_v47, %v7278_v26 }
 0x1f2   : > { %v5286_v40 = vadd.f32 %v5285_v42, %v7181_v60  ;;  %5120 = vmatpush1.bf16.msra.mxu0 %v5119_v57  ;;  %v2652_v45 = vsel %vm2515_vm2, %v5282_v2, %v2588_v51  ;;  %v5127_v57 = vpack.c.bf16 %v2786_v13, %v2784_v7  ;;  %v5129_v2 = vpack.c.bf16 %v2791_v52, %v2789_v29  ;;  %v2793_v51 = vld [vmem:[#allocation6 + $0x368] sm:$0xff] }
 0x1f3   : > { %v5288_v59 = vadd.f32 %v5287_v56, %v7183_v62  ;;  %v1642_v32 = vpop.f32.mrb[20].mxu0  ;;  %v2653_v34 = vsel %vm2516_vm1, %v5284_v47, %v2589_v58  ;;  %5122 = vmatprep.subr.bf16.mxu0 %v5121_v37  ;;  %v2788_v37 = vld [vmem:[#allocation6 + $0x340] sm:$0xff] }
 0x1f4   : > { %v5289_v20 = vadd.f32 %v1642_v32, %v7269_v18  ;;  %v1644_v61 = vpop.f32.mrb[21].mxu0  ;;  %2936 = vmatprep.mubr.f32.mxu0 %v2653_v34  ;;  %v2592_v22 = vmul.f32 %v5286_v40, %v7278_v26  ;;  %vm2519_vm4 = vcmp.ge.f32.partialorder %v5286_v40, 0.0  ;;  %v5131_v56 = vpack.c.bf16 %v2790_v39, %v2788_v37  ;;  %v2792_v32 = vld [vmem:[#allocation6 + $0x360] sm:$0xff]  ;;  %v2794_v34 = vld [vmem:[#allocation6 + $0x370] sm:$0xff]  ;;  %v2801_v39 = vld [vmem:[#allocation6 + $0x3a8] sm:$0xff] }
 0x1f5   : > { %v5291_v60 = vadd.f32 %v1644_v61, %v7274_v4  ;;  %2937 = vmatmul.mubr.f32.gmra.mrb[48].mxu0 %v2652_v45  ;;  %vm2520_vm3 = vcmp.ge.f32.partialorder %v5288_v59, 0.0  ;;  %v2593_v62 = vmul.f32 %v5288_v59, %v7278_v26  ;;  %v2797_v61 = vld [vmem:[#allocation6 + $0x388] sm:$0xff]  ;;  %v2799_v45 = vld [vmem:[#allocation6 + $0x398] sm:$0xff]  ;;  %v5135_v29 = vpack.c.bf16 %v2794_v34, %v2792_v32 }
 0x1f6   : > { %v5290_v50 = vadd.f32 %v5289_v20, %v7185_v63  ;;  %5124 = vmatpush1.bf16.msra.mxu0 %v5123_v27  ;;  %v2656_v21 = vsel %vm2519_vm4, %v5286_v40, %v2592_v22  ;;  %v5133_v40 = vpack.c.bf16 %v2795_v17, %v2793_v51  ;;  %v2807_v32 = vld [vmem:[#allocation6 + $0x3d8] sm:$0xff] }
 0x1f7   : > { %v5292_v47 = vadd.f32 %v5291_v60, %v7187_v0  ;;  %v1648_v35 = vpop.f32.mrb[22].mxu0  ;;  %v2657_v33 = vsel %vm2520_vm3, %v5288_v59, %v2593_v62  ;;  %5126 = vmatprep.subr.bf16.mxu0 %v5125_v23 }
 0x1f8   : > { %v5293_v38 = vadd.f32 %v1648_v35, %v7269_v18  ;;  %v1650_v42 = vpop.f32.mrb[23].mxu0  ;;  %2942 = vmatprep.mubr.f32.mxu0 %v2657_v33  ;;  %v2596_v3 = vmul.f32 %v5290_v50, %v7278_v26  ;;  %vm2523_vm6 = vcmp.ge.f32.partialorder %v5290_v50, 0.0 }
 0x1f9   : > { %v5295_v63 = vadd.f32 %v1650_v42, %v7274_v4  ;;  %2943 = vmatmul.mubr.f32.gmra.mrb[50].mxu0 %v2656_v21  ;;  %vm2524_vm5 = vcmp.ge.f32.partialorder %v5292_v47, 0.0  ;;  %v2597_v0 = vmul.f32 %v5292_v47, %v7278_v26 }
 0x1fa   : > { %v5294_v53 = vadd.f32 %v5293_v38, %v7190_v49  ;;  %5128 = vmatpush1.bf16.msra.mxu0 %v5127_v57  ;;  %v2660_v13 = vsel %vm2523_vm6, %v5290_v50, %v2596_v3  ;;  %v5137_v50 = vpack.c.bf16 %v2799_v45, %v2797_v61  ;;  %v2796_v57 = vld [vmem:[#allocation6 + $0x380] sm:$0xff]  ;;  %v2803_v38 = vld [vmem:[#allocation6 + $0x3b8] sm:$0xff] }
 0x1fb   : > { %v5296_v58 = vadd.f32 %v5295_v63, %v7192_v1  ;;  %v1654_v27 = vpop.f32.mrb[24].mxu0  ;;  %v2661_v59 = vsel %vm2524_vm5, %v5292_v47, %v2597_v0  ;;  %5130 = vmatprep.subr.bf16.mxu0 %v5129_v2  ;;  %v2798_v47 = vld [vmem:[#allocation6 + $0x390] sm:$0xff]  ;;  %v5141_v63 = vpack.c.bf16 %v2803_v38, %v2801_v39  ;;  %v2800_v0 = vld [vmem:[#allocation6 + $0x3a0] sm:$0xff] }
 0x1fc   : > { %v5297_v23 = vadd.f32 %v1654_v27, %v7269_v18  ;;  %v1656_v7 = vpop.f32.mrb[25].mxu0  ;;  %2948 = vmatprep.mubr.f32.mxu0 %v2661_v59  ;;  %v2600_v20 = vmul.f32 %v5294_v53, %v7278_v26  ;;  %vm2527_vm8 = vcmp.ge.f32.partialorder %v5294_v53, 0.0  ;;  %v5139_v21 = vpack.c.bf16 %v2798_v47, %v2796_v57  ;;  %v2804_v45 = vld [vmem:[#allocation6 + $0x3c0] sm:$0xff]  ;;  %v2810_v39 = vld [vmem:[#allocation6 + $0x3f0] sm:$0xff] }
 0x1fd   : > { %v5299_v49 = vadd.f32 %v1656_v7, %v7274_v4  ;;  %2949 = vmatmul.mubr.f32.gmra.mrb[52].mxu0 %v2660_v13  ;;  %vm2528_vm7 = vcmp.ge.f32.partialorder %v5296_v58, 0.0  ;;  %v2601_v1 = vmul.f32 %v5296_v58, %v7278_v26 }
 0x1fe   : > { %v5298_v22 = vadd.f32 %v5297_v23, %v7197_v5  ;;  %5132 = vmatpush1.bf16.msra.mxu0 %v5131_v56  ;;  %v2664_v2 = vsel %vm2527_vm8, %v5294_v53, %v2600_v20  ;;  %v2802_v53 = vld [vmem:[#allocation6 + $0x3b0] sm:$0xff] }
 0x1ff   : > { %v5300_v52 = vadd.f32 %v5299_v49, %v7199_v6  ;;  %v1660_v60 = vpop.f32.mrb[26].mxu0  ;;  %v2665_v62 = vsel %vm2528_vm7, %v5296_v58, %v2601_v1  ;;  %5134 = vmatprep.subr.bf16.mxu0 %v5133_v40  ;;  %v2805_v40 = vld [vmem:[#allocation6 + $0x3c8] sm:$0xff]  ;;  %v5143_v23 = vpack.c.bf16 %v2802_v53, %v2800_v0  ;;  %v2806_v49 = vld [vmem:[#allocation6 + $0x3d0] sm:$0xff] }
 0x200   : > { %v5301_v35 = vadd.f32 %v1660_v60, %v7269_v18  ;;  %v1662_v33 = vpop.f32.mrb[27].mxu0  ;;  %2954 = vmatprep.mubr.f32.mxu0 %v2665_v62  ;;  %v2604_v37 = vmul.f32 %v5298_v22, %v7278_v26  ;;  %vm2531_vm10 = vcmp.ge.f32.partialorder %v5298_v22, 0.0  ;;  %v5145_v61 = vpack.c.bf16 %v2807_v32, %v2805_v40  ;;  %v2811_v62 = vld [vmem:[#allocation6 + $0x3f8] sm:$0xff] }
 0x201   : > { %v5303_v5 = vadd.f32 %v1662_v33, %v7274_v4  ;;  %2955 = vmatmul.mubr.f32.gmra.mrb[54].mxu0 %v2664_v2  ;;  %vm2532_vm9 = vcmp.ge.f32.partialorder %v5300_v52, 0.0  ;;  %v2605_v6 = vmul.f32 %v5300_v52, %v7278_v26  ;;  %v1135_v60 = vsub.s32 2, %v7257_v8 }
 0x202   : > { %v5302_v42 = vadd.f32 %v5301_v35, %v7204_v9  ;;  %5136 = vmatpush1.bf16.msra.mxu0 %v5135_v29  ;;  %v2668_v27 = vsel %vm2531_vm10, %v5298_v22, %v2604_v37  ;;  %v5147_v47 = vpack.c.bf16 %v2806_v49, %v2804_v45  ;;  %v2808_v37 = vld [vmem:[#allocation6 + $0x3e0] sm:$0xff] }
 0x203   : > { %v5304_v3 = vadd.f32 %v5303_v5, %v7206_v10  ;;  %v1666_v51 = vpop.f32.mrb[28].mxu0  ;;  %v2669_v17 = vsel %vm2532_vm9, %v5300_v52, %v2605_v6  ;;  %5138 = vmatprep.subr.bf16.mxu0 %v5137_v50  ;;  %v7491_v5 = vrot.slane %v7263_v15, %v1135_v60 }
 0x204   : > { %v5305_v56 = vadd.f32 %v1666_v51, %v7269_v18  ;;  %v1668_v58 = vpop.f32.mrb[29].mxu0  ;;  %2960 = vmatprep.mubr.f32.mxu0 %v2669_v17  ;;  %v2608_v59 = vmul.f32 %v5302_v42, %v7278_v26  ;;  %vm2535_vm12 = vcmp.ge.f32.partialorder %v5302_v42, 0.0 }
 0x205   : > { %v5307_v9 = vadd.f32 %v1668_v58, %v7274_v4  ;;  %2961 = vmatmul.mubr.f32.gmra.mrb[56].mxu0 %v2668_v27  ;;  %vm2536_vm11 = vcmp.ge.f32.partialorder %v5304_v3, 0.0  ;;  %v2609_v10 = vmul.f32 %v5304_v3, %v7278_v26 }
 0x206   : > { %v5306_v34 = vadd.f32 %v5305_v56, %v7211_v12  ;;  %5140 = vmatpush1.bf16.msra.mxu0 %v5139_v21  ;;  %v2672_v29 = vsel %vm2535_vm12, %v5302_v42, %v2608_v59  ;;  %v2809_v12 = vld [vmem:[#allocation6 + $0x3e8] sm:$0xff] }
 0x207   : > { %v5308_v7 = vadd.f32 %v5307_v9, %v7213_v14  ;;  %v1672_v13 = vpop.f32.mrb[30].mxu0  ;;  %v2673_v20 = vsel %vm2536_vm11, %v5304_v3, %v2609_v10  ;;  %5142 = vmatprep.subr.bf16.mxu0 %v5141_v63  ;;  %v5149_v2 = vpack.c.bf16 %v2811_v62, %v2809_v12 }
 0x208   : > { %v5309_v1 = vadd.f32 %v1672_v13, %v7269_v18  ;;  %v1674_v22 = vpop.f32.mrb[31].mxu0  ;;  %2966 = vmatprep.mubr.f32.mxu0 %v2673_v20  ;;  %v2612_v52 = vmul.f32 %v5306_v34, %v7278_v26  ;;  %vm2539_vm14 = vcmp.ge.f32.partialorder %v5306_v34, 0.0  ;;  %v1139_v18 = vsub.s32 3, %v7257_v8 }
 0x209   : > { %v5311_v50 = vadd.f32 %v1674_v22, %v7274_v4  ;;  %2967 = vmatmul.mubr.f32.gmra.mrb[58].mxu0 %v2672_v29  ;;  %vm2540_vm13 = vcmp.ge.f32.partialorder %v5308_v7, 0.0  ;;  %v2613_v14 = vmul.f32 %v5308_v7, %v7278_v26 }
 0x20a   : > { %v5310_v57 = vadd.f32 %v5309_v1, %v7218_v19  ;;  %5144 = vmatpush1.bf16.msra.mxu0 %v5143_v23  ;;  %v2676_v4 = vsel %vm2539_vm14, %v5306_v34, %v2612_v52  ;;  %v7495_v6 = vrot.slane %v7263_v15, %v1139_v18 }
 0x20b   : > { %v5312_v35 = vadd.f32 %v5311_v50, %v7220_v24  ;;  %v2677_v33 = vsel %vm2540_vm13, %v5308_v7, %v2613_v14  ;;  %5146 = vmatprep.subr.bf16.mxu0 %v5145_v61  ;;  %v5151_v24 = vpack.c.bf16 %v2810_v39, %v2808_v37 }
 0x20c   : > { %2972 = vmatprep.mubr.f32.mxu0 %v2677_v33  ;;  %v2616_v38 = vmul.f32 %v5310_v57, %v7278_v26  ;;  %vm2543_vm0 = vcmp.ge.f32.partialorder %v5310_v57, 0.0 }
 0x20d   : > { %2973 = vmatmul.mubr.f32.gmra.mrb[60].mxu0 %v2676_v4  ;;  %vm2544_vm15 = vcmp.ge.f32.partialorder %v5312_v35, 0.0  ;;  %v2617_v19 = vmul.f32 %v5312_v35, %v7278_v26 }
 0x20e   : > { %5148 = vmatpush1.bf16.msra.mxu0 %v5147_v47  ;;  %v2680_v3 = vsel %vm2543_vm0, %v5310_v57, %v2616_v38 }
 0x20f   : > { %v2681_v42 = vsel %vm2544_vm15, %v5312_v35, %v2617_v19  ;;  %5150 = vmatprep.subr.bf16.mxu0 %v5149_v2 }
 0x210   : > { %2978 = vmatprep.mubr.f32.mxu0 %v2681_v42 }
 0x211   : > { %v2387_v21 = vpop.f32.mrb[32].mxu1  ;;  %2979 = vmatmul.mubr.f32.gmra.mrb[62].mxu0 %v2680_v3 }
 0x212   : > { %v5313_v51 = vadd.f32 %v2387_v21, %v7491_v5  ;;  %v2389_v17 = vpop.f32.mrb[33].mxu1  ;;  %5152 = vmatpush1.bf16.msra.mxu0 %v5151_v24 }
 0x213   : > { %v5314_v63 = vadd.f32 %v2389_v17, %v7495_v6  ;;  %5154 = vmatprep.subr.bf16.mxu0 %v7302_v30 }
 0x214   : > { %v2558_v0 = vmul.f32 %v5313_v51, %v7278_v26  ;;  %vm2485_vm1 = vcmp.ge.f32.partialorder %v5313_v51, 0.0 }
 0x215   : > { %v2559_v15 = vmul.f32 %v5314_v63, %v7278_v26  ;;  %v2393_v53 = vpop.f32.mrb[34].mxu1  ;;  %vm2486_vm2 = vcmp.ge.f32.partialorder %v5314_v63, 0.0 }
 0x216   : > { %v5315_v56 = vadd.f32 %v2393_v53, %v7491_v5  ;;  %v2395_v58 = vpop.f32.mrb[35].mxu1  ;;  %v2622_v40 = vsel %vm2485_vm1, %v5313_v51, %v2558_v0 }
 0x217   : > { %v5316_v27 = vadd.f32 %v2395_v58, %v7495_v6  ;;  %v2623_v59 = vsel %vm2486_vm2, %v5314_v63, %v2559_v15 }
 0x218   : > { %v2562_v32 = vmul.f32 %v5315_v56, %v7278_v26  ;;  %3049 = vmatprep.mubr.f32.mxu0 %v2623_v59  ;;  %vm2489_vm4 = vcmp.ge.f32.partialorder %v5315_v56, 0.0 }
 0x219   : > { %v2563_v9 = vmul.f32 %v5316_v27, %v7278_v26  ;;  %v2399_v10 = vpop.f32.mrb[36].mxu1  ;;  %3050 = vmatmul.mubr.f32.vlgmr.msra.gmra.mrb[32].mxu0 %v2622_v40  ;;  %vm2490_vm3 = vcmp.ge.f32.partialorder %v5316_v27, 0.0 }
 0x21a   : > { %v5317_v30 = vadd.f32 %v2399_v10, %v7491_v5  ;;  %v2401_v34 = vpop.f32.mrb[37].mxu1  ;;  %5156 = vmatpush3.bf16.msra.mxu0 %v7314_v43  ;;  %v2626_v20 = vsel %vm2489_vm4, %v5315_v56, %v2562_v32 }
 0x21b   : > { %v5318_v23 = vadd.f32 %v2401_v34, %v7495_v6  ;;  %v2627_v7 = vsel %vm2490_vm3, %v5316_v27, %v2563_v9  ;;  %5158 = vmatprep.subr.bf16.mxu0 %v7318_v46 }
 0x21c   : > { %v2566_v13 = vmul.f32 %v5317_v30, %v7278_v26  ;;  %3055 = vmatprep.mubr.f32.mxu0 %v2627_v7  ;;  %vm2493_vm6 = vcmp.ge.f32.partialorder %v5317_v30, 0.0 }
 0x21d   : > { %v2567_v61 = vmul.f32 %v5318_v23, %v7278_v26  ;;  %v2405_v45 = vpop.f32.mrb[38].mxu1  ;;  %3056 = vmatmul.mubr.f32.gmra.mrb[34].mxu0 %v2626_v20  ;;  %vm2494_vm5 = vcmp.ge.f32.partialorder %v5318_v23, 0.0 }
 0x21e   : > { %v5319_v49 = vadd.f32 %v2405_v45, %v7491_v5  ;;  %v2407_v1 = vpop.f32.mrb[39].mxu1  ;;  %5160 = vmatpush3.bf16.msra.mxu0 %v7340_v28  ;;  %v2630_v29 = vsel %vm2493_vm6, %v5317_v30, %v2566_v13 }
 0x21f   : > { %v5320_v43 = vadd.f32 %v2407_v1, %v7495_v6  ;;  %v2631_v22 = vsel %vm2494_vm5, %v5318_v23, %v2567_v61  ;;  %5162 = vmatprep.subr.bf16.mxu0 %v7343_v54 }
 0x220   : > { %v2570_v46 = vmul.f32 %v5319_v49, %v7278_v26  ;;  %3061 = vmatprep.mubr.f32.mxu0 %v2631_v22  ;;  %vm2497_vm8 = vcmp.ge.f32.partialorder %v5319_v49, 0.0 }
 0x221   : > { %v2571_v52 = vmul.f32 %v5320_v43, %v7278_v26  ;;  %v2411_v60 = vpop.f32.mrb[40].mxu1  ;;  %3062 = vmatmul.mubr.f32.gmra.mrb[36].mxu0 %v2630_v29  ;;  %vm2498_vm7 = vcmp.ge.f32.partialorder %v5320_v43, 0.0 }
 0x222   : > { %v5321_v12 = vadd.f32 %v2411_v60, %v7491_v5  ;;  %v2413_v62 = vpop.f32.mrb[41].mxu1  ;;  %5164 = vmatpush3.bf16.msra.mxu0 %v7365_v55  ;;  %v2634_v14 = vsel %vm2497_vm8, %v5319_v49, %v2570_v46 }
 0x223   : > { %v5322_v28 = vadd.f32 %v2413_v62, %v7495_v6  ;;  %v2635_v50 = vsel %vm2498_vm7, %v5320_v43, %v2571_v52  ;;  %5166 = vmatprep.subr.bf16.mxu0 %v7368_v41 }
 0x224   : > { %v2574_v54 = vmul.f32 %v5321_v12, %v7278_v26  ;;  %3067 = vmatprep.mubr.f32.mxu0 %v2635_v50  ;;  %vm2501_vm10 = vcmp.ge.f32.partialorder %v5321_v12, 0.0 }
 0x225   : > { %v2575_v57 = vmul.f32 %v5322_v28, %v7278_v26  ;;  %v2417_v18 = vpop.f32.mrb[42].mxu1  ;;  %3068 = vmatmul.mubr.f32.gmra.mrb[38].mxu0 %v2634_v14  ;;  %vm2502_vm9 = vcmp.ge.f32.partialorder %v5322_v28, 0.0 }
 0x226   : > { %v5323_v47 = vadd.f32 %v2417_v18, %v7491_v5  ;;  %v2419_v35 = vpop.f32.mrb[43].mxu1  ;;  %5168 = vmatpush3.bf16.msra.mxu0 %v7390_v48  ;;  %v2638_v2 = vsel %vm2501_vm10, %v5321_v12, %v2574_v54 }
 0x227   : > { %v5324_v55 = vadd.f32 %v2419_v35, %v7495_v6  ;;  %v2639_v33 = vsel %vm2502_vm9, %v5322_v28, %v2575_v57  ;;  %5170 = vmatprep.subr.bf16.mxu0 %v7393_v25 }
 0x228   : > { %v2578_v41 = vmul.f32 %v5323_v47, %v7278_v26  ;;  %3073 = vmatprep.mubr.f32.mxu0 %v2639_v33  ;;  %vm2505_vm12 = vcmp.ge.f32.partialorder %v5323_v47, 0.0 }
 0x229   : > { %v2579_v37 = vmul.f32 %v5324_v55, %v7278_v26  ;;  %v2423_v39 = vpop.f32.mrb[44].mxu1  ;;  %3074 = vmatmul.mubr.f32.gmra.mrb[40].mxu0 %v2638_v2  ;;  %vm2506_vm11 = vcmp.ge.f32.partialorder %v5324_v55, 0.0 }
 0x22a   : > { %v5325_v4 = vadd.f32 %v2423_v39, %v7491_v5  ;;  %v2425_v38 = vpop.f32.mrb[45].mxu1  ;;  %5172 = vmatpush3.bf16.msra.mxu0 %v7415_v31  ;;  %v2642_v24 = vsel %vm2505_vm12, %v5323_v47, %v2578_v41 }
 0x22b   : > { %v5326_v48 = vadd.f32 %v2425_v38, %v7495_v6  ;;  %v2643_v19 = vsel %vm2506_vm11, %v5324_v55, %v2579_v37  ;;  %5174 = vmatprep.subr.bf16.mxu0 %v7418_v44 }
 0x22c   : > { %v2582_v25 = vmul.f32 %v5325_v4, %v7278_v26  ;;  %3079 = vmatprep.mubr.f32.mxu0 %v2643_v19  ;;  %vm2509_vm14 = vcmp.ge.f32.partialorder %v5325_v4, 0.0 }
 0x22d   : > { %v2583_v42 = vmul.f32 %v5326_v48, %v7278_v26  ;;  %v2429_v21 = vpop.f32.mrb[46].mxu1  ;;  %3080 = vmatmul.mubr.f32.gmra.mrb[42].mxu0 %v2642_v24  ;;  %vm2510_vm13 = vcmp.ge.f32.partialorder %v5326_v48, 0.0 }
 0x22e   : > { %v5327_v3 = vadd.f32 %v2429_v21, %v7491_v5  ;;  %v2431_v51 = vpop.f32.mrb[47].mxu1  ;;  %5176 = vmatpush3.bf16.msra.mxu0 %v7434_v36  ;;  %v2646_v63 = vsel %vm2509_vm14, %v5325_v4, %v2582_v25 }
 0x22f   : > { %v5328_v31 = vadd.f32 %v2431_v51, %v7495_v6  ;;  %v2647_v17 = vsel %vm2510_vm13, %v5326_v48, %v2583_v42 }
 0x230   : > { %v2586_v44 = vmul.f32 %v5327_v3, %v7278_v26  ;;  %3085 = vmatprep.mubr.f32.mxu0 %v2647_v17  ;;  %vm2513_vm0 = vcmp.ge.f32.partialorder %v5327_v3, 0.0 }
 0x231   : > { %v2587_v0 = vmul.f32 %v5328_v31, %v7278_v26  ;;  %v2435_v15 = vpop.f32.mrb[48].mxu1  ;;  %3086 = vmatmul.mubr.f32.gmra.mrb[44].mxu0 %v2646_v63  ;;  %vm2514_vm15 = vcmp.ge.f32.partialorder %v5328_v31, 0.0 }
 0x232   : > { %v5329_v53 = vadd.f32 %v2435_v15, %v7491_v5  ;;  %v2437_v56 = vpop.f32.mrb[49].mxu1  ;;  %v2650_v59 = vsel %vm2513_vm0, %v5327_v3, %v2586_v44 }
 0x233   : > { %v5330_v58 = vadd.f32 %v2437_v56, %v7495_v6  ;;  %v2651_v27 = vsel %vm2514_vm15, %v5328_v31, %v2587_v0 }
 0x234   : > { %v2590_v36 = vmul.f32 %v5329_v53, %v7278_v26  ;;  %3091 = vmatprep.mubr.f32.mxu0 %v2651_v27  ;;  %vm2517_vm2 = vcmp.ge.f32.partialorder %v5329_v53, 0.0 }
 0x235   : > { %v2591_v40 = vmul.f32 %v5330_v58, %v7278_v26  ;;  %v2441_v32 = vpop.f32.mrb[50].mxu1  ;;  %3092 = vmatmul.mubr.f32.gmra.mrb[46].mxu0 %v2650_v59  ;;  %vm2518_vm1 = vcmp.ge.f32.partialorder %v5330_v58, 0.0 }
 0x236   : > { %v5331_v9 = vadd.f32 %v2441_v32, %v7491_v5  ;;  %v2443_v10 = vpop.f32.mrb[51].mxu1  ;;  %v2654_v7 = vsel %vm2517_vm2, %v5329_v53, %v2590_v36 }
 0x237   : > { %v5332_v30 = vadd.f32 %v2443_v10, %v7495_v6  ;;  %v2655_v34 = vsel %vm2518_vm1, %v5330_v58, %v2591_v40 }
 0x238   : > { %v2594_v23 = vmul.f32 %v5331_v9, %v7278_v26  ;;  %3097 = vmatprep.mubr.f32.mxu0 %v2655_v34  ;;  %vm2521_vm4 = vcmp.ge.f32.partialorder %v5331_v9, 0.0  ;;  %v3283_v34 = vld [vmem:[%s7957_s7 + $0xf8] sm:$0xff] }
 0x239   : > { %v2595_v13 = vmul.f32 %v5332_v30, %v7278_v26  ;;  %v2447_v20 = vpop.f32.mrb[52].mxu1  ;;  %3098 = vmatmul.mubr.f32.gmra.mrb[48].mxu0 %v2654_v7  ;;  %vm2522_vm3 = vcmp.ge.f32.partialorder %v5332_v30, 0.0  ;;  %v3266_v7 = vld [vmem:[%s7957_s7 + $0x70] sm:$0xff] }
 0x23a   : > { %v5333_v61 = vadd.f32 %v2447_v20, %v7491_v5  ;;  %v2449_v45 = vpop.f32.mrb[53].mxu1  ;;  %v2658_v22 = vsel %vm2521_vm4, %v5331_v9, %v2594_v23  ;;  %v3265_v9 = vld [vmem:[%s7957_s7 + $0x68] sm:$0xff] }
 0x23b   : > { %v5334_v49 = vadd.f32 %v2449_v45, %v7495_v6  ;;  %v2659_v1 = vsel %vm2522_vm3, %v5332_v30, %v2595_v13  ;;  %v3282_v30 = vld [vmem:[%s7957_s7 + $0xf0] sm:$0xff]  ;;  %v3267_v13 = vld [vmem:[%s7957_s7 + $0x78] sm:$0xff]  ;;  %v3494_v45 = vld [vmem:[%s7959_s10] sm:$0xff] }
 0x23c   : > { %v2598_v43 = vmul.f32 %v5333_v61, %v7278_v26  ;;  %3103 = vmatprep.mubr.f32.mxu0 %v2659_v1  ;;  %vm2525_vm6 = vcmp.ge.f32.partialorder %v5333_v61, 0.0  ;;  %v5181_v23 = vpack.c.bf16 %v3283_v34, %v3282_v30  ;;  %v5183_v20 = vpack.c.bf16 %v3267_v13, %v3266_v7  ;;  %v4320_v1 = vld [vmem:[#allocation5] ss:$0 sm:$0xff]  ;;  %v3499_v30 = vld [vmem:[%s7959_s10 + $0x28] sm:$0xff] }
 0x23d   : > { %v2599_v46 = vmul.f32 %v5334_v49, %v7278_v26  ;;  %v2453_v29 = vpop.f32.mrb[54].mxu1  ;;  %3104 = vmatmul.mubr.f32.gmra.mrb[50].mxu0 %v2658_v22  ;;  %vm2526_vm5 = vcmp.ge.f32.partialorder %v5334_v49, 0.0  ;;  %v2812_v22 = vld [vmem:[%s7956_s5] sm:$0x3] }
 0x23e   : > { %v5335_v52 = vadd.f32 %v2453_v29, %v7491_v5  ;;  %v2455_v60 = vpop.f32.mrb[55].mxu1  ;;  %v2662_v50 = vsel %vm2525_vm6, %v5333_v61, %v2598_v43  ;;  %v4318_v61 = vld [vmem:[#allocation4] ss:$0 sm:$0xff]  ;;  %v7615_v29 = vrot.slane %v2812_v22, %v1131_v16 }
 0x23f   : > { %v5336_v12 = vadd.f32 %v2455_v60, %v7495_v6  ;;  %v2663_v62 = vsel %vm2526_vm5, %v5334_v49, %v2599_v46  ;;  %3459 = vperm.xlu1 %5594, %v4318_v61   ;;  %v3495_v49 = vld [vmem:[%s7959_s10 + $0x8] sm:$0xff]  ;;  %v7611_v46 = vrot.slane %v2812_v22, %v1127_v11  ;;  %v3500_v22 = vld [vmem:[%s7959_s10 + $0x30] sm:$0xff] }
 0x240   : > { %v2602_v28 = vmul.f32 %v5335_v52, %v7278_v26  ;;  %3109 = vmatprep.mubr.f32.mxu0 %v2663_v62  ;;  %vm2529_vm8 = vcmp.ge.f32.partialorder %v5335_v52, 0.0  ;;  %v7603_v43 = vpack.c.bf16 %v3495_v49, %v3494_v45  ;;  %v7618_v62 = vpop.permute.xlu0 %3185 }
 0x241   : > { %v2603_v54 = vmul.f32 %v5336_v12, %v7278_v26  ;;  %v2459_v14 = vpop.f32.mrb[56].mxu1  ;;  %3110 = vmatmul.mubr.f32.gmra.mrb[52].mxu0 %v2662_v50  ;;  %vm2530_vm7 = vcmp.ge.f32.partialorder %v5336_v12, 0.0 }
 0x242   : > { %v5337_v57 = vadd.f32 %v2459_v14, %v7491_v5  ;;  %v2461_v18 = vpop.f32.mrb[57].mxu1  ;;  %v2666_v33 = vsel %vm2529_vm8, %v5335_v52, %v2602_v28 }
 0x243   : > { %v5338_v47 = vadd.f32 %v2461_v18, %v7495_v6  ;;  %v2667_v35 = vsel %vm2530_vm7, %v5336_v12, %v2603_v54  ;;  %3685 = vperm.xlu1 %5594, %v4320_v1  }
 0x244   : > { %v2606_v55 = vmul.f32 %v5337_v57, %v7278_v26  ;;  %3115 = vmatprep.mubr.f32.mxu0 %v2667_v35  ;;  %vm2533_vm10 = vcmp.ge.f32.partialorder %v5337_v57, 0.0 }
 0x245   : > { %v2607_v41 = vmul.f32 %v5338_v47, %v7278_v26  ;;  %v2465_v2 = vpop.f32.mrb[58].mxu1  ;;  %3116 = vmatmul.mubr.f32.gmra.mrb[54].mxu0 %v2666_v33  ;;  %vm2534_vm9 = vcmp.ge.f32.partialorder %v5338_v47, 0.0 }
 0x246   : > { %v5339_v37 = vadd.f32 %v2465_v2, %v7491_v5  ;;  %v2467_v39 = vpop.f32.mrb[59].mxu1  ;;  %v2670_v19 = vsel %vm2533_vm10, %v5337_v57, %v2606_v55 }
 0x247   : > { %v5340_v4 = vadd.f32 %v2467_v39, %v7495_v6  ;;  %v2671_v38 = vsel %vm2534_vm9, %v5338_v47, %v2607_v41 }
 0x248   : > { %v2610_v48 = vmul.f32 %v5339_v37, %v7278_v26  ;;  %3121 = vmatprep.mubr.f32.mxu0 %v2671_v38  ;;  %vm2537_vm12 = vcmp.ge.f32.partialorder %v5339_v37, 0.0 }
 0x249   : > { %v2611_v25 = vmul.f32 %v5340_v4, %v7278_v26  ;;  %v2471_v24 = vpop.f32.mrb[60].mxu1  ;;  %3122 = vmatmul.mubr.f32.gmra.mrb[56].mxu0 %v2670_v19  ;;  %vm2538_vm11 = vcmp.ge.f32.partialorder %v5340_v4, 0.0 }
 0x24a   : > { %v5341_v42 = vadd.f32 %v2471_v24, %v7491_v5  ;;  %v2473_v21 = vpop.f32.mrb[61].mxu1  ;;  %v2674_v17 = vsel %vm2537_vm12, %v5339_v37, %v2610_v48 }
 0x24b   : > { %v5342_v3 = vadd.f32 %v2473_v21, %v7495_v6  ;;  %v2675_v51 = vsel %vm2538_vm11, %v5340_v4, %v2611_v25 }
 0x24c   : > { %v2614_v31 = vmul.f32 %v5341_v42, %v7278_v26  ;;  %3127 = vmatprep.mubr.f32.mxu0 %v2675_v51  ;;  %vm2541_vm14 = vcmp.ge.f32.partialorder %v5341_v42, 0.0 }
 0x24d   : > { %v2615_v44 = vmul.f32 %v5342_v3, %v7278_v26  ;;  %v2477_v63 = vpop.f32.mrb[62].mxu1  ;;  %3128 = vmatmul.mubr.f32.gmra.mrb[58].mxu0 %v2674_v17  ;;  %vm2542_vm13 = vcmp.ge.f32.partialorder %v5342_v3, 0.0 }
 0x24e   : > { %v5343_v0 = vadd.f32 %v2477_v63, %v7491_v5  ;;  %v2479_v15 = vpop.f32.mrb[63].mxu1  ;;  %v2678_v27 = vsel %vm2541_vm14, %v5341_v42, %v2614_v31  ;;  %v3280_v5 = vld [vmem:[%s7957_s7 + $0xe0] sm:$0xff] }
 0x24f   : > { %v5344_v53 = vadd.f32 %v2479_v15, %v7495_v6  ;;  %v2679_v56 = vsel %vm2542_vm13, %v5342_v3, %v2615_v44  ;;  %v3281_v6 = vld [vmem:[%s7957_s7 + $0xe8] sm:$0xff] }
 0x250   : > { %v2618_v58 = vmul.f32 %v5343_v0, %v7278_v26  ;;  %3133 = vmatprep.mubr.f32.mxu0 %v2679_v56  ;;  %vm2545_vm0 = vcmp.ge.f32.partialorder %v5343_v0, 0.0  ;;  %v5177_v32 = vpack.c.bf16 %v3281_v6, %v3280_v5  ;;  %v3496_v56 = vld [vmem:[%s7959_s10 + $0x10] sm:$0xff] }
 0x251   : > { %v2619_v36 = vmul.f32 %v5344_v53, %v7278_v26  ;;  %3134 = vmatmul.mubr.f32.gmra.mrb[60].mxu0 %v2678_v27  ;;  %vm2546_vm15 = vcmp.ge.f32.partialorder %v5344_v53, 0.0  ;;  %v3264_v26 = vld [vmem:[%s7957_s7 + $0x60] sm:$0xff] }
 0x252   : > { %v2682_v40 = vsel %vm2545_vm0, %v5343_v0, %v2618_v58  ;;  %v5179_v10 = vpack.c.bf16 %v3265_v9, %v3264_v26  ;;  %5178 = vmatprep.subr.bf16.mxu0 %v5177_v32  ;;  %5239 = vmatprep.subr.bf16.mxu1 %v5177_v32  ;;  %v3497_v58 = vld [vmem:[%s7959_s10 + $0x18] sm:$0xff] }
 0x253   : > { %v2683_v59 = vsel %vm2546_vm15, %v5344_v53, %v2619_v36  ;;  %v5189_v32 = vpack.c.bf16 %v3497_v58, %v3496_v56 }
 0x254   : > { %3139 = vmatprep.mubr.f32.mxu0 %v2683_v59  ;;  %5180 = vmatpush3.bf16.msra.mxu0 %v5179_v10 }
 0x255   : > { %3140 = vmatmul.mubr.f32.gmra.mrb[62].mxu0 %v2682_v40  ;;  %5247 = vmatpush3.bf16.msra.mxu1 %v5179_v10  ;;  %v3498_v10 = vld [vmem:[%s7959_s10 + $0x20] sm:$0xff] }
 0x256   : > { %5182 = vmatprep.subr.bf16.mxu0 %v5181_v23  ;;  %5240 = vmatprep.subr.bf16.mxu1 %v5181_v23  ;;  %v5193_v45 = vpack.c.bf16 %v3499_v30, %v3498_v10 }
 0x258   : > { %5184 = vmatpush3.bf16.msra.mxu0 %v5183_v20 }
 0x259   : > { %5248 = vmatpush3.bf16.msra.mxu1 %v5183_v20 }
 0x25a   : > { %5186 = vmatprep.subr.bf16.mxu1 %v7603_v43 }
 0x2ec   : > { %v3051_v52 = vpop.f32.mrb[32].mxu0 }
 0x2ed   : > { %v5345_v60 = vadd.f32 %v3051_v52, %v7611_v46  ;;  %v3053_v12 = vpop.f32.mrb[33].mxu0  ;;  %v3501_v52 = vld [vmem:[%s7959_s10 + $0x38] sm:$0xff] }
 0x2ee   : > { %v5346_v28 = vadd.f32 %v3053_v12, %v7615_v29 }
 0x2ef   : > { %v3188_v50 = vmul.f32 %v5345_v60, %v7618_v62  ;;  %vm3147_vm1 = vcmp.ge.f32.partialorder %v5345_v60, 0.0 }
 0x2f0   : > { %v3189_v54 = vmul.f32 %v5346_v28, %v7618_v62  ;;  %v3057_v14 = vpop.f32.mrb[34].mxu0  ;;  %vm3148_vm2 = vcmp.ge.f32.partialorder %v5346_v28, 0.0 }
 0x2f1   : > { %v5347_v11 = vadd.f32 %v3057_v14, %v7611_v46  ;;  %v3059_v8 = vpop.f32.mrb[35].mxu0  ;;  %v3220_v18 = vsel %vm3147_vm1, %v5345_v60, %v3188_v50  ;;  %v5197_v14 = vpack.c.bf16 %v3501_v52, %v3500_v22 }
 0x2f2   : > { %v5348_v16 = vadd.f32 %v3059_v8, %v7615_v29  ;;  %v3221_v57 = vsel %vm3148_vm2, %v5346_v28, %v3189_v54 }
 0x2f3   : > { %v3190_v47 = vmul.f32 %v5347_v11, %v7618_v62  ;;  %3355 = vmatprep.mubr.f32.mxu0 %v3221_v57  ;;  %vm3149_vm4 = vcmp.ge.f32.partialorder %v5347_v11, 0.0  ;;  %v3503_v57 = vld [vmem:[%s7959_s10 + $0x48] sm:$0xff] }
 0x2f4   : > { %v3191_v35 = vmul.f32 %v5348_v16, %v7618_v62  ;;  %v3063_v55 = vpop.f32.mrb[36].mxu0  ;;  %3356 = vmatmul.mubr.f32.vlgmr.msra.gmra.mrb[64].mxu0 %v3220_v18  ;;  %vm3150_vm3 = vcmp.ge.f32.partialorder %v5348_v16, 0.0 }
 0x2f5   : > { %v5349_v33 = vadd.f32 %v3063_v55, %v7611_v46  ;;  %v3065_v41 = vpop.f32.mrb[37].mxu0  ;;  %v3222_v4 = vsel %vm3149_vm4, %v5347_v11, %v3190_v47 }
 0x2f6   : > { %v5350_v2 = vadd.f32 %v3065_v41, %v7615_v29  ;;  %v3223_v37 = vsel %vm3150_vm3, %v5348_v16, %v3191_v35  ;;  %v3502_v16 = vld [vmem:[%s7959_s10 + $0x40] sm:$0xff] }
 0x2f7   : > { %v3192_v39 = vmul.f32 %v5349_v33, %v7618_v62  ;;  %3360 = vmatprep.mubr.f32.mxu0 %v3223_v37  ;;  %vm3151_vm6 = vcmp.ge.f32.partialorder %v5349_v33, 0.0 }
 0x2f8   : > { %v3193_v38 = vmul.f32 %v5350_v2, %v7618_v62  ;;  %v3069_v48 = vpop.f32.mrb[38].mxu0  ;;  %3361 = vmatmul.mubr.f32.gmra.mrb[66].mxu0 %v3222_v4  ;;  %vm3152_vm5 = vcmp.ge.f32.partialorder %v5350_v2, 0.0 }
 0x2f9   : > { %v5351_v19 = vadd.f32 %v3069_v48, %v7611_v46  ;;  %v3071_v25 = vpop.f32.mrb[39].mxu0  ;;  %v3224_v3 = vsel %vm3151_vm6, %v5349_v33, %v3192_v39 }
 0x2fa   : > { %v5352_v24 = vadd.f32 %v3071_v25, %v7615_v29  ;;  %v3225_v42 = vsel %vm3152_vm5, %v5350_v2, %v3193_v38  ;;  %v5201_v2 = vpack.c.bf16 %v3503_v57, %v3502_v16 }
 0x2fb   : > { %v3194_v21 = vmul.f32 %v5351_v19, %v7618_v62  ;;  %3365 = vmatprep.mubr.f32.mxu0 %v3225_v42  ;;  %vm3153_vm8 = vcmp.ge.f32.partialorder %v5351_v19, 0.0 }
 0x2fc   : > { %v3195_v51 = vmul.f32 %v5352_v24, %v7618_v62  ;;  %v3075_v31 = vpop.f32.mrb[40].mxu0  ;;  %3366 = vmatmul.mubr.f32.gmra.mrb[68].mxu0 %v3224_v3  ;;  %vm3154_vm7 = vcmp.ge.f32.partialorder %v5352_v24, 0.0 }
 0x2fd   : > { %v5353_v17 = vadd.f32 %v3075_v31, %v7611_v46  ;;  %v3077_v44 = vpop.f32.mrb[41].mxu0  ;;  %v3226_v53 = vsel %vm3153_vm8, %v5351_v19, %v3194_v21 }
 0x2fe   : > { %v5354_v63 = vadd.f32 %v3077_v44, %v7615_v29  ;;  %v3227_v0 = vsel %vm3154_vm7, %v5352_v24, %v3195_v51 }
 0x2ff   : > { %v3196_v15 = vmul.f32 %v5353_v17, %v7618_v62  ;;  %3370 = vmatprep.mubr.f32.mxu0 %v3227_v0  ;;  %vm3155_vm9 = vcmp.ge.f32.partialorder %v5353_v17, 0.0 }
 0x300   : > { %v3197_v27 = vmul.f32 %v5354_v63, %v7618_v62  ;;  %v3081_v36 = vpop.f32.mrb[42].mxu0  ;;  %3371 = vmatmul.mubr.f32.gmra.mrb[70].mxu0 %v3226_v53  ;;  %vm3156_vm10 = vcmp.ge.f32.partialorder %v5354_v63, 0.0 }
 0x301   : > { %v5355_v59 = vadd.f32 %v3081_v36, %v7611_v46  ;;  %v3083_v40 = vpop.f32.mrb[43].mxu0  ;;  %v3228_v26 = vsel %vm3155_vm9, %v5353_v17, %v3196_v15 }
 0x302   : > { %v5356_v5 = vadd.f32 %v3083_v40, %v7615_v29  ;;  %v3229_v6 = vsel %vm3156_vm10, %v5354_v63, %v3197_v27 }
 0x303   : > { %v3198_v9 = vmul.f32 %v5355_v59, %v7618_v62  ;;  %3375 = vmatprep.mubr.f32.mxu1 %v3229_v6  ;;  %vm3157_vm12 = vcmp.ge.f32.partialorder %v5355_v59, 0.0 }
 0x304   : > { %v3199_v34 = vmul.f32 %v5356_v5, %v7618_v62  ;;  %v3087_v23 = vpop.f32.mrb[44].mxu0  ;;  %3376 = vmatmul.mubr.f32.vlgmr.msra.gmra.mrb[64].mxu1 %v3228_v26  ;;  %vm3158_vm11 = vcmp.ge.f32.partialorder %v5356_v5, 0.0 }
 0x305   : > { %v5357_v7 = vadd.f32 %v3087_v23, %v7611_v46  ;;  %v3089_v13 = vpop.f32.mrb[45].mxu0  ;;  %5188 = vmatpush3.bf16.msra.mxu1 %v7603_v43  ;;  %v3230_v1 = vsel %vm3157_vm12, %v5355_v59, %v3198_v9 }
 0x306   : > { %v5358_v20 = vadd.f32 %v3089_v13, %v7615_v29  ;;  %v3231_v61 = vsel %vm3158_vm11, %v5356_v5, %v3199_v34  ;;  %5190 = vmatprep.subr.bf16.mxu1 %v5189_v32 }
 0x307   : > { %v3200_v49 = vmul.f32 %v5357_v7, %v7618_v62  ;;  %3380 = vmatprep.mubr.f32.mxu1 %v3231_v61  ;;  %vm3159_vm14 = vcmp.ge.f32.partialorder %v5357_v7, 0.0 }
 0x308   : > { %v3201_v60 = vmul.f32 %v5358_v20, %v7618_v62  ;;  %v3093_v43 = vpop.f32.mrb[46].mxu0  ;;  %3381 = vmatmul.mubr.f32.gmra.mrb[66].mxu1 %v3230_v1  ;;  %vm3160_vm13 = vcmp.ge.f32.partialorder %v5358_v20, 0.0 }
 0x309   : > { %v5359_v12 = vadd.f32 %v3093_v43, %v7611_v46  ;;  %v3095_v28 = vpop.f32.mrb[47].mxu0  ;;  %5192 = vmatpush3.bf16.msra.mxu1 %v5189_v32  ;;  %v3232_v8 = vsel %vm3159_vm14, %v5357_v7, %v3200_v49 }
 0x30a   : > { %v5360_v50 = vadd.f32 %v3095_v28, %v7615_v29  ;;  %v3233_v54 = vsel %vm3160_vm13, %v5358_v20, %v3201_v60  ;;  %5194 = vmatprep.subr.bf16.mxu1 %v5193_v45 }
 0x30b   : > { %v3202_v11 = vmul.f32 %v5359_v12, %v7618_v62  ;;  %3385 = vmatprep.mubr.f32.mxu1 %v3233_v54  ;;  %vm3161_vm0 = vcmp.ge.f32.partialorder %v5359_v12, 0.0 }
 0x30c   : > { %v3203_v18 = vmul.f32 %v5360_v50, %v7618_v62  ;;  %v3099_v47 = vpop.f32.mrb[48].mxu0  ;;  %3386 = vmatmul.mubr.f32.gmra.mrb[68].mxu1 %v3232_v8  ;;  %vm3162_vm15 = vcmp.ge.f32.partialorder %v5360_v50, 0.0 }
 0x30d   : > { %v5361_v35 = vadd.f32 %v3099_v47, %v7611_v46  ;;  %v3101_v55 = vpop.f32.mrb[49].mxu0  ;;  %5196 = vmatpush3.bf16.msra.mxu1 %v5193_v45  ;;  %v3234_v39 = vsel %vm3161_vm0, %v5359_v12, %v3202_v11 }
 0x30e   : > { %v5362_v33 = vadd.f32 %v3101_v55, %v7615_v29  ;;  %v3235_v41 = vsel %vm3162_vm15, %v5360_v50, %v3203_v18  ;;  %5198 = vmatprep.subr.bf16.mxu1 %v5197_v14 }
 0x30f   : > { %v3204_v37 = vmul.f32 %v5361_v35, %v7618_v62  ;;  %3390 = vmatprep.mubr.f32.mxu1 %v3235_v41  ;;  %vm3163_vm2 = vcmp.ge.f32.partialorder %v5361_v35, 0.0 }
 0x310   : > { %v3205_v4 = vmul.f32 %v5362_v33, %v7618_v62  ;;  %v3105_v38 = vpop.f32.mrb[50].mxu0  ;;  %3391 = vmatmul.mubr.f32.gmra.mrb[70].mxu1 %v3234_v39  ;;  %vm3164_vm1 = vcmp.ge.f32.partialorder %v5362_v33, 0.0  ;;  %v3507_v39 = vld [vmem:[%s7959_s10 + $0x68] sm:$0xff] }
 0x311   : > { %v5363_v48 = vadd.f32 %v3105_v38, %v7611_v46  ;;  %v3107_v19 = vpop.f32.mrb[51].mxu0  ;;  %5200 = vmatpush3.bf16.msra.mxu1 %v5197_v14  ;;  %v3236_v21 = vsel %vm3163_vm2, %v5361_v35, %v3204_v37  ;;  %v3508_v38 = vld [vmem:[%s7959_s10 + $0x70] sm:$0xff] }
 0x312   : > { %v5364_v25 = vadd.f32 %v3107_v19, %v7615_v29  ;;  %v3237_v24 = vsel %vm3164_vm1, %v5362_v33, %v3205_v4  ;;  %5202 = vmatprep.subr.bf16.mxu1 %v5201_v2 }
 0x313   : > { %v3206_v42 = vmul.f32 %v5363_v48, %v7618_v62  ;;  %3395 = vmatprep.mubr.f32.mxu1 %v3237_v24  ;;  %vm3165_vm4 = vcmp.ge.f32.partialorder %v5363_v48, 0.0  ;;  %v3721_v24 = vld [vmem:[%s7961_s13 + $0x8] sm:$0xff] }
 0x314   : > { %v3207_v3 = vmul.f32 %v5364_v25, %v7618_v62  ;;  %v3111_v51 = vpop.f32.mrb[52].mxu0  ;;  %3396 = vmatmul.mubr.f32.gmra.mrb[72].mxu1 %v3236_v21  ;;  %vm3166_vm3 = vcmp.ge.f32.partialorder %v5364_v25, 0.0 }
 0x315   : > { %v5365_v31 = vadd.f32 %v3111_v51, %v7611_v46  ;;  %v3113_v17 = vpop.f32.mrb[53].mxu0  ;;  %5204 = vmatpush3.bf16.msra.mxu1 %v5201_v2  ;;  %v3238_v15 = vsel %vm3165_vm4, %v5363_v48, %v3206_v42  ;;  %v3509_v48 = vld [vmem:[%s7959_s10 + $0x78] sm:$0xff] }
 0x316   : > { %v5366_v44 = vadd.f32 %v3113_v17, %v7615_v29  ;;  %v3239_v63 = vsel %vm3166_vm3, %v5364_v25, %v3207_v3  ;;  %v5213_v19 = vpack.c.bf16 %v3509_v48, %v3508_v38  ;;  %v3720_v25 = vld [vmem:[%s7961_s13] sm:$0xff]  ;;  %v7737_v17 = vpop.permute.xlu1 %3459 }
 0x317   : > { %v3208_v0 = vmul.f32 %v5365_v31, %v7618_v62  ;;  %3400 = vmatprep.mubr.f32.mxu1 %v3239_v63  ;;  %vm3167_vm6 = vcmp.ge.f32.partialorder %v5365_v31, 0.0  ;;  %v5217_v42 = vpack.c.bf16 %v3721_v24, %v3720_v25  ;;  %v7735_v3 = vld [vmem:[%s7958_s8] ss:$0 sm:$0xff] }
 0x318   : > { %v3209_v53 = vmul.f32 %v5366_v44, %v7618_v62  ;;  %v3117_v56 = vpop.f32.mrb[54].mxu0  ;;  %3401 = vmatmul.mubr.f32.gmra.mrb[74].mxu1 %v3238_v15  ;;  %vm3168_vm5 = vcmp.ge.f32.partialorder %v5366_v44, 0.0 }
 0x319   : > { %v5367_v58 = vadd.f32 %v3117_v56, %v7611_v46  ;;  %v3119_v27 = vpop.f32.mrb[55].mxu0  ;;  %v3240_v5 = vsel %vm3167_vm6, %v5365_v31, %v3208_v0 }
 0x31a   : > { %v5368_v36 = vadd.f32 %v3119_v27, %v7615_v29  ;;  %v3241_v59 = vsel %vm3168_vm5, %v5366_v44, %v3209_v53 }
 0x31b   : > { %v3210_v40 = vmul.f32 %v5367_v58, %v7618_v62  ;;  %3405 = vmatprep.mubr.f32.mxu1 %v3241_v59  ;;  %vm3169_vm8 = vcmp.ge.f32.partialorder %v5367_v58, 0.0  ;;  %v3723_v59 = vld [vmem:[%s7961_s13 + $0x18] sm:$0xff] }
 0x31c   : > { %v3211_v6 = vmul.f32 %v5368_v36, %v7618_v62  ;;  %v3123_v32 = vpop.f32.mrb[56].mxu0  ;;  %3406 = vmatmul.mubr.f32.gmra.mrb[76].mxu1 %v3240_v5  ;;  %vm3170_vm7 = vcmp.ge.f32.partialorder %v5368_v36, 0.0 }
 0x31d   : > { %v5369_v26 = vadd.f32 %v3123_v32, %v7611_v46  ;;  %v3125_v9 = vpop.f32.mrb[57].mxu0  ;;  %v3242_v23 = vsel %vm3169_vm8, %v5367_v58, %v3210_v40 }
 0x31e   : > { %v5370_v10 = vadd.f32 %v3125_v9, %v7615_v29  ;;  %v3243_v30 = vsel %vm3170_vm7, %v5368_v36, %v3211_v6  ;;  %v3722_v36 = vld [vmem:[%s7961_s13 + $0x10] sm:$0xff] }
 0x31f   : > { %v3212_v34 = vmul.f32 %v5369_v26, %v7618_v62  ;;  %3410 = vmatprep.mubr.f32.mxu1 %v3243_v30  ;;  %vm3171_vm10 = vcmp.ge.f32.partialorder %v5369_v26, 0.0  ;;  %v5221_v32 = vpack.c.bf16 %v3723_v59, %v3722_v36 }
 0x320   : > { %v3213_v7 = vmul.f32 %v5370_v10, %v7618_v62  ;;  %v3129_v13 = vpop.f32.mrb[58].mxu0  ;;  %3411 = vmatmul.mubr.f32.gmra.mrb[78].mxu1 %v3242_v23  ;;  %vm3172_vm9 = vcmp.ge.f32.partialorder %v5370_v10, 0.0 }
 0x321   : > { %v5371_v20 = vadd.f32 %v3129_v13, %v7611_v46  ;;  %v3131_v61 = vpop.f32.mrb[59].mxu0  ;;  %v3244_v22 = vsel %vm3171_vm10, %v5369_v26, %v3212_v34 }
 0x322   : > { %v5372_v45 = vadd.f32 %v3131_v61, %v7615_v29  ;;  %v3245_v49 = vsel %vm3172_vm9, %v5370_v10, %v3213_v7 }
 0x323   : > { %v3214_v1 = vmul.f32 %v5371_v20, %v7618_v62  ;;  %3415 = vmatprep.mubr.f32.mxu1 %v3245_v49  ;;  %vm3173_vm12 = vcmp.ge.f32.partialorder %v5371_v20, 0.0 }
 0x324   : > { %v3215_v52 = vmul.f32 %v5372_v45, %v7618_v62  ;;  %v3135_v60 = vpop.f32.mrb[60].mxu0  ;;  %3416 = vmatmul.mubr.f32.gmra.mrb[80].mxu1 %v3244_v22  ;;  %vm3174_vm11 = vcmp.ge.f32.partialorder %v5372_v45, 0.0 }
 0x325   : > { %v5373_v43 = vadd.f32 %v3135_v60, %v7611_v46  ;;  %v3137_v12 = vpop.f32.mrb[61].mxu0  ;;  %v3246_v14 = vsel %vm3173_vm12, %v5371_v20, %v3214_v1 }
 0x326   : > { %v5374_v28 = vadd.f32 %v3137_v12, %v7615_v29  ;;  %v3247_v50 = vsel %vm3174_vm11, %v5372_v45, %v3215_v52 }
 0x327   : > { %v3216_v54 = vmul.f32 %v5373_v43, %v7618_v62  ;;  %3420 = vmatprep.mubr.f32.mxu1 %v3247_v50  ;;  %vm3175_vm14 = vcmp.ge.f32.partialorder %v5373_v43, 0.0 }
 0x328   : > { %v3217_v11 = vmul.f32 %v5374_v28, %v7618_v62  ;;  %v3141_v8 = vpop.f32.mrb[62].mxu0  ;;  %3421 = vmatmul.mubr.f32.gmra.mrb[82].mxu1 %v3246_v14  ;;  %vm3176_vm13 = vcmp.ge.f32.partialorder %v5374_v28, 0.0 }
 0x329   : > { %v5375_v16 = vadd.f32 %v3141_v8, %v7611_v46  ;;  %v3143_v57 = vpop.f32.mrb[63].mxu0  ;;  %v3248_v55 = vsel %vm3175_vm14, %v5373_v43, %v3216_v54  ;;  %v3504_v46 = vld [vmem:[%s7959_s10 + $0x50] sm:$0xff] }
 0x32a   : > { %v5376_v18 = vadd.f32 %v3143_v57, %v7615_v29  ;;  %v3249_v47 = vsel %vm3176_vm13, %v5374_v28, %v3217_v11  ;;  %v3505_v29 = vld [vmem:[%s7959_s10 + $0x58] sm:$0xff] }
 0x32b   : > { %v3218_v35 = vmul.f32 %v5375_v16, %v7618_v62  ;;  %3425 = vmatprep.mubr.f32.mxu1 %v3249_v47  ;;  %vm3177_vm0 = vcmp.ge.f32.partialorder %v5375_v16, 0.0  ;;  %v5205_v37 = vpack.c.bf16 %v3505_v29, %v3504_v46 }
 0x32c   : > { %v3219_v33 = vmul.f32 %v5376_v18, %v7618_v62  ;;  %3426 = vmatmul.mubr.f32.gmra.mrb[84].mxu1 %v3248_v55  ;;  %vm3178_vm15 = vcmp.ge.f32.partialorder %v5376_v18, 0.0  ;;  %v3506_v62 = vld [vmem:[%s7959_s10 + $0x60] sm:$0xff] }
 0x32d   : > { %v3250_v2 = vsel %vm3177_vm0, %v5375_v16, %v3218_v35  ;;  %5206 = vmatprep.subr.bf16.mxu1 %v5205_v37  ;;  %v5209_v4 = vpack.c.bf16 %v3507_v39, %v3506_v62 }
 0x32e   : > { %v3251_v41 = vsel %vm3178_vm15, %v5376_v18, %v3219_v33  ;;  %5208 = vmatpush3.bf16.msra.mxu1 %v5205_v37 }
 0x32f   : > { %3430 = vmatprep.mubr.f32.mxu1 %v3251_v41  ;;  %5210 = vmatprep.subr.bf16.mxu1 %v5209_v4 }
 0x330   : > { %3431 = vmatmul.mubr.f32.gmra.mrb[86].mxu1 %v3250_v2 }
 0x332   : > { %5212 = vmatpush3.bf16.msra.mxu1 %v5209_v4 }
 0x333   : > { %5214 = vmatprep.subr.bf16.mxu1 %v5213_v19 }
 0x336   : > { %5216 = vmatpush3.bf16.msra.mxu1 %v5213_v19 }
 0x337   : > { %5218 = vmatprep.subr.bf16.mxu1 %v5217_v42 }
 0x3c7   : > { %v4390_v21 = vpop.f32.mrb[64].mxu0 }
 0x3c8   : > { %v4391_v51 = vpop.f32.mrb[65].mxu0 }
 0x3c9   : > { %v4392_v31 = vadd.f32 %v4391_v51, %v4390_v21 }
 0x3cb   : > { %v3358_v44 = vadd.f32 %v4392_v31, %v7735_v3  ;;  %v4393_v63 = vpop.f32.mrb[66].mxu0 }
 0x3cc   : > { %v4394_v0 = vpop.f32.mrb[67].mxu0 }
 0x3cd   : > { %v4395_v15 = vadd.f32 %v4394_v0, %v4393_v63  ;;  %vm3437_vm1 = vcmp.ge.f32.partialorder %v3358_v44, 0.0  ;;  %v3462_v53 = vmul.f32 %v7737_v17, %v3358_v44 }
 0x3cf   : > { %v3363_v56 = vadd.f32 %v4395_v15, %v7735_v3  ;;  %v4396_v58 = vpop.f32.mrb[68].mxu0  ;;  %v3478_v27 = vsel %vm3437_vm1, %v3358_v44, %v3462_v53 }
 0x3d0   : > { %v4397_v40 = vpop.f32.mrb[69].mxu0  ;;  %4543 = vmatprep.mubr.f32.mxu1 %v3478_v27 }
 0x3d1   : > { %vm3438_vm2 = vcmp.ge.f32.partialorder %v3363_v56, 0.0  ;;  %v3463_v5 = vmul.f32 %v7737_v17, %v3363_v56  ;;  %v4398_v6 = vadd.f32 %v4397_v40, %v4396_v58 }
 0x3d3   : > { %v3368_v26 = vadd.f32 %v4398_v6, %v7735_v3  ;;  %v4399_v9 = vpop.f32.mrb[70].mxu0  ;;  %v3479_v10 = vsel %vm3438_vm2, %v3363_v56, %v3463_v5 }
 0x3d4   : > { %v4400_v30 = vpop.f32.mrb[71].mxu0  ;;  %4544 = vmatmul.mubr.f32.vlgmr.msra.gmra.mrb[88].mxu1 %v3479_v10 }
 0x3d5   : > { %v4401_v34 = vadd.f32 %v4400_v30, %v4399_v9  ;;  %vm3439_vm3 = vcmp.ge.f32.partialorder %v3368_v26, 0.0  ;;  %v3464_v23 = vmul.f32 %v7737_v17, %v3368_v26  ;;  %5220 = vmatpush3.bf16.msra.mxu1 %v5217_v42 }
 0x3d6   : > { %5222 = vmatprep.subr.bf16.mxu1 %v5221_v32 }
 0x3d7   : > { %v3373_v7 = vadd.f32 %v4401_v34, %v7735_v3  ;;  %v4402_v13 = vpop.f32.mrb[64].mxu1  ;;  %v3480_v20 = vsel %vm3439_vm3, %v3368_v26, %v3464_v23  ;;  %vm3735_vm3 = vcmask 523264  }
 0x3d8   : > { %v4403_v61 = vpop.f32.mrb[65].mxu1  ;;  %4546 = vmatprep.mubr.f32.mxu1 %v3480_v20 }
 0x3d9   : > { %v4404_v45 = vadd.f32 %v4403_v61, %v4402_v13  ;;  %vm3440_vm4 = vcmp.ge.f32.partialorder %v3373_v7, 0.0  ;;  %v3465_v49 = vmul.f32 %v7737_v17, %v3373_v7  ;;  %5224 = vmatpush3.bf16.msra.mxu1 %v5221_v32 }
 0x3db   : > { %v3378_v1 = vadd.f32 %v4404_v45, %v7735_v3  ;;  %v4405_v22 = vpop.f32.mrb[66].mxu1  ;;  %v3481_v52 = vsel %vm3440_vm4, %v3373_v7, %v3465_v49 }
 0x3dc   : > { %v4406_v60 = vpop.f32.mrb[67].mxu1  ;;  %4547 = vmatmul.mubr.f32.gmra.mrb[90].mxu1 %v3481_v52 }
 0x3dd   : > { %v4407_v43 = vadd.f32 %v4406_v60, %v4405_v22  ;;  %vm3441_vm5 = vcmp.ge.f32.partialorder %v3378_v1, 0.0  ;;  %v3466_v12 = vmul.f32 %v7737_v17, %v3378_v1 }
 0x3df   : > { %v3383_v28 = vadd.f32 %v4407_v43, %v7735_v3  ;;  %v4408_v50 = vpop.f32.mrb[68].mxu1  ;;  %v3482_v54 = vsel %vm3441_vm5, %v3378_v1, %v3466_v12 }
 0x3e0   : > { %v4409_v14 = vpop.f32.mrb[69].mxu1  ;;  %4549 = vmatprep.mubr.f32.mxu1 %v3482_v54  ;;  %v3724_v54 = vld [vmem:[%s7961_s13 + $0x20] sm:$0xff] }
 0x3e1   : > { %v4410_v11 = vadd.f32 %v4409_v14, %v4408_v50  ;;  %vm3442_vm6 = vcmp.ge.f32.partialorder %v3383_v28, 0.0  ;;  %v3467_v8 = vmul.f32 %v7737_v17, %v3383_v28  ;;  %v3725_v14 = vld [vmem:[%s7961_s13 + $0x28] sm:$0xff] }
 0x3e3   : > { %v3388_v16 = vadd.f32 %v4410_v11, %v7735_v3  ;;  %v4411_v57 = vpop.f32.mrb[70].mxu1  ;;  %v3483_v18 = vsel %vm3442_vm6, %v3383_v28, %v3467_v8  ;;  %v5225_v11 = vpack.c.bf16 %v3725_v14, %v3724_v54 }
 0x3e4   : > { %v4412_v47 = vpop.f32.mrb[71].mxu1  ;;  %4550 = vmatmul.mubr.f32.gmra.mrb[92].mxu1 %v3483_v18 }
 0x3e5   : > { %v4413_v35 = vadd.f32 %v4412_v47, %v4411_v57  ;;  %vm3443_vm7 = vcmp.ge.f32.partialorder %v3388_v16, 0.0  ;;  %v3468_v55 = vmul.f32 %v7737_v17, %v3388_v16  ;;  %5226 = vmatprep.subr.bf16.mxu1 %v5225_v11 }
 0x3e6   : > { %5228 = vmatpush3.bf16.msra.mxu1 %v5225_v11 }
 0x3e7   : > { %v3393_v33 = vadd.f32 %v4413_v35, %v7735_v3  ;;  %v4414_v41 = vpop.f32.mrb[72].mxu1  ;;  %v3484_v2 = vsel %vm3443_vm7, %v3388_v16, %v3468_v55  ;;  %v7792_v16 = vld [vmem:[%s7960_s11] ss:$0 sm:$0xff]  ;;  %v7795_v35 = vpop.permute.xlu1 %3685 }
 0x3e8   : > { %v4415_v46 = vpop.f32.mrb[73].mxu1  ;;  %4552 = vmatprep.mubr.f32.mxu1 %v3484_v2 }
 0x3e9   : > { %v4416_v29 = vadd.f32 %v4415_v46, %v4414_v41  ;;  %vm3444_vm8 = vcmp.ge.f32.partialorder %v3393_v33, 0.0  ;;  %v3469_v37 = vmul.f32 %v7737_v17, %v3393_v33 }
 0x3eb   : > { %v3398_v62 = vadd.f32 %v4416_v29, %v7735_v3  ;;  %v4417_v39 = vpop.f32.mrb[74].mxu1  ;;  %v3485_v4 = vsel %vm3444_vm8, %v3393_v33, %v3469_v37 }
 0x3ec   : > { %v4418_v38 = vpop.f32.mrb[75].mxu1  ;;  %4553 = vmatmul.mubr.f32.gmra.mrb[94].mxu1 %v3485_v4 }
 0x3ed   : > { %v4419_v48 = vadd.f32 %v4418_v38, %v4417_v39  ;;  %vm3445_vm9 = vcmp.ge.f32.partialorder %v3398_v62, 0.0  ;;  %v3470_v19 = vmul.f32 %v7737_v17, %v3398_v62 }
 0x3ef   : > { %v3403_v25 = vadd.f32 %v4419_v48, %v7735_v3  ;;  %v4420_v24 = vpop.f32.mrb[76].mxu1  ;;  %v3486_v42 = vsel %vm3445_vm9, %v3398_v62, %v3470_v19 }
 0x3f0   : > { %v4421_v21 = vpop.f32.mrb[77].mxu1  ;;  %4555 = vmatprep.mubr.f32.mxu1 %v3486_v42 }
 0x3f1   : > { %v4422_v51 = vadd.f32 %v4421_v21, %v4420_v24  ;;  %vm3446_vm10 = vcmp.ge.f32.partialorder %v3403_v25, 0.0  ;;  %v3471_v31 = vmul.f32 %v7737_v17, %v3403_v25 }
 0x3f3   : > { %v3408_v44 = vadd.f32 %v4422_v51, %v7735_v3  ;;  %v4423_v63 = vpop.f32.mrb[78].mxu1  ;;  %v3487_v0 = vsel %vm3446_vm10, %v3403_v25, %v3471_v31 }
 0x3f4   : > { %v4424_v15 = vpop.f32.mrb[79].mxu1  ;;  %4556 = vmatmul.mubr.f32.gmra.mrb[96].mxu1 %v3487_v0 }
 0x3f5   : > { %v4425_v53 = vadd.f32 %v4424_v15, %v4423_v63  ;;  %vm3447_vm11 = vcmp.ge.f32.partialorder %v3408_v44, 0.0  ;;  %v3472_v56 = vmul.f32 %v7737_v17, %v3408_v44 }
 0x3f7   : > { %v3413_v58 = vadd.f32 %v4425_v53, %v7735_v3  ;;  %v4426_v27 = vpop.f32.mrb[80].mxu1  ;;  %v3488_v36 = vsel %vm3447_vm11, %v3408_v44, %v3472_v56 }
 0x3f8   : > { %v4427_v59 = vpop.f32.mrb[81].mxu1  ;;  %4558 = vmatprep.mubr.f32.mxu1 %v3488_v36 }
 0x3f9   : > { %v4428_v40 = vadd.f32 %v4427_v59, %v4426_v27  ;;  %vm3448_vm12 = vcmp.ge.f32.partialorder %v3413_v58, 0.0  ;;  %v3473_v5 = vmul.f32 %v7737_v17, %v3413_v58 }
 0x3fb   : > { %v3418_v6 = vadd.f32 %v4428_v40, %v7735_v3  ;;  %v4429_v32 = vpop.f32.mrb[82].mxu1  ;;  %v3489_v26 = vsel %vm3448_vm12, %v3413_v58, %v3473_v5 }
 0x3fc   : > { %v4430_v9 = vpop.f32.mrb[83].mxu1  ;;  %4559 = vmatmul.mubr.f32.gmra.mrb[98].mxu1 %v3489_v26 }
 0x3fd   : > { %v4431_v10 = vadd.f32 %v4430_v9, %v4429_v32  ;;  %vm3449_vm13 = vcmp.ge.f32.partialorder %v3418_v6, 0.0  ;;  %v3474_v30 = vmul.f32 %v7737_v17, %v3418_v6 }
 0x3ff   : > { %v3423_v34 = vadd.f32 %v4431_v10, %v7735_v3  ;;  %v4432_v23 = vpop.f32.mrb[84].mxu1  ;;  %v3490_v7 = vsel %vm3449_vm13, %v3418_v6, %v3474_v30 }
 0x400   : > { %v4433_v13 = vpop.f32.mrb[85].mxu1  ;;  %4561 = vmatprep.mubr.f32.mxu1 %v3490_v7 }
 0x401   : > { %v4434_v20 = vadd.f32 %v4433_v13, %v4432_v23  ;;  %vm3450_vm14 = vcmp.ge.f32.partialorder %v3423_v34, 0.0  ;;  %v3475_v61 = vmul.f32 %v7737_v17, %v3423_v34 }
 0x403   : > { %v3428_v45 = vadd.f32 %v4434_v20, %v7735_v3  ;;  %v4435_v49 = vpop.f32.mrb[86].mxu1  ;;  %v3491_v1 = vsel %vm3450_vm14, %v3423_v34, %v3475_v61 }
 0x404   : > { %v4436_v22 = vpop.f32.mrb[87].mxu1  ;;  %4562 = vmatmul.mubr.f32.gmra.mrb[100].mxu1 %v3491_v1 }
 0x405   : > { %v4437_v52 = vadd.f32 %v4436_v22, %v4435_v49  ;;  %vm3451_vm15 = vcmp.ge.f32.partialorder %v3428_v45, 0.0  ;;  %v3476_v60 = vmul.f32 %v7737_v17, %v3428_v45 }
 0x407   : > { %v3433_v43 = vadd.f32 %v4437_v52, %v7735_v3  ;;  %v3492_v12 = vsel %vm3451_vm15, %v3428_v45, %v3476_v60  ;;  %v3726_v3 = vld [vmem:[%s7961_s13 + $0x30] sm:$0xff] }
 0x408   : > { %4564 = vmatprep.mubr.f32.mxu1 %v3492_v12 }
 0x409   : > { %vm3452_vm0 = vcmp.ge.f32.partialorder %v3433_v43, 0.0  ;;  %v3477_v28 = vmul.f32 %v7737_v17, %v3433_v43  ;;  %v3727_v17 = vld [vmem:[%s7961_s13 + $0x38] sm:$0xff] }
 0x40a   : > { %v5229_v8 = vpack.c.bf16 %v3727_v17, %v3726_v3 }
 0x40b   : > { %v3493_v50 = vsel %vm3452_vm0, %v3433_v43, %v3477_v28 }
 0x40c   : > { %4565 = vmatmul.mubr.f32.gmra.mrb[102].mxu1 %v3493_v50  ;;  %5230 = vmatprep.subr.bf16.mxu1 %v5229_v8 }
 0x40d   : > { %5232 = vmatpush3.bf16.msra.mxu1 %v5229_v8 }
 0x4a7   : > { %v4545_v57 = vpop.f32.mrb[88].mxu1 }
 0x4a8   : > { %v3589_v18 = vadd.f32 %v4545_v57, %v7792_v16  ;;  %v3583_v47 = vpop.f32.mrb[89].mxu1 }
 0x4a9   : > { %v3584_v55 = vadd.f32 %v7792_v16, %v3583_v47  ;;  %v3946_v47 = vld [vmem:[%s7963_s15] sm:$0x3] }
 0x4aa   : > { %v3689_v33 = vmul.f32 %v7795_v35, %v3589_v18  ;;  %vm3664_vm1 = vcmp.ge.f32.partialorder %v3589_v18, 0.0 }
 0x4ab   : > { %vm3663_vm2 = vcmp.ge.f32.partialorder %v3584_v55, 0.0  ;;  %v3688_v41 = vmul.f32 %v7795_v35, %v3584_v55 }
 0x4ac   : > { %v3705_v46 = vsel %vm3664_vm1, %v3589_v18, %v3689_v33 }
 0x4ad   : > { %v3704_v2 = vsel %vm3663_vm2, %v3584_v55, %v3688_v41  ;;  %vm4002_vm2 = vcmask 1041408  }
 0x4ae   : > { %4583 = vmatprep.mubr.msk.f32.mxu1 %vm3735_vm3, %v3704_v2  ;;  %4607 = vmatprep.subr.msk.mxu0 %vm4002_vm2, %v3946_v47 }
 0x4af   : > { %v4548_v29 = vpop.f32.mrb[90].mxu1  ;;  %4584 = vmatmul.mubr.msk.f32.vlgmr.msra.gmra.mrb[104].mxu1 %vm3735_vm3, %v3705_v46  ;;  %4608 = vmatpush3.msk.msra.mxu0 %vm4002_vm2, %v3946_v47 }
 0x4b0   : > { %v3599_v37 = vadd.f32 %v4548_v29, %v7792_v16  ;;  %v3593_v62 = vpop.f32.mrb[91].mxu1 }
 0x4b1   : > { %v3594_v39 = vadd.f32 %v7792_v16, %v3593_v62 }
 0x4b2   : > { %v3691_v4 = vmul.f32 %v7795_v35, %v3599_v37  ;;  %vm3666_vm4 = vcmp.ge.f32.partialorder %v3599_v37, 0.0 }
 0x4b3   : > { %vm3665_vm5 = vcmp.ge.f32.partialorder %v3594_v39, 0.0  ;;  %v3690_v38 = vmul.f32 %v7795_v35, %v3594_v39 }
 0x4b4   : > { %v3707_v19 = vsel %vm3666_vm4, %v3599_v37, %v3691_v4  ;;  %vm4151_vm4 = vcmask 80896  }
 0x4b5   : > { %v3706_v48 = vsel %vm3665_vm5, %v3594_v39, %v3690_v38 }
 0x4b6   : > { %4586 = vmatprep.mubr.msk.f32.mxu1 %vm3735_vm3, %v3706_v48 }
 0x4b7   : > { %v4551_v25 = vpop.f32.mrb[92].mxu1  ;;  %4587 = vmatmul.mubr.msk.f32.gmra.mrb[106].mxu1 %vm3735_vm3, %v3707_v19 }
 0x4b8   : > { %v3609_v24 = vadd.f32 %v4551_v25, %v7792_v16  ;;  %v3603_v42 = vpop.f32.mrb[93].mxu1 }
 0x4b9   : > { %v3604_v21 = vadd.f32 %v7792_v16, %v3603_v42 }
 0x4ba   : > { %v3693_v51 = vmul.f32 %v7795_v35, %v3609_v24  ;;  %vm3668_vm6 = vcmp.ge.f32.partialorder %v3609_v24, 0.0 }
 0x4bb   : > { %vm3667_vm7 = vcmp.ge.f32.partialorder %v3604_v21, 0.0  ;;  %v3692_v31 = vmul.f32 %v7795_v35, %v3604_v21 }
 0x4bc   : > { %v3709_v63 = vsel %vm3668_vm6, %v3609_v24, %v3693_v51 }
 0x4bd   : > { %v3708_v44 = vsel %vm3667_vm7, %v3604_v21, %v3692_v31 }
 0x4be   : > { %4589 = vmatprep.mubr.msk.f32.mxu1 %vm3735_vm3, %v3708_v44 }
 0x4bf   : > { %v4554_v0 = vpop.f32.mrb[94].mxu1  ;;  %4590 = vmatmul.mubr.msk.f32.gmra.mrb[108].mxu1 %vm3735_vm3, %v3709_v63 }
 0x4c0   : > { %v3619_v15 = vadd.f32 %v4554_v0, %v7792_v16  ;;  %v3613_v53 = vpop.f32.mrb[95].mxu1 }
 0x4c1   : > { %v3614_v56 = vadd.f32 %v7792_v16, %v3613_v53 }
 0x4c2   : > { %v3695_v58 = vmul.f32 %v7795_v35, %v3619_v15  ;;  %vm3670_vm8 = vcmp.ge.f32.partialorder %v3619_v15, 0.0 }
 0x4c3   : > { %vm3669_vm9 = vcmp.ge.f32.partialorder %v3614_v56, 0.0  ;;  %v3694_v27 = vmul.f32 %v7795_v35, %v3614_v56 }
 0x4c4   : > { %v3711_v59 = vsel %vm3670_vm8, %v3619_v15, %v3695_v58 }
 0x4c5   : > { %v3710_v36 = vsel %vm3669_vm9, %v3614_v56, %v3694_v27 }
 0x4c6   : > { %4592 = vmatprep.mubr.msk.f32.mxu1 %vm3735_vm3, %v3710_v36 }
 0x4c7   : > { %v4557_v40 = vpop.f32.mrb[96].mxu1  ;;  %4593 = vmatmul.mubr.msk.f32.gmra.mrb[110].mxu1 %vm3735_vm3, %v3711_v59 }
 0x4c8   : > { %v3629_v5 = vadd.f32 %v4557_v40, %v7792_v16  ;;  %v3623_v6 = vpop.f32.mrb[97].mxu1 }
 0x4c9   : > { %v3624_v32 = vadd.f32 %v7792_v16, %v3623_v6  ;;  %v4338_v6 = vld [vmem:[%s7964_s16] ss:$0 sm:$0xff] }
 0x4ca   : > { %v3697_v26 = vmul.f32 %v7795_v35, %v3629_v5  ;;  %vm3672_vm10 = vcmp.ge.f32.partialorder %v3629_v5, 0.0 }
 0x4cb   : > { %vm3671_vm11 = vcmp.ge.f32.partialorder %v3624_v32, 0.0  ;;  %v3696_v9 = vmul.f32 %v7795_v35, %v3624_v32 }
 0x4cc   : > { %v3713_v30 = vsel %vm3672_vm10, %v3629_v5, %v3697_v26 }
 0x4cd   : > { %v3712_v10 = vsel %vm3671_vm11, %v3624_v32, %v3696_v9 }
 0x4ce   : > { %4595 = vmatprep.mubr.msk.f32.mxu1 %vm3735_vm3, %v3712_v10 }
 0x4cf   : > { %v4560_v34 = vpop.f32.mrb[98].mxu1  ;;  %4596 = vmatmul.mubr.msk.f32.gmra.mrb[112].mxu1 %vm3735_vm3, %v3713_v30 }
 0x4d0   : > { %v3639_v23 = vadd.f32 %v4560_v34, %v7792_v16  ;;  %v3633_v7 = vpop.f32.mrb[99].mxu1 }
 0x4d1   : > { %v3634_v13 = vadd.f32 %v7792_v16, %v3633_v7 }
 0x4d2   : > { %v3699_v20 = vmul.f32 %v7795_v35, %v3639_v23  ;;  %vm3674_vm12 = vcmp.ge.f32.partialorder %v3639_v23, 0.0 }
 0x4d3   : > { %vm3673_vm13 = vcmp.ge.f32.partialorder %v3634_v13, 0.0  ;;  %v3698_v61 = vmul.f32 %v7795_v35, %v3634_v13 }
 0x4d4   : > { %v3715_v49 = vsel %vm3674_vm12, %v3639_v23, %v3699_v20 }
 0x4d5   : > { %v3714_v45 = vsel %vm3673_vm13, %v3634_v13, %v3698_v61 }
 0x4d6   : > { %4598 = vmatprep.mubr.msk.f32.mxu1 %vm3735_vm3, %v3714_v45 }
 0x4d7   : > { %v4563_v1 = vpop.f32.mrb[100].mxu1  ;;  %4599 = vmatmul.mubr.msk.f32.gmra.mrb[114].mxu1 %vm3735_vm3, %v3715_v49 }
 0x4d8   : > { %v3649_v22 = vadd.f32 %v4563_v1, %v7792_v16  ;;  %v3643_v52 = vpop.f32.mrb[101].mxu1 }
 0x4d9   : > { %v3644_v60 = vadd.f32 %v7792_v16, %v3643_v52 }
 0x4da   : > { %v3701_v43 = vmul.f32 %v7795_v35, %v3649_v22  ;;  %vm3676_vm14 = vcmp.ge.f32.partialorder %v3649_v22, 0.0 }
 0x4db   : > { %vm3675_vm15 = vcmp.ge.f32.partialorder %v3644_v60, 0.0  ;;  %v3700_v12 = vmul.f32 %v7795_v35, %v3644_v60 }
 0x4dc   : > { %v3717_v50 = vsel %vm3676_vm14, %v3649_v22, %v3701_v43 }
 0x4dd   : > { %v3716_v28 = vsel %vm3675_vm15, %v3644_v60, %v3700_v12 }
 0x4de   : > { %4601 = vmatprep.mubr.msk.f32.mxu1 %vm3735_vm3, %v3716_v28 }
 0x4df   : > { %v4566_v54 = vpop.f32.mrb[102].mxu1  ;;  %4602 = vmatmul.mubr.msk.f32.gmra.mrb[116].mxu1 %vm3735_vm3, %v3717_v50 }
 0x4e0   : > { %v3659_v14 = vadd.f32 %v4566_v54, %v7792_v16  ;;  %v3653_v11 = vpop.f32.mrb[103].mxu1 }
 0x4e1   : > { %v3654_v3 = vadd.f32 %v7792_v16, %v3653_v11  ;;  %v4321_v16 = vld [vmem:[%s7962_s14] ss:$0 sm:$0xff] }
 0x4e2   : > { %v3703_v17 = vmul.f32 %v7795_v35, %v3659_v14  ;;  %vm3678_vm0 = vcmp.ge.f32.partialorder %v3659_v14, 0.0 }
 0x4e3   : > { %vm3677_vm1 = vcmp.ge.f32.partialorder %v3654_v3, 0.0  ;;  %v3702_v8 = vmul.f32 %v7795_v35, %v3654_v3 }
 0x4e4   : > { %v3719_v18 = vsel %vm3678_vm0, %v3659_v14, %v3703_v17 }
 0x4e5   : > { %v3718_v57 = vsel %vm3677_vm1, %v3654_v3, %v3702_v8 }
 0x4e6   : > { %4604 = vmatprep.mubr.msk.f32.mxu1 %vm3735_vm3, %v3718_v57 }
 0x4e7   : > { %4605 = vmatmul.mubr.msk.f32.gmra.mrb[118].mxu1 %vm3735_vm3, %v3719_v18  ;;  %vm3929_vm3 = vcmask 15360  }
 0x582   : > { %v4585_v35 = vpop.f32.mrb[104].mxu1 }
 0x583   : > { %v3856_v55 = vadd.f32 %v4585_v35, %v4321_v16  ;;  %v3850_v33 = vpop.f32.mrb[105].mxu1 }
 0x584   : > { %v3851_v41 = vadd.f32 %v4321_v16, %v3850_v33 }
 0x585   : > { %3931 = vst.msk [vmem:[%s7856_s27 + $0x8] sm:$0xff] %vm3929_vm3, %v3856_v55 }
 0x586   : > { %3930 = vst.msk [vmem:[%s7856_s27] sm:$0xff] %vm3929_vm3, %v3851_v41  ;;  %4609 = vmatprep.mubr.msk.f32.mxu0 %vm3929_vm3, %v3851_v41 }
 0x587   : > { %4610 = vmatmul.mubr.msk.f32.vlgmr.msra.gmra.mrb[72].mxu0 %vm3929_vm3, %v3856_v55 }
 0x58a   : > { %v4588_v2 = vpop.f32.mrb[106].mxu1 }
 0x58b   : > { %v3866_v46 = vadd.f32 %v4588_v2, %v4321_v16  ;;  %v3860_v29 = vpop.f32.mrb[107].mxu1 }
 0x58c   : > { %v3861_v37 = vadd.f32 %v4321_v16, %v3860_v29 }
 0x58d   : > { %3933 = vst.msk [vmem:[%s7856_s27 + $0x18] sm:$0xff] %vm3929_vm3, %v3866_v46 }
 0x58e   : > { %3932 = vst.msk [vmem:[%s7856_s27 + $0x10] sm:$0xff] %vm3929_vm3, %v3861_v37  ;;  %4612 = vmatprep.mubr.msk.f32.mxu0 %vm3929_vm3, %v3861_v37 }
 0x58f   : > { %4613 = vmatmul.mubr.msk.f32.gmra.mrb[74].mxu0 %vm3929_vm3, %v3866_v46 }
 0x592   : > { %v4591_v62 = vpop.f32.mrb[108].mxu1 }
 0x593   : > { %v3876_v39 = vadd.f32 %v4591_v62, %v4321_v16  ;;  %v3870_v4 = vpop.f32.mrb[109].mxu1 }
 0x594   : > { %v3871_v38 = vadd.f32 %v4321_v16, %v3870_v4 }
 0x595   : > { %3935 = vst.msk [vmem:[%s7856_s27 + $0x28] sm:$0xff] %vm3929_vm3, %v3876_v39 }
 0x596   : > { %3934 = vst.msk [vmem:[%s7856_s27 + $0x20] sm:$0xff] %vm3929_vm3, %v3871_v38  ;;  %4615 = vmatprep.mubr.msk.f32.mxu0 %vm3929_vm3, %v3871_v38 }
 0x597   : > { %4616 = vmatmul.mubr.msk.f32.gmra.mrb[76].mxu0 %vm3929_vm3, %v3876_v39 }
 0x59a   : > { %v4594_v48 = vpop.f32.mrb[110].mxu1 }
 0x59b   : > { %v3886_v19 = vadd.f32 %v4594_v48, %v4321_v16  ;;  %v3880_v25 = vpop.f32.mrb[111].mxu1 }
 0x59c   : > { %v3881_v24 = vadd.f32 %v4321_v16, %v3880_v25 }
 0x59d   : > { %3937 = vst.msk [vmem:[%s7856_s27 + $0x38] sm:$0xff] %vm3929_vm3, %v3886_v19 }
 0x59e   : > { %3936 = vst.msk [vmem:[%s7856_s27 + $0x30] sm:$0xff] %vm3929_vm3, %v3881_v24  ;;  %4618 = vmatprep.mubr.msk.f32.mxu0 %vm3929_vm3, %v3881_v24 }
 0x59f   : > { %4619 = vmatmul.mubr.msk.f32.gmra.mrb[78].mxu0 %vm3929_vm3, %v3886_v19 }
 0x5a2   : > { %v4597_v42 = vpop.f32.mrb[112].mxu1 }
 0x5a3   : > { %v3896_v21 = vadd.f32 %v4597_v42, %v4321_v16  ;;  %v3890_v51 = vpop.f32.mrb[113].mxu1 }
 0x5a4   : > { %v3891_v31 = vadd.f32 %v4321_v16, %v3890_v51 }
 0x5a5   : > { %3939 = vst.msk [vmem:[%s7856_s27 + $0x48] sm:$0xff] %vm3929_vm3, %v3896_v21 }
 0x5a6   : > { %3938 = vst.msk [vmem:[%s7856_s27 + $0x40] sm:$0xff] %vm3929_vm3, %v3891_v31  ;;  %4621 = vmatprep.mubr.msk.f32.mxu0 %vm3929_vm3, %v3891_v31 }
 0x5a7   : > { %4622 = vmatmul.mubr.msk.f32.gmra.mrb[80].mxu0 %vm3929_vm3, %v3896_v21 }
 0x5aa   : > { %v4600_v44 = vpop.f32.mrb[114].mxu1 }
 0x5ab   : > { %v3906_v63 = vadd.f32 %v4600_v44, %v4321_v16  ;;  %v3900_v0 = vpop.f32.mrb[115].mxu1 }
 0x5ac   : > { %v3901_v15 = vadd.f32 %v4321_v16, %v3900_v0 }
 0x5ad   : > { %3941 = vst.msk [vmem:[%s7856_s27 + $0x58] sm:$0xff] %vm3929_vm3, %v3906_v63 }
 0x5ae   : > { %3940 = vst.msk [vmem:[%s7856_s27 + $0x50] sm:$0xff] %vm3929_vm3, %v3901_v15  ;;  %4624 = vmatprep.mubr.msk.f32.mxu0 %vm3929_vm3, %v3901_v15 }
 0x5af   : > { %4625 = vmatmul.mubr.msk.f32.gmra.mrb[82].mxu0 %vm3929_vm3, %v3906_v63 }
 0x5b2   : > { %v4603_v53 = vpop.f32.mrb[116].mxu1 }
 0x5b3   : > { %v3916_v56 = vadd.f32 %v4603_v53, %v4321_v16  ;;  %v3910_v58 = vpop.f32.mrb[117].mxu1 }
 0x5b4   : > { %v3911_v27 = vadd.f32 %v4321_v16, %v3910_v58 }
 0x5b5   : > { %3943 = vst.msk [vmem:[%s7856_s27 + $0x68] sm:$0xff] %vm3929_vm3, %v3916_v56 }
 0x5b6   : > { %3942 = vst.msk [vmem:[%s7856_s27 + $0x60] sm:$0xff] %vm3929_vm3, %v3911_v27  ;;  %4627 = vmatprep.mubr.msk.f32.mxu0 %vm3929_vm3, %v3911_v27 }
 0x5b7   : > { %4628 = vmatmul.mubr.msk.f32.gmra.mrb[84].mxu0 %vm3929_vm3, %v3916_v56 }
 0x5ba   : > { %v4606_v36 = vpop.f32.mrb[118].mxu1 }
 0x5bb   : > { %v3926_v59 = vadd.f32 %v4606_v36, %v4321_v16  ;;  %v3920_v40 = vpop.f32.mrb[119].mxu1 }
 0x5bc   : > { %v3921_v5 = vadd.f32 %v4321_v16, %v3920_v40 }
 0x5bd   : > { %3945 = vst.msk [vmem:[%s7856_s27 + $0x78] sm:$0xff] %vm3929_vm3, %v3926_v59 }
 0x5be   : > { %3944 = vst.msk [vmem:[%s7856_s27 + $0x70] sm:$0xff] %vm3929_vm3, %v3921_v5  ;;  %4630 = vmatprep.mubr.msk.f32.mxu0 %vm3929_vm3, %v3921_v5 }
 0x5bf   : > { %4631 = vmatmul.mubr.msk.f32.gmra.mrb[86].mxu0 %vm3929_vm3, %v3926_v59 }
 0x65a   : > { %v4611_v32 = vpop.f32.mrb[72].mxu0 }
 0x65b   : > { %v4078_v26 = vadd.f32 %v4611_v32, %v4338_v6  ;;  %v4072_v9 = vpop.f32.mrb[73].mxu0 }
 0x65c   : > { %v4073_v10 = vadd.f32 %v4338_v6, %v4072_v9 }
 0x65d   : > { %4153 = vst.msk [vmem:[%s7914_s19 + $0x8] sm:$0xff] %vm4151_vm4, %v4078_v26 }
 0x65e   : > { %4152 = vst.msk [vmem:[%s7914_s19] sm:$0xff] %vm4151_vm4, %v4073_v10 }
 0x662   : > { %v4614_v30 = vpop.f32.mrb[74].mxu0 }
 0x663   : > { %v4088_v34 = vadd.f32 %v4614_v30, %v4338_v6  ;;  %v4082_v23 = vpop.f32.mrb[75].mxu0 }
 0x664   : > { %v4083_v7 = vadd.f32 %v4338_v6, %v4082_v23 }
 0x665   : > { %4155 = vst.msk [vmem:[%s7914_s19 + $0x18] sm:$0xff] %vm4151_vm4, %v4088_v34 }
 0x666   : > { %4154 = vst.msk [vmem:[%s7914_s19 + $0x10] sm:$0xff] %vm4151_vm4, %v4083_v7 }
 0x66a   : > { %v4617_v13 = vpop.f32.mrb[76].mxu0 }
 0x66b   : > { %v4098_v20 = vadd.f32 %v4617_v13, %v4338_v6  ;;  %v4092_v61 = vpop.f32.mrb[77].mxu0 }
 0x66c   : > { %v4093_v45 = vadd.f32 %v4338_v6, %v4092_v61 }
 0x66d   : > { %4157 = vst.msk [vmem:[%s7914_s19 + $0x28] sm:$0xff] %vm4151_vm4, %v4098_v20 }
 0x66e   : > { %4156 = vst.msk [vmem:[%s7914_s19 + $0x20] sm:$0xff] %vm4151_vm4, %v4093_v45 }
 0x672   : > { %v4620_v49 = vpop.f32.mrb[78].mxu0 }
 0x673   : > { %v4108_v1 = vadd.f32 %v4620_v49, %v4338_v6  ;;  %v4102_v22 = vpop.f32.mrb[79].mxu0 }
 0x674   : > { %v4103_v52 = vadd.f32 %v4338_v6, %v4102_v22 }
 0x675   : > { %4159 = vst.msk [vmem:[%s7914_s19 + $0x38] sm:$0xff] %vm4151_vm4, %v4108_v1 }
 0x676   : > { %4158 = vst.msk [vmem:[%s7914_s19 + $0x30] sm:$0xff] %vm4151_vm4, %v4103_v52 }
 0x67a   : > { %v4623_v60 = vpop.f32.mrb[80].mxu0 }
 0x67b   : > { %v4118_v43 = vadd.f32 %v4623_v60, %v4338_v6  ;;  %v4112_v12 = vpop.f32.mrb[81].mxu0 }
 0x67c   : > { %v4113_v28 = vadd.f32 %v4338_v6, %v4112_v12 }
 0x67d   : > { %4161 = vst.msk [vmem:[%s7914_s19 + $0x48] sm:$0xff] %vm4151_vm4, %v4118_v43 }
 0x67e   : > { %4160 = vst.msk [vmem:[%s7914_s19 + $0x40] sm:$0xff] %vm4151_vm4, %v4113_v28 }
 0x682   : > { %v4626_v50 = vpop.f32.mrb[82].mxu0 }
 0x683   : > { %v4128_v54 = vadd.f32 %v4626_v50, %v4338_v6  ;;  %v4122_v14 = vpop.f32.mrb[83].mxu0 }
 0x684   : > { %v4123_v11 = vadd.f32 %v4338_v6, %v4122_v14 }
 0x685   : > { %4163 = vst.msk [vmem:[%s7914_s19 + $0x58] sm:$0xff] %vm4151_vm4, %v4128_v54 }
 0x686   : > { %4162 = vst.msk [vmem:[%s7914_s19 + $0x50] sm:$0xff] %vm4151_vm4, %v4123_v11 }
 0x68a   : > { %v4629_v3 = vpop.f32.mrb[84].mxu0 }
 0x68b   : > { %v4138_v17 = vadd.f32 %v4629_v3, %v4338_v6  ;;  %v4132_v8 = vpop.f32.mrb[85].mxu0 }
 0x68c   : > { %v4133_v57 = vadd.f32 %v4338_v6, %v4132_v8 }
 0x68d   : > { %4165 = vst.msk [vmem:[%s7914_s19 + $0x68] sm:$0xff] %vm4151_vm4, %v4138_v17 }
 0x68e   : > { %4164 = vst.msk [vmem:[%s7914_s19 + $0x60] sm:$0xff] %vm4151_vm4, %v4133_v57 }
 0x692   : > { %v4632_v18 = vpop.f32.mrb[86].mxu0 }
 0x693   : > { %v4148_v47 = vadd.f32 %v4632_v18, %v4338_v6  ;;  %v4142_v16 = vpop.f32.mrb[87].mxu0 }
 0x694   : > { %v4143_v35 = vadd.f32 %v4338_v6, %v4142_v16 }
 0x695   : > { %4167 = vst.msk [vmem:[%s7914_s19 + $0x78] sm:$0xff] %vm4151_vm4, %v4148_v47 }
 0x696   : > { %4166 = vst.msk [vmem:[%s7914_s19 + $0x70] sm:$0xff] %vm4151_vm4, %v4143_v35 }
 0x697 PF: > { %s38_s21 = sadd.s32 1, %s5649_s21  }
 0x698   : > { %p35_p3 = scmp.ge.s32.totalorder %s38_s21, 4  }
 0x69a   :  { %37 = sbr.rel (!%p35_p3) target bundleno = 5 (0x5), region = 135 }
 0x6a1   :  { %4207 = vsyncpa [#allocation7], 1 }
 0x6a2   :  { %4209 = vsyncpa [#allocation7 + $0x1], 1 }

</bundles_post_ra>
